<compile_context>
chip_gen: v7x
topology: tpu7x:2x2x1
jax: 0.10.0
libtpu: 0.0.40
codegen_flags: <defaults>
</compile_context>

<pallas_src>
import functools

import jax
import jax.numpy as jnp
from jax import lax
from jax.experimental import pallas as pl
from jax.experimental.pallas import tpu as pltpu


@functools.lru_cache(maxsize=None)
def _vmem_limit_bytes():
    # v5e/v6e: 128 MiB physical VMEM -> up to 96 MiB scoped.
    # v7x:      64 MiB physical VMEM -> ~48 MiB scoped.
    cap = None
    try:
        info = pltpu.get_tpu_info()
        cap = int(getattr(info, "vmem_capacity_bytes"))
    except Exception:
        cap = None
    if cap is None:
        return 48 * 1024 * 1024          # conservative fallback, safe everywhere
    return int(min(96 * 1024 * 1024, cap * 3 // 4))


def _pick_tile(dim, candidates):
    for c in candidates:
        if dim % c == 0:
            return c
    return dim


# ----------------------------------------------------------------------------
# Pallas kernel 1: tiled MXU matmul (bf16 operands, f32 accumulation) used for
# all nn.Linear projections and the time-maa LoRA.
# ----------------------------------------------------------------------------
def _matmul_kernel(x_ref, w_ref, o_ref, acc_ref):
    @pl.when(pl.program_id(2) == 0)
    def _():
        acc_ref[...] = jnp.zeros_like(acc_ref)

    acc_ref[...] += jnp.dot(x_ref[...], w_ref[...],
                            preferred_element_type=jnp.float32)

    @pl.when(pl.program_id(2) == pl.num_programs(2) - 1)
    def _():
        o_ref[...] = acc_ref[...].astype(o_ref.dtype)


def pallas_matmul(x, w, out_dtype=jnp.float32):
    """(M, K) @ (K, N) -> (M, N) in out_dtype.  bf16 MXU operands, f32 accum.

    Operands are only cast if not already bf16; feed bf16 activations from the
    upstream fused kernels so no extra HBM cast pass is emitted."""
    M, K = x.shape
    K2, N = w.shape
    assert K == K2
    xb = x if x.dtype == jnp.bfloat16 else x.astype(jnp.bfloat16)
    wb = w if w.dtype == jnp.bfloat16 else w.astype(jnp.bfloat16)
    tm = _pick_tile(M, (512, 256, 128))
    tn = _pick_tile(N, (512, 256, 128))
    tk = _pick_tile(K, (1024, 512, 256, 128))
    return pl.pallas_call(
        _matmul_kernel,
        out_shape=jax.ShapeDtypeStruct((M, N), out_dtype),
        grid_spec=pltpu.PrefetchScalarGridSpec(
            num_scalar_prefetch=0,
            grid=(M // tm, N // tn, K // tk),
            in_specs=[pl.BlockSpec((tm, tk), lambda i, j, k: (i, k)),
                      pl.BlockSpec((tk, tn), lambda i, j, k: (k, j))],
            out_specs=pl.BlockSpec((tm, tn), lambda i, j, k: (i, j)),
            scratch_shapes=[pltpu.VMEM((tm, tn), jnp.float32)]),
        compiler_params=pltpu.CompilerParams(
            dimension_semantics=("parallel", "parallel", "arbitrary"),
            vmem_limit_bytes=_vmem_limit_bytes()),
    )(xb, wb)


# ----------------------------------------------------------------------------
# Pallas kernel 2: fused token-shift mixes.
# One HBM pass produces xw/xk/xv/xr/xg = x + xx*(maa_* + m_*) in bf16.
# ----------------------------------------------------------------------------
def _mix5_kernel(x_ref, xx_ref, maa_ref, m_ref,
                 xw_ref, xk_ref, xv_ref, xr_ref, xg_ref):
    x = x_ref[...].astype(jnp.float32)
    xx = xx_ref[...].astype(jnp.float32)
    outs = (xw_ref, xk_ref, xv_ref, xr_ref, xg_ref)
    for s in range(5):
        mix = maa_ref[s:s + 1, :] + m_ref[s]          # (1,C) + (tm,C)
        outs[s][...] = (x + xx * mix).astype(outs[s].dtype)


def token_shift_mix_pallas(x2d, xx2d, maa_stack, mixes, out_dtype=jnp.bfloat16):
    """x2d/xx2d: (M,C) f32; maa_stack: (5,C) f32; mixes: (5,M,C) f32.
    Returns (xw, xk, xv, xr, xg), each (M,C) out_dtype."""
    M, C = x2d.shape
    tm = _pick_tile(M, (512, 256, 128))
    shp = jax.ShapeDtypeStruct((M, C), out_dtype)
    blk = pl.BlockSpec((tm, C), lambda i: (i, 0))
    return pl.pallas_call(
        _mix5_kernel,
        out_shape=(shp,) * 5,
        grid_spec=pltpu.PrefetchScalarGridSpec(
            num_scalar_prefetch=0,
            grid=(M // tm,),
            in_specs=[blk, blk,
                      pl.BlockSpec((5, C), lambda i: (0, 0)),
                      pl.BlockSpec((5, tm, C), lambda i: (0, i, 0))],
            out_specs=[blk] * 5),
        compiler_params=pltpu.CompilerParams(
            dimension_semantics=("parallel",),
            vmem_limit_bytes=_vmem_limit_bytes()),
    )(x2d, xx2d, maa_stack, mixes)


# ----------------------------------------------------------------------------
# Pallas kernel 3: fused decay LoRA producing ld = -exp(w) directly.
# ld = -exp(time_decay + tanh(xw @ w1) @ w2); the 64-wide intermediate never
# leaves VMEM, output is lane-dense (A multiple of 128), and the exp moves out
# of the EUP-bound WKV kernel into this mem-bound pass.
# ----------------------------------------------------------------------------
def _decay_ld_kernel(xw_ref, w1_ref, w2_ref, td_ref, o_ref):
    h = jnp.tanh(jnp.dot(xw_ref[...], w1_ref[...],
                         preferred_element_type=jnp.float32))
    ww = jnp.dot(h.astype(jnp.bfloat16), w2_ref[...],
                 preferred_element_type=jnp.float32)
    o_ref[...] = -jnp.exp(td_ref[...] + ww)


def decay_ld_pallas(xw2d, w1, w2, time_decay):
    M, C = xw2d.shape
    Dd, A = w2.shape
    tm = _pick_tile(M, (512, 256, 128))
    xwb = xw2d if xw2d.dtype == jnp.bfloat16 else xw2d.astype(jnp.bfloat16)
    return pl.pallas_call(
        _decay_ld_kernel,
        out_shape=jax.ShapeDtypeStruct((M, A), jnp.float32),
        grid_spec=pltpu.PrefetchScalarGridSpec(
            num_scalar_prefetch=0,
            grid=(M // tm,),
            in_specs=[pl.BlockSpec((tm, C), lambda i: (i, 0)),
                      pl.BlockSpec((C, Dd), lambda i: (0, 0)),
                      pl.BlockSpec((Dd, A), lambda i: (0, 0)),
                      pl.BlockSpec((1, A), lambda i: (0, 0))],
            out_specs=pl.BlockSpec((tm, A), lambda i: (i, 0))),
        compiler_params=pltpu.CompilerParams(
            dimension_semantics=("parallel",),
            vmem_limit_bytes=_vmem_limit_bytes()),
    )(xwb, w1.astype(jnp.bfloat16), w2.astype(jnp.bfloat16),
      time_decay.reshape(1, A).astype(jnp.float32))


# ----------------------------------------------------------------------------
# Pallas kernel 4: WKV6 with initial state (the wkv6state CUDA kernel).
#
# Sequential recurrence (per head, per batch), with ld = -exp(w) precomputed:
#   y_t[j]   = sum_i r_t[i] * (u[i] k_t[i] v_t[j] + S_{t-1}[i, j])
#   S_t[i,j] = exp(ld_t[i]) * S_{t-1}[i, j] + k_t[i] v_t[j]
#
# Layout: r/k/v (B, T, C=H*N) bf16, ld (B, T, C) f32, u (1, C) f32, initial
# state s_t (H, N, N) f32 stored TRANSPOSED (St[j, i]) so the per-sub-chunk
# decay broadcasts along lanes for free.  Grid = (B, T // block_len); 32-token
# sub-chunks and all heads are handled inside; the per-head state is carried
# in a (H, N, N) f32 VMEM scratch.
# ----------------------------------------------------------------------------
def _wkv6_kernel(r_ref, k_ref, v_ref, ld_ref, u_ref, s0_ref, y_ref, st,
                 *, n_head, head_size, sub_len):
    c = pl.program_id(1)

    @pl.when(c == 0)
    def _():
        st[...] = s0_ref[...]            # (H, N, N) f32, transposed state St[j, i]

    H, N, Cs = n_head, head_size, sub_len
    blk_t = r_ref.shape[1]
    nsub = blk_t // Cs

    row = lax.broadcasted_iota(jnp.int32, (Cs, Cs), 0)
    col = lax.broadcasted_iota(jnp.int32, (Cs, Cs), 1)
    tri = (row >= col).astype(jnp.float32)   # lower-triangular (inclusive)

    u = u_ref[...].astype(jnp.float32)       # (1, C)

    for s in range(nsub):                    # static unroll: sub-chunks in time
        t0, t1 = s * Cs, (s + 1) * Cs

        # ---- decay math hoisted to full C = H*N width (full 128-lane vregs) --
        ld = ld_ref[0, t0:t1, :]                         # (Cs, C) f32, ld <= 0
        r_f = r_ref[0, t0:t1, :].astype(jnp.float32)     # (Cs, C)
        k_f = k_ref[0, t0:t1, :].astype(jnp.float32)     # (Cs, C)
        v_b = v_ref[0, t0:t1, :]                         # (Cs, C) bf16

        cum_incl = jnp.dot(tri, ld, preferred_element_type=jnp.float32)
        cum_excl = cum_incl - ld
        # NOTE: exp(-cum_incl) exposure is bounded by Cs*|ld|; safe for the
        # RWKV decay init range with Cs=32.
        e_neg = jnp.exp(-cum_incl)                                     # (Cs, C)
        d_tot = pl.reciprocal(e_neg[Cs - 1:Cs, :], approx=True)        # exp(sum ld)

        rq = (r_f * jnp.exp(cum_excl)).astype(jnp.bfloat16)   # r_t * prod_{m<t} d_m
        kq_f = k_f * e_neg                                    # k_s / prod_{m<=s} d_m
        kq = kq_f.astype(jnp.bfloat16)
        kq2 = (kq_f * d_tot).astype(jnp.bfloat16)             # k_s * prod_{m>s} d_m
        bonus = r_f * u * k_f                                 # (Cs, C)

        # ---- per-head MXU work only; y stored straight into the output block.
        for h in range(H):   # TODO(synk): lax.fori_loop(..., unroll=4) for large H
            c0, c1 = h * N, (h + 1) * N
            rq_h = rq[:, c0:c1]

            # Intra-sub-chunk attention (strictly causal) + u-bonus on the diag.
            A = lax.dot_general(rq_h, kq[:, c0:c1], (((1,), (1,)), ((), ())),
                                preferred_element_type=jnp.float32)     # (Cs, Cs)
            bonus_h = jnp.sum(bonus[:, c0:c1], axis=1, keepdims=True)   # (Cs, 1)
            A = jnp.where(row > col, A, 0.0) + jnp.where(row == col, bonus_h, 0.0)

            v_h = v_b[:, c0:c1]                                         # (Cs, N)
            Sprev = st[h]                                               # (N, N) f32
            y_h = jnp.dot(A.astype(jnp.bfloat16), v_h,
                          preferred_element_type=jnp.float32)           # intra
            y_h = y_h + lax.dot_general(rq_h, Sprev.astype(jnp.bfloat16),
                                        (((1,), (1,)), ((), ())),
                                        preferred_element_type=jnp.float32)
            y_ref[0, t0:t1, c0:c1] = y_h.astype(y_ref.dtype)            # bound live range

            # State update: St_new[j, i] = d_tot[i]*St[j, i] + sum_s v_s[j] kq2_s[i]
            st_add = lax.dot_general(v_h, kq2[:, c0:c1], (((0,), (0,)), ((), ())),
                                     preferred_element_type=jnp.float32)  # (N, N)
            st[h] = d_tot[:, c0:c1] * Sprev + st_add


def wkv6_pallas(r, k, v, ld, u, s_t, block_len=128, sub_len=32):
    """r/k/v: (B, T, H*N) bf16; ld = -exp(w): (B, T, H*N) f32; u: (1, H*N) f32;
    s_t: (H, N, N) f32 transposed initial state St[j, i].  Returns (B, T, H*N) bf16."""
    B, T, C = r.shape
    H, N, N2 = s_t.shape
    assert N == N2 and C == H * N
    block_len = min(block_len, T)
    assert T % block_len == 0, "T must be a multiple of block_len"
    sub_len = min(sub_len, block_len)
    assert block_len % sub_len == 0
    nc = T // block_len

    blk = pl.BlockSpec((1, block_len, C), lambda b, c: (b, c, 0))
    kernel = functools.partial(_wkv6_kernel, n_head=H, head_size=N,
                               sub_len=sub_len)
    # TODO(synk): for B=1 on v7x, add a parallel head-group grid axis so both
    # TensorCores are used.
    return pl.pallas_call(
        kernel,
        out_shape=jax.ShapeDtypeStruct((B, T, C), jnp.bfloat16),
        grid_spec=pltpu.PrefetchScalarGridSpec(
            num_scalar_prefetch=0,
            grid=(B, nc),
            in_specs=[blk, blk, blk, blk,
                      pl.BlockSpec((1, C), lambda b, c: (0, 0)),
                      pl.BlockSpec((H, N, N), lambda b, c: (0, 0, 0))],
            out_specs=blk,
            scratch_shapes=[pltpu.VMEM((H, N, N), jnp.float32)],
        ),
        compiler_params=pltpu.CompilerParams(
            dimension_semantics=("parallel", "arbitrary"),
            vmem_limit_bytes=_vmem_limit_bytes()),
    )(r, k, v, ld, u, s_t)


# ----------------------------------------------------------------------------
# Pallas kernel 5: fused GroupNorm(n_head groups) * silu(gate).
# ----------------------------------------------------------------------------
def _gn_gate_kernel(y_ref, g_ref, lnw_ref, lnb_ref, o_ref,
                    *, n_head, head_size, eps):
    y = y_ref[...].astype(jnp.float32)       # (tm, C)
    g = g_ref[...].astype(jnp.float32)       # (tm, C)
    N = head_size
    parts = []
    for h in range(n_head):
        yh = y[:, h * N:(h + 1) * N]
        mu = jnp.mean(yh, axis=1, keepdims=True)
        d = yh - mu
        var = jnp.mean(d * d, axis=1, keepdims=True)   # two-pass variance
        parts.append(d * lax.rsqrt(var + eps))
    yn = parts[0] if n_head == 1 else jnp.concatenate(parts, axis=1)
    yn = yn * lnw_ref[...] + lnb_ref[...]
    sig = 1.0 / (1.0 + jnp.exp(-g))          # silu(g) = g * sigmoid(g)
    o_ref[...] = (yn * (g * sig)).astype(o_ref.dtype)


def gn_silu_gate_pallas(y, g, ln_w, ln_b, n_head, head_size, eps,
                        out_dtype=jnp.float32):
    M, C = y.shape
    tm = _pick_tile(M, (256, 128))           # modest rows: fits v7x 64 MiB VMEM
    kernel = functools.partial(_gn_gate_kernel, n_head=n_head,
                               head_size=head_size, eps=float(eps))
    return pl.pallas_call(
        kernel,
        out_shape=jax.ShapeDtypeStruct((M, C), out_dtype),
        grid_spec=pltpu.PrefetchScalarGridSpec(
            num_scalar_prefetch=0,
            grid=(M // tm,),
            in_specs=[pl.BlockSpec((tm, C), lambda i: (i, 0)),
                      pl.BlockSpec((tm, C), lambda i: (i, 0)),
                      pl.BlockSpec((1, C), lambda i: (0, 0)),
                      pl.BlockSpec((1, C), lambda i: (0, 0))],
            out_specs=pl.BlockSpec((tm, C), lambda i: (i, 0)),
        ),
        compiler_params=pltpu.CompilerParams(
            dimension_semantics=("parallel",),
            vmem_limit_bytes=_vmem_limit_bytes()),
    )(y, g,
      ln_w.reshape(1, C).astype(jnp.float32),
      ln_b.reshape(1, C).astype(jnp.float32))


# ----------------------------------------------------------------------------
# Pure-JAX sequential reference for the WKV6 recurrence (validation only).
# ----------------------------------------------------------------------------
def wkv6_reference(r, k, v, ld, u, s_t):
    B, T, C = r.shape
    H, N, _ = s_t.shape
    rf = r.astype(jnp.float32).reshape(B, T, H, N)
    kf = k.astype(jnp.float32).reshape(B, T, H, N)
    vf = v.astype(jnp.float32).reshape(B, T, H, N)
    df = jnp.exp(ld.astype(jnp.float32)).reshape(B, T, H, N)
    uf = u.astype(jnp.float32).reshape(1, H, N)
    S0 = jnp.swapaxes(s_t.astype(jnp.float32), -1, -2)   # back to S[i, j]
    S0 = jnp.broadcast_to(S0, (B, H, N, N))

    def step(S, inp):
        rt, kt, vt, dt = inp                              # (B, H, N)
        ruk = jnp.sum(rt * uf * kt, axis=-1, keepdims=True)
        y = ruk * vt + jnp.einsum('bhi,bhij->bhj', rt, S)
        S = S * dt[..., :, None] + kt[..., :, None] * vt[..., None, :]
        return S, y

    xs = tuple(jnp.moveaxis(a, 1, 0) for a in (rf, kf, vf, df))
    _, ys = lax.scan(step, S0, xs)                        # (T, B, H, N)
    return jnp.moveaxis(ys, 0, 1).reshape(B, T, C)


# ----------------------------------------------------------------------------
# Parameter init (shapes follow TimeMix.__init__; random parts deterministic).
# ----------------------------------------------------------------------------
def init_params(key, *, n_embd, dim_att, n_head, head_size, n_layer, layer_id,
                head_size_divisor=8):
    D_MIX_LORA, D_DECAY_LORA = 32, 64
    ks = jax.random.split(key, 10)
    ratio_0_to_1 = layer_id / (n_layer - 1)
    ratio_1_to_almost0 = 1.0 - layer_id / n_layer
    ddd = jnp.arange(n_embd, dtype=jnp.float32) / n_embd

    def maa(p):
        return (1.0 - ddd ** p).reshape(1, 1, n_embd)

    p = {}
    p['time_maa_x'] = maa(ratio_1_to_almost0)
    p['time_maa_w'] = maa(ratio_1_to_almost0)
    p['time_maa_k'] = maa(ratio_1_to_almost0)
    p['time_maa_v'] = (1.0 - (ddd ** ratio_1_to_almost0 + 0.3 * ratio_0_to_1)
                       ).reshape(1, 1, n_embd)
    p['time_maa_r'] = maa(0.5 * ratio_1_to_almost0)
    p['time_maa_g'] = maa(0.5 * ratio_1_to_almost0)
    p['time_maa_w1'] = jax.random.uniform(ks[0], (n_embd, D_MIX_LORA * 5),
                                          minval=-0.01, maxval=0.01)
    p['time_maa_w2'] = jax.random.uniform(ks[1], (5, D_MIX_LORA, n_embd),
                                          minval=-0.01, maxval=0.01)
    n = jnp.arange(dim_att, dtype=jnp.float32)
    p['time_decay'] = (-6.0 + 5.0 * (n / (dim_att - 1)) **
                       (0.7 + 1.3 * ratio_0_to_1)).reshape(1, 1, dim_att)
    p['time_decay_w1'] = jax.random.uniform(ks[2], (n_embd, D_DECAY_LORA),
                                            minval=-0.01, maxval=0.01)
    p['time_decay_w2'] = jax.random.uniform(ks[3], (D_DECAY_LORA, dim_att),
                                            minval=-0.01, maxval=0.01)
    zigzag = ((n + 1.0) % 3.0 - 1.0) * 0.1
    p['time_faaaa'] = (ratio_0_to_1 * (1.0 - n / (dim_att - 1)) + zigzag
                       ).reshape(n_head, head_size)
    # time_state is zeros in __init__; use small random values to exercise the path.
    p['time_state'] = 0.1 * jax.random.normal(ks[4], (n_head, head_size, head_size))

    def lin(k_, fan_in, fan_out):          # stored as (in, out) so y = x @ W
        return jax.random.normal(k_, (fan_in, fan_out)) / jnp.sqrt(fan_in)

    p['w_receptance'] = lin(ks[5], n_embd, dim_att)
    p['w_key'] = lin(ks[6], n_embd, dim_att)
    p['w_value'] = lin(ks[7], n_embd, dim_att)
    p['w_gate'] = lin(ks[8], n_embd, dim_att)
    p['w_output'] = lin(ks[9], dim_att, n_embd)
    p['ln_w'] = jnp.ones((dim_att,), jnp.float32)
    p['ln_b'] = jnp.zeros((dim_att,), jnp.float32)
    p['ln_eps'] = 1e-5 * head_size_divisor ** 2
    p['n_head'] = n_head
    p['head_size'] = head_size
    return p


# ----------------------------------------------------------------------------
# TimeMix forward (semantics of TimeMix.forward_cuda).  `last_state` accepted
# but unused, exactly like forward_cuda.
# ----------------------------------------------------------------------------
def time_mix_forward(params, x, last_state=None, block_len=128, sub_len=32):
    B, T, C = x.shape
    H = params['n_head']
    N = params['head_size']
    A = H * N
    shift_state_out = x[:, -1]

    # time_shift = ZeroPad2d((0, 0, 1, -1)): shifted[t] = x[t-1], shifted[0] = 0
    x_prev = jnp.pad(x, ((0, 0), (1, 0), (0, 0)))[:, :T, :]
    xx = x_prev - x
    x2d = x.reshape(B * T, C)
    xx2d = xx.reshape(B * T, C)

    # time-maa LoRA (D_MIX=32, small): matmul in Pallas, einsum in JAX.
    xxx = (x2d + xx2d * params['time_maa_x'].reshape(1, C)).astype(jnp.bfloat16)
    tmp = jnp.tanh(pallas_matmul(xxx, params['time_maa_w1']))       # (B*T, 160) f32
    D_MIX = params['time_maa_w2'].shape[1]
    mixes = jnp.einsum('bsd,sdc->sbc', tmp.reshape(B * T, 5, D_MIX),
                       params['time_maa_w2'])                       # (5, B*T, C)

    maa_stack = jnp.concatenate(
        [params['time_maa_w'].reshape(1, C), params['time_maa_k'].reshape(1, C),
         params['time_maa_v'].reshape(1, C), params['time_maa_r'].reshape(1, C),
         params['time_maa_g'].reshape(1, C)], axis=0)               # (5, C)

    # One fused HBM pass produces all five bf16 token-shift mixes.
    xw, xk, xv, xr, xg = token_shift_mix_pallas(x2d, xx2d, maa_stack, mixes)

    # Projections: bf16 in, bf16 out (no dtype round trips through HBM).
    r = pallas_matmul(xr, params['w_receptance'], out_dtype=jnp.bfloat16)
    k = pallas_matmul(xk, params['w_key'], out_dtype=jnp.bfloat16)
    v = pallas_matmul(xv, params['w_value'], out_dtype=jnp.bfloat16)
    g = pallas_matmul(xg, params['w_gate'], out_dtype=jnp.bfloat16)

    # Fused decay LoRA: ld = -exp(time_decay + tanh(xw @ w1) @ w2)  (f32).
    ld = decay_ld_pallas(xw, params['time_decay_w1'], params['time_decay_w2'],
                         params['time_decay'])                      # (B*T, A)

    u = params['time_faaaa'].reshape(1, A).astype(jnp.float32)
    s_t = jnp.swapaxes(params['time_state'], -1, -2).astype(jnp.float32)  # St[j, i]

    # WKV6 core: keep (B, T, H*N) layout; no head transposes in HBM.
    y = wkv6_pallas(r.reshape(B, T, A), k.reshape(B, T, A), v.reshape(B, T, A),
                    ld.reshape(B, T, A), u, s_t,
                    block_len=block_len, sub_len=sub_len)           # (B, T, A) bf16

    # Fused GroupNorm(n_head groups, eps = 1e-5 * head_size_divisor**2) * silu(g)
    yn_g = gn_silu_gate_pallas(y.reshape(B * T, A), g,
                               params['ln_w'], params['ln_b'],
                               H, N, params['ln_eps'], out_dtype=jnp.bfloat16)

    out = pallas_matmul(yn_g, params['w_output']).reshape(B, T, C)
    # TODO(synk): backward pass (wkv6state_cuda.backward) is not implemented.
    return out, (shift_state_out, params['time_state'])


# ----------------------------------------------------------------------------
if __name__ == "__main__":
    key = jax.random.PRNGKey(0)
    k_param, k_x, k_r, k_k, k_v, k_w, k_u, k_s, k_g = jax.random.split(key, 9)

    # Small, TimeMix-consistent shapes.
    B, T = 2, 128
    n_embd = dim_att = 128
    head_size = 64                    # RWKV_HEAD_SIZE_A
    n_head = dim_att // head_size     # 2
    block_len, sub_len = 128, 32

    params = init_params(k_param, n_embd=n_embd, dim_att=dim_att, n_head=n_head,
                         head_size=head_size, n_layer=4, layer_id=1)

    # --- standalone WKV6 kernel validation against a sequential JAX reference ---
    C = dim_att
    rb = (0.5 * jax.random.normal(k_r, (B, T, C))).astype(jnp.bfloat16)
    kb = (0.5 * jax.random.normal(k_k, (B, T, C))).astype(jnp.bfloat16)
    vb = (0.5 * jax.random.normal(k_v, (B, T, C))).astype(jnp.bfloat16)
    wb = jax.random.uniform(k_w, (B, T, C), minval=-4.0, maxval=0.0)
    ldb = (-jnp.exp(wb)).astype(jnp.float32)
    ub = (0.3 * jax.random.normal(k_u, (1, C))).astype(jnp.float32)
    sb = (0.1 * jax.random.normal(k_s, (n_head, head_size, head_size))
          ).astype(jnp.float32)

    y_kernel = wkv6_pallas(rb, kb, vb, ldb, ub, sb, block_len, sub_len)
    jax.block_until_ready(y_kernel)
    y_ref = wkv6_reference(rb, kb, vb, ldb, ub, sb)
    err = float(jnp.max(jnp.abs(y_kernel.astype(jnp.float32) - y_ref)))
    scale = float(jnp.max(jnp.abs(y_ref))) + 1e-6
    assert err / scale < 5e-2, f"WKV6 kernel mismatch: err={err}, scale={scale}"

    # --- fused GroupNorm*silu(gate) kernel validation ---
    y_gn_in = y_kernel.reshape(B * T, C)
    g_in = jax.random.normal(k_g, (B * T, C), jnp.float32)
    gn_out = gn_silu_gate_pallas(y_gn_in, g_in, params['ln_w'], params['ln_b'],
                                 n_head, head_size, params['ln_eps'])
    jax.block_until_ready(gn_out)
    yf = y_gn_in.astype(jnp.float32).reshape(B * T, n_head, head_size)
    mu = jnp.mean(yf, axis=-1, keepdims=True)
    var = jnp.var(yf, axis=-1, keepdims=True)
    gn_ref = ((yf - mu) / jnp.sqrt(var + params['ln_eps'])).reshape(B * T, C)
    gn_ref = (gn_ref * params['ln_w'] + params['ln_b']) * jax.nn.silu(g_in)
    gerr = float(jnp.max(jnp.abs(gn_out - gn_ref)))
    gscale = float(jnp.max(jnp.abs(gn_ref))) + 1e-6
    assert gerr / gscale < 1e-2, f"GN kernel mismatch: err={gerr}, scale={gscale}"

    # --- full TimeMix forward ---
    x = jax.random.normal(k_x, (B, T, n_embd), jnp.float32)
    out, (shift_state, wkv_state) = time_mix_forward(params, x, last_state=None,
                                                     block_len=block_len,
                                                     sub_len=sub_len)
    jax.block_until_ready(out)
    assert out.shape == (B, T, n_embd)
    assert bool(jnp.all(jnp.isfinite(out)))

    print("KERNEL_OK")
</pallas_src>

<mosaic_0001>
module attributes {stable_mosaic.version = 11 : i64} {
  func.func @_wkv6_kernel(%arg0: i32, %arg1: i32, %arg2: memref<1x128x128xbf16, #tpu.memory_space<vmem>>, %arg3: memref<1x128x128xbf16, #tpu.memory_space<vmem>>, %arg4: memref<1x128x128xbf16, #tpu.memory_space<vmem>>, %arg5: memref<1x128x128xf32, #tpu.memory_space<vmem>>, %arg6: memref<1x128xf32, #tpu.memory_space<vmem>>, %arg7: memref<2x64x64xf32, #tpu.memory_space<vmem>>, %arg8: memref<1x128x128xbf16, #tpu.memory_space<vmem>>, %arg9: memref<2x64x64xf32, #tpu.memory_space<vmem>>) attributes {dimension_semantics = [#tpu.dimension_semantics<parallel>, #tpu.dimension_semantics<arbitrary>], iteration_bounds = array<i64: 2, 1>, scalar_prefetch = 0 : i64, scratch_operands = 1 : i64, tpu.core_type = #tpu.core_type<tc>, window_params = [{transform_indices = @transform_0, window_bounds = array<i64: 1, 128, 128>}, {transform_indices = @transform_1, window_bounds = array<i64: 1, 128, 128>}, {transform_indices = @transform_2, window_bounds = array<i64: 1, 128, 128>}, {transform_indices = @transform_3, window_bounds = array<i64: 1, 128, 128>}, {pipeline_mode = #tpu.pipeline_mode<synchronous>, transform_indices = @transform_4, window_bounds = array<i64: 1, 128>}, {pipeline_mode = #tpu.pipeline_mode<synchronous>, transform_indices = @transform_5, window_bounds = array<i64: 2, 64, 64>}, {transform_indices = @transform_6, window_bounds = array<i64: 1, 128, 128>}]} {
    %c0_i32 = arith.constant 0 : i32
    %0 = arith.cmpi eq, %arg1, %c0_i32 : i32
    %1 = arith.extui %0 : i1 to i32
    %c0_i32_0 = arith.constant 0 : i32
    %2 = arith.cmpi ne, %1, %c0_i32_0 : i32
    scf.if %2 {
      %c0_181 = arith.constant 0 : index
      %c0_182 = arith.constant 0 : index
      %c0_183 = arith.constant 0 : index
      %409 = vector.load %arg7[%c0_181, %c0_182, %c0_183] : memref<2x64x64xf32, #tpu.memory_space<vmem>>, vector<2x64x64xf32>
      %c0_184 = arith.constant 0 : index
      %c0_185 = arith.constant 0 : index
      %c0_186 = arith.constant 0 : index
      %410 = vector.load %arg9[%c0_184, %c0_185, %c0_186] : memref<2x64x64xf32, #tpu.memory_space<vmem>>, vector<2x64x64xf32>
      tpu.vector_store %arg9[%c0_184, %c0_185, %c0_186], %409 {strides = array<i32>} : memref<2x64x64xf32, #tpu.memory_space<vmem>>, vector<2x64x64xf32>,
    } else {
    }
    %3 = tpu.iota {dimensions = array<i32: 0>} : vector<32x32xi32>
    %4 = tpu.iota {dimensions = array<i32: 1>} : vector<32x32xi32>
    %5 = arith.cmpi sge, %3, %4 : vector<32x32xi32>
    %6 = arith.extui %5 : vector<32x32xi1> to vector<32x32xi32>
    %7 = arith.sitofp %6 : vector<32x32xi32> to vector<32x32xf32>
    %c0 = arith.constant 0 : index
    %c0_1 = arith.constant 0 : index
    %8 = vector.load %arg6[%c0, %c0_1] : memref<1x128xf32, #tpu.memory_space<vmem>>, vector<1x128xf32>
    %c0_2 = arith.constant 0 : index
    %c0_3 = arith.constant 0 : index
    %c0_4 = arith.constant 0 : index
    %9 = vector.load %arg5[%c0_2, %c0_3, %c0_4] : memref<1x128x128xf32, #tpu.memory_space<vmem>>, vector<1x32x128xf32>
    %10 = vector.shape_cast %9 : vector<1x32x128xf32> to vector<32x128xf32>
    %c0_5 = arith.constant 0 : index
    %c0_6 = arith.constant 0 : index
    %c0_7 = arith.constant 0 : index
    %11 = vector.load %arg2[%c0_5, %c0_6, %c0_7] : memref<1x128x128xbf16, #tpu.memory_space<vmem>>, vector<1x32x128xbf16>
    %12 = vector.shape_cast %11 : vector<1x32x128xbf16> to vector<32x128xbf16>
    %13 = arith.extf %12 : vector<32x128xbf16> to vector<32x128xf32>
    %c0_8 = arith.constant 0 : index
    %c0_9 = arith.constant 0 : index
    %c0_10 = arith.constant 0 : index
    %14 = vector.load %arg3[%c0_8, %c0_9, %c0_10] : memref<1x128x128xbf16, #tpu.memory_space<vmem>>, vector<1x32x128xbf16>
    %15 = vector.shape_cast %14 : vector<1x32x128xbf16> to vector<32x128xbf16>
    %16 = arith.extf %15 : vector<32x128xbf16> to vector<32x128xf32>
    %c0_11 = arith.constant 0 : index
    %c0_12 = arith.constant 0 : index
    %c0_13 = arith.constant 0 : index
    %17 = vector.load %arg4[%c0_11, %c0_12, %c0_13] : memref<1x128x128xbf16, #tpu.memory_space<vmem>>, vector<1x32x128xbf16>
    %18 = vector.shape_cast %17 : vector<1x32x128xbf16> to vector<32x128xbf16>
    %cst = arith.constant dense<0.000000e+00> : vector<32x128xf32>
    %19 = tpu.matmul %7, %10, %cst {dimension_numbers = #tpu.dot_dimension_numbers<[1], [0], [0], [1], [0, 0, 1, 1], [], []>} : vector<32x32xf32>, vector<32x128xf32>, vector<32x128xf32> -> vector<32x128xf32>
    %20 = arith.subf %19, %10 : vector<32x128xf32>
    %cst_14 = arith.constant 0.000000e+00 : f32
    %21 = vector.broadcast %cst_14 : f32 to vector<32x128xf32>
    %22 = arith.subf %21, %19 : vector<32x128xf32>
    %23 = math.exp %22 : vector<32x128xf32>
    %24 = vector.extract_strided_slice %23 {offsets = [31, 0], sizes = [1, 128], strides = [1, 1]} : vector<32x128xf32> to vector<1x128xf32>
    %25 = tpu.reciprocal %24 {approx = true} : vector<1x128xf32> -> vector<1x128xf32>
    %26 = math.exp %20 : vector<32x128xf32>
    %27 = arith.mulf %13, %26 : vector<32x128xf32>
    %28 = arith.truncf %27 : vector<32x128xf32> to vector<32x128xbf16>
    %29 = arith.mulf %16, %23 : vector<32x128xf32>
    %30 = arith.truncf %29 : vector<32x128xf32> to vector<32x128xbf16>
    %31 = vector.broadcast %25 : vector<1x128xf32> to vector<32x128xf32>
    %32 = arith.mulf %29, %31 : vector<32x128xf32>
    %33 = arith.truncf %32 : vector<32x128xf32> to vector<32x128xbf16>
    %34 = vector.broadcast %8 : vector<1x128xf32> to vector<32x128xf32>
    %35 = arith.mulf %13, %34 : vector<32x128xf32>
    %36 = arith.mulf %35, %16 : vector<32x128xf32>
    %37 = vector.extract_strided_slice %28 {offsets = [0, 0], sizes = [32, 64], strides = [1, 1]} : vector<32x128xbf16> to vector<32x64xbf16>
    %38 = vector.extract_strided_slice %30 {offsets = [0, 0], sizes = [32, 64], strides = [1, 1]} : vector<32x128xbf16> to vector<32x64xbf16>
    %cst_15 = arith.constant dense<0.000000e+00> : vector<32x32xf32>
    %39 = tpu.matmul %37, %38, %cst_15 {dimension_numbers = #tpu.dot_dimension_numbers<[1], [1], [0], [0], [0, 0, 1, 0], [], []>} : vector<32x64xbf16>, vector<32x64xbf16>, vector<32x32xf32> -> vector<32x32xf32>
    %40 = vector.extract_strided_slice %36 {offsets = [0, 0], sizes = [32, 64], strides = [1, 1]} : vector<32x128xf32> to vector<32x64xf32>
    %cst_16 = arith.constant dense<0.000000e+00> : vector<32xf32>
    %41 = vector.multi_reduction <add>, %40, %cst_16 [1] : vector<32x64xf32> to vector<32xf32>
    %42 = vector.shape_cast %41 : vector<32xf32> to vector<32x1xf32>
    %43 = arith.cmpi sgt, %3, %4 : vector<32x32xi32>
    %cst_17 = arith.constant 0.000000e+00 : f32
    %44 = vector.broadcast %cst_17 : f32 to vector<32x32xf32>
    %45 = arith.select %43, %39, %44 : vector<32x32xi1>, vector<32x32xf32>
    %46 = arith.cmpi eq, %3, %4 : vector<32x32xi32>
    %cst_18 = arith.constant 0.000000e+00 : f32
    %47 = vector.shape_cast %42 : vector<32x1xf32> to vector<32x1xf32>
    %48 = vector.broadcast %47 : vector<32x1xf32> to vector<32x32xf32>
    %49 = vector.broadcast %cst_18 : f32 to vector<32x32xf32>
    %50 = arith.select %46, %48, %49 : vector<32x32xi1>, vector<32x32xf32>
    %51 = arith.addf %45, %50 : vector<32x32xf32>
    %52 = vector.extract_strided_slice %18 {offsets = [0, 0], sizes = [32, 64], strides = [1, 1]} : vector<32x128xbf16> to vector<32x64xbf16>
    %c0_19 = arith.constant 0 : index
    %c0_20 = arith.constant 0 : index
    %c0_21 = arith.constant 0 : index
    %53 = vector.load %arg9[%c0_19, %c0_20, %c0_21] : memref<2x64x64xf32, #tpu.memory_space<vmem>>, vector<1x64x64xf32>
    %54 = vector.shape_cast %53 : vector<1x64x64xf32> to vector<64x64xf32>
    %55 = arith.truncf %51 : vector<32x32xf32> to vector<32x32xbf16>
    %cst_22 = arith.constant dense<0.000000e+00> : vector<32x64xf32>
    %56 = tpu.matmul %55, %52, %cst_22 {dimension_numbers = #tpu.dot_dimension_numbers<[1], [0], [0], [1], [0, 0, 1, 1], [], []>} : vector<32x32xbf16>, vector<32x64xbf16>, vector<32x64xf32> -> vector<32x64xf32>
    %57 = arith.truncf %54 : vector<64x64xf32> to vector<64x64xbf16>
    %cst_23 = arith.constant dense<0.000000e+00> : vector<32x64xf32>
    %58 = tpu.matmul %37, %57, %cst_23 {dimension_numbers = #tpu.dot_dimension_numbers<[1], [1], [0], [0], [0, 0, 1, 0], [], []>} : vector<32x64xbf16>, vector<64x64xbf16>, vector<32x64xf32> -> vector<32x64xf32>
    %59 = arith.addf %56, %58 : vector<32x64xf32>
    %60 = arith.truncf %59 : vector<32x64xf32> to vector<32x64xbf16>
    %c0_24 = arith.constant 0 : index
    %c0_25 = arith.constant 0 : index
    %c0_26 = arith.constant 0 : index
    %61 = vector.load %arg8[%c0_24, %c0_25, %c0_26] : memref<1x128x128xbf16, #tpu.memory_space<vmem>>, vector<1x32x64xbf16>
    %62 = vector.shape_cast %61 : vector<1x32x64xbf16> to vector<32x64xbf16>
    %63 = vector.shape_cast %60 : vector<32x64xbf16> to vector<1x32x64xbf16>
    tpu.vector_store %arg8[%c0_24, %c0_25, %c0_26], %63 {strides = array<i32>} : memref<1x128x128xbf16, #tpu.memory_space<vmem>>, vector<1x32x64xbf16>,
    %64 = vector.extract_strided_slice %33 {offsets = [0, 0], sizes = [32, 64], strides = [1, 1]} : vector<32x128xbf16> to vector<32x64xbf16>
    %cst_27 = arith.constant dense<0.000000e+00> : vector<64x64xf32>
    %65 = tpu.matmul %52, %64, %cst_27 {dimension_numbers = #tpu.dot_dimension_numbers<[0], [0], [1], [1], [0, 1, 1, 1], [], []>} : vector<32x64xbf16>, vector<32x64xbf16>, vector<64x64xf32> -> vector<64x64xf32>
    %66 = vector.extract_strided_slice %25 {offsets = [0, 0], sizes = [1, 64], strides = [1, 1]} : vector<1x128xf32> to vector<1x64xf32>
    %67 = vector.broadcast %66 : vector<1x64xf32> to vector<64x64xf32>
    %68 = arith.mulf %67, %54 : vector<64x64xf32>
    %69 = arith.addf %68, %65 : vector<64x64xf32>
    %c0_28 = arith.constant 0 : index
    %c0_29 = arith.constant 0 : index
    %c0_30 = arith.constant 0 : index
    %70 = vector.load %arg9[%c0_28, %c0_29, %c0_30] : memref<2x64x64xf32, #tpu.memory_space<vmem>>, vector<1x64x64xf32>
    %71 = vector.shape_cast %70 : vector<1x64x64xf32> to vector<64x64xf32>
    %72 = vector.shape_cast %69 : vector<64x64xf32> to vector<1x64x64xf32>
    tpu.vector_store %arg9[%c0_28, %c0_29, %c0_30], %72 {strides = array<i32>} : memref<2x64x64xf32, #tpu.memory_space<vmem>>, vector<1x64x64xf32>,
    %73 = vector.extract_strided_slice %28 {offsets = [0, 64], sizes = [32, 64], strides = [1, 1]} : vector<32x128xbf16> to vector<32x64xbf16>
    %74 = vector.extract_strided_slice %30 {offsets = [0, 64], sizes = [32, 64], strides = [1, 1]} : vector<32x128xbf16> to vector<32x64xbf16>
    %cst_31 = arith.constant dense<0.000000e+00> : vector<32x32xf32>
    %75 = tpu.matmul %73, %74, %cst_31 {dimension_numbers = #tpu.dot_dimension_numbers<[1], [1], [0], [0], [0, 0, 1, 0], [], []>} : vector<32x64xbf16>, vector<32x64xbf16>, vector<32x32xf32> -> vector<32x32xf32>
    %76 = vector.extract_strided_slice %36 {offsets = [0, 64], sizes = [32, 64], strides = [1, 1]} : vector<32x128xf32> to vector<32x64xf32>
    %cst_32 = arith.constant dense<0.000000e+00> : vector<32xf32>
    %77 = vector.multi_reduction <add>, %76, %cst_32 [1] : vector<32x64xf32> to vector<32xf32>
    %78 = vector.shape_cast %77 : vector<32xf32> to vector<32x1xf32>
    %79 = arith.cmpi sgt, %3, %4 : vector<32x32xi32>
    %cst_33 = arith.constant 0.000000e+00 : f32
    %80 = vector.broadcast %cst_33 : f32 to vector<32x32xf32>
    %81 = arith.select %79, %75, %80 : vector<32x32xi1>, vector<32x32xf32>
    %82 = arith.cmpi eq, %3, %4 : vector<32x32xi32>
    %cst_34 = arith.constant 0.000000e+00 : f32
    %83 = vector.shape_cast %78 : vector<32x1xf32> to vector<32x1xf32>
    %84 = vector.broadcast %83 : vector<32x1xf32> to vector<32x32xf32>
    %85 = vector.broadcast %cst_34 : f32 to vector<32x32xf32>
    %86 = arith.select %82, %84, %85 : vector<32x32xi1>, vector<32x32xf32>
    %87 = arith.addf %81, %86 : vector<32x32xf32>
    %88 = vector.extract_strided_slice %18 {offsets = [0, 64], sizes = [32, 64], strides = [1, 1]} : vector<32x128xbf16> to vector<32x64xbf16>
    %c1 = arith.constant 1 : index
    %c0_35 = arith.constant 0 : index
    %c0_36 = arith.constant 0 : index
    %89 = vector.load %arg9[%c1, %c0_35, %c0_36] : memref<2x64x64xf32, #tpu.memory_space<vmem>>, vector<1x64x64xf32>
    %90 = vector.shape_cast %89 : vector<1x64x64xf32> to vector<64x64xf32>
    %91 = arith.truncf %87 : vector<32x32xf32> to vector<32x32xbf16>
    %cst_37 = arith.constant dense<0.000000e+00> : vector<32x64xf32>
    %92 = tpu.matmul %91, %88, %cst_37 {dimension_numbers = #tpu.dot_dimension_numbers<[1], [0], [0], [1], [0, 0, 1, 1], [], []>} : vector<32x32xbf16>, vector<32x64xbf16>, vector<32x64xf32> -> vector<32x64xf32>
    %93 = arith.truncf %90 : vector<64x64xf32> to vector<64x64xbf16>
    %cst_38 = arith.constant dense<0.000000e+00> : vector<32x64xf32>
    %94 = tpu.matmul %73, %93, %cst_38 {dimension_numbers = #tpu.dot_dimension_numbers<[1], [1], [0], [0], [0, 0, 1, 0], [], []>} : vector<32x64xbf16>, vector<64x64xbf16>, vector<32x64xf32> -> vector<32x64xf32>
    %95 = arith.addf %92, %94 : vector<32x64xf32>
    %96 = arith.truncf %95 : vector<32x64xf32> to vector<32x64xbf16>
    %c0_39 = arith.constant 0 : index
    %c0_40 = arith.constant 0 : index
    %c64 = arith.constant 64 : index
    %97 = vector.load %arg8[%c0_39, %c0_40, %c64] : memref<1x128x128xbf16, #tpu.memory_space<vmem>>, vector<1x32x64xbf16>
    %98 = vector.shape_cast %97 : vector<1x32x64xbf16> to vector<32x64xbf16>
    %99 = vector.shape_cast %96 : vector<32x64xbf16> to vector<1x32x64xbf16>
    tpu.vector_store %arg8[%c0_39, %c0_40, %c64], %99 {strides = array<i32>} : memref<1x128x128xbf16, #tpu.memory_space<vmem>>, vector<1x32x64xbf16>,
    %100 = vector.extract_strided_slice %33 {offsets = [0, 64], sizes = [32, 64], strides = [1, 1]} : vector<32x128xbf16> to vector<32x64xbf16>
    %cst_41 = arith.constant dense<0.000000e+00> : vector<64x64xf32>
    %101 = tpu.matmul %88, %100, %cst_41 {dimension_numbers = #tpu.dot_dimension_numbers<[0], [0], [1], [1], [0, 1, 1, 1], [], []>} : vector<32x64xbf16>, vector<32x64xbf16>, vector<64x64xf32> -> vector<64x64xf32>
    %102 = vector.extract_strided_slice %25 {offsets = [0, 64], sizes = [1, 64], strides = [1, 1]} : vector<1x128xf32> to vector<1x64xf32>
    %103 = vector.broadcast %102 : vector<1x64xf32> to vector<64x64xf32>
    %104 = arith.mulf %103, %90 : vector<64x64xf32>
    %105 = arith.addf %104, %101 : vector<64x64xf32>
    %c1_42 = arith.constant 1 : index
    %c0_43 = arith.constant 0 : index
    %c0_44 = arith.constant 0 : index
    %106 = vector.load %arg9[%c1_42, %c0_43, %c0_44] : memref<2x64x64xf32, #tpu.memory_space<vmem>>, vector<1x64x64xf32>
    %107 = vector.shape_cast %106 : vector<1x64x64xf32> to vector<64x64xf32>
    %108 = vector.shape_cast %105 : vector<64x64xf32> to vector<1x64x64xf32>
    tpu.vector_store %arg9[%c1_42, %c0_43, %c0_44], %108 {strides = array<i32>} : memref<2x64x64xf32, #tpu.memory_space<vmem>>, vector<1x64x64xf32>,
    %c0_45 = arith.constant 0 : index
    %c32 = arith.constant 32 : index
    %c0_46 = arith.constant 0 : index
    %109 = vector.load %arg5[%c0_45, %c32, %c0_46] : memref<1x128x128xf32, #tpu.memory_space<vmem>>, vector<1x32x128xf32>
    %110 = vector.shape_cast %109 : vector<1x32x128xf32> to vector<32x128xf32>
    %c0_47 = arith.constant 0 : index
    %c32_48 = arith.constant 32 : index
    %c0_49 = arith.constant 0 : index
    %111 = vector.load %arg2[%c0_47, %c32_48, %c0_49] : memref<1x128x128xbf16, #tpu.memory_space<vmem>>, vector<1x32x128xbf16>
    %112 = vector.shape_cast %111 : vector<1x32x128xbf16> to vector<32x128xbf16>
    %113 = arith.extf %112 : vector<32x128xbf16> to vector<32x128xf32>
    %c0_50 = arith.constant 0 : index
    %c32_51 = arith.constant 32 : index
    %c0_52 = arith.constant 0 : index
    %114 = vector.load %arg3[%c0_50, %c32_51, %c0_52] : memref<1x128x128xbf16, #tpu.memory_space<vmem>>, vector<1x32x128xbf16>
    %115 = vector.shape_cast %114 : vector<1x32x128xbf16> to vector<32x128xbf16>
    %116 = arith.extf %115 : vector<32x128xbf16> to vector<32x128xf32>
    %c0_53 = arith.constant 0 : index
    %c32_54 = arith.constant 32 : index
    %c0_55 = arith.constant 0 : index
    %117 = vector.load %arg4[%c0_53, %c32_54, %c0_55] : memref<1x128x128xbf16, #tpu.memory_space<vmem>>, vector<1x32x128xbf16>
    %118 = vector.shape_cast %117 : vector<1x32x128xbf16> to vector<32x128xbf16>
    %cst_56 = arith.constant dense<0.000000e+00> : vector<32x128xf32>
    %119 = tpu.matmul %7, %110, %cst_56 {dimension_numbers = #tpu.dot_dimension_numbers<[1], [0], [0], [1], [0, 0, 1, 1], [], []>} : vector<32x32xf32>, vector<32x128xf32>, vector<32x128xf32> -> vector<32x128xf32>
    %120 = arith.subf %119, %110 : vector<32x128xf32>
    %cst_57 = arith.constant 0.000000e+00 : f32
    %121 = vector.broadcast %cst_57 : f32 to vector<32x128xf32>
    %122 = arith.subf %121, %119 : vector<32x128xf32>
    %123 = math.exp %122 : vector<32x128xf32>
    %124 = vector.extract_strided_slice %123 {offsets = [31, 0], sizes = [1, 128], strides = [1, 1]} : vector<32x128xf32> to vector<1x128xf32>
    %125 = tpu.reciprocal %124 {approx = true} : vector<1x128xf32> -> vector<1x128xf32>
    %126 = math.exp %120 : vector<32x128xf32>
    %127 = arith.mulf %113, %126 : vector<32x128xf32>
    %128 = arith.truncf %127 : vector<32x128xf32> to vector<32x128xbf16>
    %129 = arith.mulf %116, %123 : vector<32x128xf32>
    %130 = arith.truncf %129 : vector<32x128xf32> to vector<32x128xbf16>
    %131 = vector.broadcast %125 : vector<1x128xf32> to vector<32x128xf32>
    %132 = arith.mulf %129, %131 : vector<32x128xf32>
    %133 = arith.truncf %132 : vector<32x128xf32> to vector<32x128xbf16>
    %134 = vector.broadcast %8 : vector<1x128xf32> to vector<32x128xf32>
    %135 = arith.mulf %113, %134 : vector<32x128xf32>
    %136 = arith.mulf %135, %116 : vector<32x128xf32>
    %137 = vector.extract_strided_slice %128 {offsets = [0, 0], sizes = [32, 64], strides = [1, 1]} : vector<32x128xbf16> to vector<32x64xbf16>
    %138 = vector.extract_strided_slice %130 {offsets = [0, 0], sizes = [32, 64], strides = [1, 1]} : vector<32x128xbf16> to vector<32x64xbf16>
    %cst_58 = arith.constant dense<0.000000e+00> : vector<32x32xf32>
    %139 = tpu.matmul %137, %138, %cst_58 {dimension_numbers = #tpu.dot_dimension_numbers<[1], [1], [0], [0], [0, 0, 1, 0], [], []>} : vector<32x64xbf16>, vector<32x64xbf16>, vector<32x32xf32> -> vector<32x32xf32>
    %140 = vector.extract_strided_slice %136 {offsets = [0, 0], sizes = [32, 64], strides = [1, 1]} : vector<32x128xf32> to vector<32x64xf32>
    %cst_59 = arith.constant dense<0.000000e+00> : vector<32xf32>
    %141 = vector.multi_reduction <add>, %140, %cst_59 [1] : vector<32x64xf32> to vector<32xf32>
    %142 = vector.shape_cast %141 : vector<32xf32> to vector<32x1xf32>
    %143 = arith.cmpi sgt, %3, %4 : vector<32x32xi32>
    %cst_60 = arith.constant 0.000000e+00 : f32
    %144 = vector.broadcast %cst_60 : f32 to vector<32x32xf32>
    %145 = arith.select %143, %139, %144 : vector<32x32xi1>, vector<32x32xf32>
    %146 = arith.cmpi eq, %3, %4 : vector<32x32xi32>
    %cst_61 = arith.constant 0.000000e+00 : f32
    %147 = vector.shape_cast %142 : vector<32x1xf32> to vector<32x1xf32>
    %148 = vector.broadcast %147 : vector<32x1xf32> to vector<32x32xf32>
    %149 = vector.broadcast %cst_61 : f32 to vector<32x32xf32>
    %150 = arith.select %146, %148, %149 : vector<32x32xi1>, vector<32x32xf32>
    %151 = arith.addf %145, %150 : vector<32x32xf32>
    %152 = vector.extract_strided_slice %118 {offsets = [0, 0], sizes = [32, 64], strides = [1, 1]} : vector<32x128xbf16> to vector<32x64xbf16>
    %c0_62 = arith.constant 0 : index
    %c0_63 = arith.constant 0 : index
    %c0_64 = arith.constant 0 : index
    %153 = vector.load %arg9[%c0_62, %c0_63, %c0_64] : memref<2x64x64xf32, #tpu.memory_space<vmem>>, vector<1x64x64xf32>
    %154 = vector.shape_cast %153 : vector<1x64x64xf32> to vector<64x64xf32>
    %155 = arith.truncf %151 : vector<32x32xf32> to vector<32x32xbf16>
    %cst_65 = arith.constant dense<0.000000e+00> : vector<32x64xf32>
    %156 = tpu.matmul %155, %152, %cst_65 {dimension_numbers = #tpu.dot_dimension_numbers<[1], [0], [0], [1], [0, 0, 1, 1], [], []>} : vector<32x32xbf16>, vector<32x64xbf16>, vector<32x64xf32> -> vector<32x64xf32>
    %157 = arith.truncf %154 : vector<64x64xf32> to vector<64x64xbf16>
    %cst_66 = arith.constant dense<0.000000e+00> : vector<32x64xf32>
    %158 = tpu.matmul %137, %157, %cst_66 {dimension_numbers = #tpu.dot_dimension_numbers<[1], [1], [0], [0], [0, 0, 1, 0], [], []>} : vector<32x64xbf16>, vector<64x64xbf16>, vector<32x64xf32> -> vector<32x64xf32>
    %159 = arith.addf %156, %158 : vector<32x64xf32>
    %160 = arith.truncf %159 : vector<32x64xf32> to vector<32x64xbf16>
    %c0_67 = arith.constant 0 : index
    %c32_68 = arith.constant 32 : index
    %c0_69 = arith.constant 0 : index
    %161 = vector.load %arg8[%c0_67, %c32_68, %c0_69] : memref<1x128x128xbf16, #tpu.memory_space<vmem>>, vector<1x32x64xbf16>
    %162 = vector.shape_cast %161 : vector<1x32x64xbf16> to vector<32x64xbf16>
    %163 = vector.shape_cast %160 : vector<32x64xbf16> to vector<1x32x64xbf16>
    tpu.vector_store %arg8[%c0_67, %c32_68, %c0_69], %163 {strides = array<i32>} : memref<1x128x128xbf16, #tpu.memory_space<vmem>>, vector<1x32x64xbf16>,
    %164 = vector.extract_strided_slice %133 {offsets = [0, 0], sizes = [32, 64], strides = [1, 1]} : vector<32x128xbf16> to vector<32x64xbf16>
    %cst_70 = arith.constant dense<0.000000e+00> : vector<64x64xf32>
    %165 = tpu.matmul %152, %164, %cst_70 {dimension_numbers = #tpu.dot_dimension_numbers<[0], [0], [1], [1], [0, 1, 1, 1], [], []>} : vector<32x64xbf16>, vector<32x64xbf16>, vector<64x64xf32> -> vector<64x64xf32>
    %166 = vector.extract_strided_slice %125 {offsets = [0, 0], sizes = [1, 64], strides = [1, 1]} : vector<1x128xf32> to vector<1x64xf32>
    %167 = vector.broadcast %166 : vector<1x64xf32> to vector<64x64xf32>
    %168 = arith.mulf %167, %154 : vector<64x64xf32>
    %169 = arith.addf %168, %165 : vector<64x64xf32>
    %c0_71 = arith.constant 0 : index
    %c0_72 = arith.constant 0 : index
    %c0_73 = arith.constant 0 : index
    %170 = vector.load %arg9[%c0_71, %c0_72, %c0_73] : memref<2x64x64xf32, #tpu.memory_space<vmem>>, vector<1x64x64xf32>
    %171 = vector.shape_cast %170 : vector<1x64x64xf32> to vector<64x64xf32>
    %172 = vector.shape_cast %169 : vector<64x64xf32> to vector<1x64x64xf32>
    tpu.vector_store %arg9[%c0_71, %c0_72, %c0_73], %172 {strides = array<i32>} : memref<2x64x64xf32, #tpu.memory_space<vmem>>, vector<1x64x64xf32>,
    %173 = vector.extract_strided_slice %128 {offsets = [0, 64], sizes = [32, 64], strides = [1, 1]} : vector<32x128xbf16> to vector<32x64xbf16>
    %174 = vector.extract_strided_slice %130 {offsets = [0, 64], sizes = [32, 64], strides = [1, 1]} : vector<32x128xbf16> to vector<32x64xbf16>
    %cst_74 = arith.constant dense<0.000000e+00> : vector<32x32xf32>
    %175 = tpu.matmul %173, %174, %cst_74 {dimension_numbers = #tpu.dot_dimension_numbers<[1], [1], [0], [0], [0, 0, 1, 0], [], []>} : vector<32x64xbf16>, vector<32x64xbf16>, vector<32x32xf32> -> vector<32x32xf32>
    %176 = vector.extract_strided_slice %136 {offsets = [0, 64], sizes = [32, 64], strides = [1, 1]} : vector<32x128xf32> to vector<32x64xf32>
    %cst_75 = arith.constant dense<0.000000e+00> : vector<32xf32>
    %177 = vector.multi_reduction <add>, %176, %cst_75 [1] : vector<32x64xf32> to vector<32xf32>
    %178 = vector.shape_cast %177 : vector<32xf32> to vector<32x1xf32>
    %179 = arith.cmpi sgt, %3, %4 : vector<32x32xi32>
    %cst_76 = arith.constant 0.000000e+00 : f32
    %180 = vector.broadcast %cst_76 : f32 to vector<32x32xf32>
    %181 = arith.select %179, %175, %180 : vector<32x32xi1>, vector<32x32xf32>
    %182 = arith.cmpi eq, %3, %4 : vector<32x32xi32>
    %cst_77 = arith.constant 0.000000e+00 : f32
    %183 = vector.shape_cast %178 : vector<32x1xf32> to vector<32x1xf32>
    %184 = vector.broadcast %183 : vector<32x1xf32> to vector<32x32xf32>
    %185 = vector.broadcast %cst_77 : f32 to vector<32x32xf32>
    %186 = arith.select %182, %184, %185 : vector<32x32xi1>, vector<32x32xf32>
    %187 = arith.addf %181, %186 : vector<32x32xf32>
    %188 = vector.extract_strided_slice %118 {offsets = [0, 64], sizes = [32, 64], strides = [1, 1]} : vector<32x128xbf16> to vector<32x64xbf16>
    %c1_78 = arith.constant 1 : index
    %c0_79 = arith.constant 0 : index
    %c0_80 = arith.constant 0 : index
    %189 = vector.load %arg9[%c1_78, %c0_79, %c0_80] : memref<2x64x64xf32, #tpu.memory_space<vmem>>, vector<1x64x64xf32>
    %190 = vector.shape_cast %189 : vector<1x64x64xf32> to vector<64x64xf32>
    %191 = arith.truncf %187 : vector<32x32xf32> to vector<32x32xbf16>
    %cst_81 = arith.constant dense<0.000000e+00> : vector<32x64xf32>
    %192 = tpu.matmul %191, %188, %cst_81 {dimension_numbers = #tpu.dot_dimension_numbers<[1], [0], [0], [1], [0, 0, 1, 1], [], []>} : vector<32x32xbf16>, vector<32x64xbf16>, vector<32x64xf32> -> vector<32x64xf32>
    %193 = arith.truncf %190 : vector<64x64xf32> to vector<64x64xbf16>
    %cst_82 = arith.constant dense<0.000000e+00> : vector<32x64xf32>
    %194 = tpu.matmul %173, %193, %cst_82 {dimension_numbers = #tpu.dot_dimension_numbers<[1], [1], [0], [0], [0, 0, 1, 0], [], []>} : vector<32x64xbf16>, vector<64x64xbf16>, vector<32x64xf32> -> vector<32x64xf32>
    %195 = arith.addf %192, %194 : vector<32x64xf32>
    %196 = arith.truncf %195 : vector<32x64xf32> to vector<32x64xbf16>
    %c0_83 = arith.constant 0 : index
    %c32_84 = arith.constant 32 : index
    %c64_85 = arith.constant 64 : index
    %197 = vector.load %arg8[%c0_83, %c32_84, %c64_85] : memref<1x128x128xbf16, #tpu.memory_space<vmem>>, vector<1x32x64xbf16>
    %198 = vector.shape_cast %197 : vector<1x32x64xbf16> to vector<32x64xbf16>
    %199 = vector.shape_cast %196 : vector<32x64xbf16> to vector<1x32x64xbf16>
    tpu.vector_store %arg8[%c0_83, %c32_84, %c64_85], %199 {strides = array<i32>} : memref<1x128x128xbf16, #tpu.memory_space<vmem>>, vector<1x32x64xbf16>,
    %200 = vector.extract_strided_slice %133 {offsets = [0, 64], sizes = [32, 64], strides = [1, 1]} : vector<32x128xbf16> to vector<32x64xbf16>
    %cst_86 = arith.constant dense<0.000000e+00> : vector<64x64xf32>
    %201 = tpu.matmul %188, %200, %cst_86 {dimension_numbers = #tpu.dot_dimension_numbers<[0], [0], [1], [1], [0, 1, 1, 1], [], []>} : vector<32x64xbf16>, vector<32x64xbf16>, vector<64x64xf32> -> vector<64x64xf32>
    %202 = vector.extract_strided_slice %125 {offsets = [0, 64], sizes = [1, 64], strides = [1, 1]} : vector<1x128xf32> to vector<1x64xf32>
    %203 = vector.broadcast %202 : vector<1x64xf32> to vector<64x64xf32>
    %204 = arith.mulf %203, %190 : vector<64x64xf32>
    %205 = arith.addf %204, %201 : vector<64x64xf32>
    %c1_87 = arith.constant 1 : index
    %c0_88 = arith.constant 0 : index
    %c0_89 = arith.constant 0 : index
    %206 = vector.load %arg9[%c1_87, %c0_88, %c0_89] : memref<2x64x64xf32, #tpu.memory_space<vmem>>, vector<1x64x64xf32>
    %207 = vector.shape_cast %206 : vector<1x64x64xf32> to vector<64x64xf32>
    %208 = vector.shape_cast %205 : vector<64x64xf32> to vector<1x64x64xf32>
    tpu.vector_store %arg9[%c1_87, %c0_88, %c0_89], %208 {strides = array<i32>} : memref<2x64x64xf32, #tpu.memory_space<vmem>>, vector<1x64x64xf32>,
    %c0_90 = arith.constant 0 : index
    %c64_91 = arith.constant 64 : index
    %c0_92 = arith.constant 0 : index
    %209 = vector.load %arg5[%c0_90, %c64_91, %c0_92] : memref<1x128x128xf32, #tpu.memory_space<vmem>>, vector<1x32x128xf32>
    %210 = vector.shape_cast %209 : vector<1x32x128xf32> to vector<32x128xf32>
    %c0_93 = arith.constant 0 : index
    %c64_94 = arith.constant 64 : index
    %c0_95 = arith.constant 0 : index
    %211 = vector.load %arg2[%c0_93, %c64_94, %c0_95] : memref<1x128x128xbf16, #tpu.memory_space<vmem>>, vector<1x32x128xbf16>
    %212 = vector.shape_cast %211 : vector<1x32x128xbf16> to vector<32x128xbf16>
    %213 = arith.extf %212 : vector<32x128xbf16> to vector<32x128xf32>
    %c0_96 = arith.constant 0 : index
    %c64_97 = arith.constant 64 : index
    %c0_98 = arith.constant 0 : index
    %214 = vector.load %arg3[%c0_96, %c64_97, %c0_98] : memref<1x128x128xbf16, #tpu.memory_space<vmem>>, vector<1x32x128xbf16>
    %215 = vector.shape_cast %214 : vector<1x32x128xbf16> to vector<32x128xbf16>
    %216 = arith.extf %215 : vector<32x128xbf16> to vector<32x128xf32>
    %c0_99 = arith.constant 0 : index
    %c64_100 = arith.constant 64 : index
    %c0_101 = arith.constant 0 : index
    %217 = vector.load %arg4[%c0_99, %c64_100, %c0_101] : memref<1x128x128xbf16, #tpu.memory_space<vmem>>, vector<1x32x128xbf16>
    %218 = vector.shape_cast %217 : vector<1x32x128xbf16> to vector<32x128xbf16>
    %cst_102 = arith.constant dense<0.000000e+00> : vector<32x128xf32>
    %219 = tpu.matmul %7, %210, %cst_102 {dimension_numbers = #tpu.dot_dimension_numbers<[1], [0], [0], [1], [0, 0, 1, 1], [], []>} : vector<32x32xf32>, vector<32x128xf32>, vector<32x128xf32> -> vector<32x128xf32>
    %220 = arith.subf %219, %210 : vector<32x128xf32>
    %cst_103 = arith.constant 0.000000e+00 : f32
    %221 = vector.broadcast %cst_103 : f32 to vector<32x128xf32>
    %222 = arith.subf %221, %219 : vector<32x128xf32>
    %223 = math.exp %222 : vector<32x128xf32>
    %224 = vector.extract_strided_slice %223 {offsets = [31, 0], sizes = [1, 128], strides = [1, 1]} : vector<32x128xf32> to vector<1x128xf32>
    %225 = tpu.reciprocal %224 {approx = true} : vector<1x128xf32> -> vector<1x128xf32>
    %226 = math.exp %220 : vector<32x128xf32>
    %227 = arith.mulf %213, %226 : vector<32x128xf32>
    %228 = arith.truncf %227 : vector<32x128xf32> to vector<32x128xbf16>
    %229 = arith.mulf %216, %223 : vector<32x128xf32>
    %230 = arith.truncf %229 : vector<32x128xf32> to vector<32x128xbf16>
    %231 = vector.broadcast %225 : vector<1x128xf32> to vector<32x128xf32>
    %232 = arith.mulf %229, %231 : vector<32x128xf32>
    %233 = arith.truncf %232 : vector<32x128xf32> to vector<32x128xbf16>
    %234 = vector.broadcast %8 : vector<1x128xf32> to vector<32x128xf32>
    %235 = arith.mulf %213, %234 : vector<32x128xf32>
    %236 = arith.mulf %235, %216 : vector<32x128xf32>
    %237 = vector.extract_strided_slice %228 {offsets = [0, 0], sizes = [32, 64], strides = [1, 1]} : vector<32x128xbf16> to vector<32x64xbf16>
    %238 = vector.extract_strided_slice %230 {offsets = [0, 0], sizes = [32, 64], strides = [1, 1]} : vector<32x128xbf16> to vector<32x64xbf16>
    %cst_104 = arith.constant dense<0.000000e+00> : vector<32x32xf32>
    %239 = tpu.matmul %237, %238, %cst_104 {dimension_numbers = #tpu.dot_dimension_numbers<[1], [1], [0], [0], [0, 0, 1, 0], [], []>} : vector<32x64xbf16>, vector<32x64xbf16>, vector<32x32xf32> -> vector<32x32xf32>
    %240 = vector.extract_strided_slice %236 {offsets = [0, 0], sizes = [32, 64], strides = [1, 1]} : vector<32x128xf32> to vector<32x64xf32>
    %cst_105 = arith.constant dense<0.000000e+00> : vector<32xf32>
    %241 = vector.multi_reduction <add>, %240, %cst_105 [1] : vector<32x64xf32> to vector<32xf32>
    %242 = vector.shape_cast %241 : vector<32xf32> to vector<32x1xf32>
    %243 = arith.cmpi sgt, %3, %4 : vector<32x32xi32>
    %cst_106 = arith.constant 0.000000e+00 : f32
    %244 = vector.broadcast %cst_106 : f32 to vector<32x32xf32>
    %245 = arith.select %243, %239, %244 : vector<32x32xi1>, vector<32x32xf32>
    %246 = arith.cmpi eq, %3, %4 : vector<32x32xi32>
    %cst_107 = arith.constant 0.000000e+00 : f32
    %247 = vector.shape_cast %242 : vector<32x1xf32> to vector<32x1xf32>
    %248 = vector.broadcast %247 : vector<32x1xf32> to vector<32x32xf32>
    %249 = vector.broadcast %cst_107 : f32 to vector<32x32xf32>
    %250 = arith.select %246, %248, %249 : vector<32x32xi1>, vector<32x32xf32>
    %251 = arith.addf %245, %250 : vector<32x32xf32>
    %252 = vector.extract_strided_slice %218 {offsets = [0, 0], sizes = [32, 64], strides = [1, 1]} : vector<32x128xbf16> to vector<32x64xbf16>
    %c0_108 = arith.constant 0 : index
    %c0_109 = arith.constant 0 : index
    %c0_110 = arith.constant 0 : index
    %253 = vector.load %arg9[%c0_108, %c0_109, %c0_110] : memref<2x64x64xf32, #tpu.memory_space<vmem>>, vector<1x64x64xf32>
    %254 = vector.shape_cast %253 : vector<1x64x64xf32> to vector<64x64xf32>
    %255 = arith.truncf %251 : vector<32x32xf32> to vector<32x32xbf16>
    %cst_111 = arith.constant dense<0.000000e+00> : vector<32x64xf32>
    %256 = tpu.matmul %255, %252, %cst_111 {dimension_numbers = #tpu.dot_dimension_numbers<[1], [0], [0], [1], [0, 0, 1, 1], [], []>} : vector<32x32xbf16>, vector<32x64xbf16>, vector<32x64xf32> -> vector<32x64xf32>
    %257 = arith.truncf %254 : vector<64x64xf32> to vector<64x64xbf16>
    %cst_112 = arith.constant dense<0.000000e+00> : vector<32x64xf32>
    %258 = tpu.matmul %237, %257, %cst_112 {dimension_numbers = #tpu.dot_dimension_numbers<[1], [1], [0], [0], [0, 0, 1, 0], [], []>} : vector<32x64xbf16>, vector<64x64xbf16>, vector<32x64xf32> -> vector<32x64xf32>
    %259 = arith.addf %256, %258 : vector<32x64xf32>
    %260 = arith.truncf %259 : vector<32x64xf32> to vector<32x64xbf16>
    %c0_113 = arith.constant 0 : index
    %c64_114 = arith.constant 64 : index
    %c0_115 = arith.constant 0 : index
    %261 = vector.load %arg8[%c0_113, %c64_114, %c0_115] : memref<1x128x128xbf16, #tpu.memory_space<vmem>>, vector<1x32x64xbf16>
    %262 = vector.shape_cast %261 : vector<1x32x64xbf16> to vector<32x64xbf16>
    %263 = vector.shape_cast %260 : vector<32x64xbf16> to vector<1x32x64xbf16>
    tpu.vector_store %arg8[%c0_113, %c64_114, %c0_115], %263 {strides = array<i32>} : memref<1x128x128xbf16, #tpu.memory_space<vmem>>, vector<1x32x64xbf16>,
    %264 = vector.extract_strided_slice %233 {offsets = [0, 0], sizes = [32, 64], strides = [1, 1]} : vector<32x128xbf16> to vector<32x64xbf16>
    %cst_116 = arith.constant dense<0.000000e+00> : vector<64x64xf32>
    %265 = tpu.matmul %252, %264, %cst_116 {dimension_numbers = #tpu.dot_dimension_numbers<[0], [0], [1], [1], [0, 1, 1, 1], [], []>} : vector<32x64xbf16>, vector<32x64xbf16>, vector<64x64xf32> -> vector<64x64xf32>
    %266 = vector.extract_strided_slice %225 {offsets = [0, 0], sizes = [1, 64], strides = [1, 1]} : vector<1x128xf32> to vector<1x64xf32>
    %267 = vector.broadcast %266 : vector<1x64xf32> to vector<64x64xf32>
    %268 = arith.mulf %267, %254 : vector<64x64xf32>
    %269 = arith.addf %268, %265 : vector<64x64xf32>
    %c0_117 = arith.constant 0 : index
    %c0_118 = arith.constant 0 : index
    %c0_119 = arith.constant 0 : index
    %270 = vector.load %arg9[%c0_117, %c0_118, %c0_119] : memref<2x64x64xf32, #tpu.memory_space<vmem>>, vector<1x64x64xf32>
    %271 = vector.shape_cast %270 : vector<1x64x64xf32> to vector<64x64xf32>
    %272 = vector.shape_cast %269 : vector<64x64xf32> to vector<1x64x64xf32>
    tpu.vector_store %arg9[%c0_117, %c0_118, %c0_119], %272 {strides = array<i32>} : memref<2x64x64xf32, #tpu.memory_space<vmem>>, vector<1x64x64xf32>,
    %273 = vector.extract_strided_slice %228 {offsets = [0, 64], sizes = [32, 64], strides = [1, 1]} : vector<32x128xbf16> to vector<32x64xbf16>
    %274 = vector.extract_strided_slice %230 {offsets = [0, 64], sizes = [32, 64], strides = [1, 1]} : vector<32x128xbf16> to vector<32x64xbf16>
    %cst_120 = arith.constant dense<0.000000e+00> : vector<32x32xf32>
    %275 = tpu.matmul %273, %274, %cst_120 {dimension_numbers = #tpu.dot_dimension_numbers<[1], [1], [0], [0], [0, 0, 1, 0], [], []>} : vector<32x64xbf16>, vector<32x64xbf16>, vector<32x32xf32> -> vector<32x32xf32>
    %276 = vector.extract_strided_slice %236 {offsets = [0, 64], sizes = [32, 64], strides = [1, 1]} : vector<32x128xf32> to vector<32x64xf32>
    %cst_121 = arith.constant dense<0.000000e+00> : vector<32xf32>
    %277 = vector.multi_reduction <add>, %276, %cst_121 [1] : vector<32x64xf32> to vector<32xf32>
    %278 = vector.shape_cast %277 : vector<32xf32> to vector<32x1xf32>
    %279 = arith.cmpi sgt, %3, %4 : vector<32x32xi32>
    %cst_122 = arith.constant 0.000000e+00 : f32
    %280 = vector.broadcast %cst_122 : f32 to vector<32x32xf32>
    %281 = arith.select %279, %275, %280 : vector<32x32xi1>, vector<32x32xf32>
    %282 = arith.cmpi eq, %3, %4 : vector<32x32xi32>
    %cst_123 = arith.constant 0.000000e+00 : f32
    %283 = vector.shape_cast %278 : vector<32x1xf32> to vector<32x1xf32>
    %284 = vector.broadcast %283 : vector<32x1xf32> to vector<32x32xf32>
    %285 = vector.broadcast %cst_123 : f32 to vector<32x32xf32>
    %286 = arith.select %282, %284, %285 : vector<32x32xi1>, vector<32x32xf32>
    %287 = arith.addf %281, %286 : vector<32x32xf32>
    %288 = vector.extract_strided_slice %218 {offsets = [0, 64], sizes = [32, 64], strides = [1, 1]} : vector<32x128xbf16> to vector<32x64xbf16>
    %c1_124 = arith.constant 1 : index
    %c0_125 = arith.constant 0 : index
    %c0_126 = arith.constant 0 : index
    %289 = vector.load %arg9[%c1_124, %c0_125, %c0_126] : memref<2x64x64xf32, #tpu.memory_space<vmem>>, vector<1x64x64xf32>
    %290 = vector.shape_cast %289 : vector<1x64x64xf32> to vector<64x64xf32>
    %291 = arith.truncf %287 : vector<32x32xf32> to vector<32x32xbf16>
    %cst_127 = arith.constant dense<0.000000e+00> : vector<32x64xf32>
    %292 = tpu.matmul %291, %288, %cst_127 {dimension_numbers = #tpu.dot_dimension_numbers<[1], [0], [0], [1], [0, 0, 1, 1], [], []>} : vector<32x32xbf16>, vector<32x64xbf16>, vector<32x64xf32> -> vector<32x64xf32>
    %293 = arith.truncf %290 : vector<64x64xf32> to vector<64x64xbf16>
    %cst_128 = arith.constant dense<0.000000e+00> : vector<32x64xf32>
    %294 = tpu.matmul %273, %293, %cst_128 {dimension_numbers = #tpu.dot_dimension_numbers<[1], [1], [0], [0], [0, 0, 1, 0], [], []>} : vector<32x64xbf16>, vector<64x64xbf16>, vector<32x64xf32> -> vector<32x64xf32>
    %295 = arith.addf %292, %294 : vector<32x64xf32>
    %296 = arith.truncf %295 : vector<32x64xf32> to vector<32x64xbf16>
    %c0_129 = arith.constant 0 : index
    %c64_130 = arith.constant 64 : index
    %c64_131 = arith.constant 64 : index
    %297 = vector.load %arg8[%c0_129, %c64_130, %c64_131] : memref<1x128x128xbf16, #tpu.memory_space<vmem>>, vector<1x32x64xbf16>
    %298 = vector.shape_cast %297 : vector<1x32x64xbf16> to vector<32x64xbf16>
    %299 = vector.shape_cast %296 : vector<32x64xbf16> to vector<1x32x64xbf16>
    tpu.vector_store %arg8[%c0_129, %c64_130, %c64_131], %299 {strides = array<i32>} : memref<1x128x128xbf16, #tpu.memory_space<vmem>>, vector<1x32x64xbf16>,
    %300 = vector.extract_strided_slice %233 {offsets = [0, 64], sizes = [32, 64], strides = [1, 1]} : vector<32x128xbf16> to vector<32x64xbf16>
    %cst_132 = arith.constant dense<0.000000e+00> : vector<64x64xf32>
    %301 = tpu.matmul %288, %300, %cst_132 {dimension_numbers = #tpu.dot_dimension_numbers<[0], [0], [1], [1], [0, 1, 1, 1], [], []>} : vector<32x64xbf16>, vector<32x64xbf16>, vector<64x64xf32> -> vector<64x64xf32>
    %302 = vector.extract_strided_slice %225 {offsets = [0, 64], sizes = [1, 64], strides = [1, 1]} : vector<1x128xf32> to vector<1x64xf32>
    %303 = vector.broadcast %302 : vector<1x64xf32> to vector<64x64xf32>
    %304 = arith.mulf %303, %290 : vector<64x64xf32>
    %305 = arith.addf %304, %301 : vector<64x64xf32>
    %c1_133 = arith.constant 1 : index
    %c0_134 = arith.constant 0 : index
    %c0_135 = arith.constant 0 : index
    %306 = vector.load %arg9[%c1_133, %c0_134, %c0_135] : memref<2x64x64xf32, #tpu.memory_space<vmem>>, vector<1x64x64xf32>
    %307 = vector.shape_cast %306 : vector<1x64x64xf32> to vector<64x64xf32>
    %308 = vector.shape_cast %305 : vector<64x64xf32> to vector<1x64x64xf32>
    tpu.vector_store %arg9[%c1_133, %c0_134, %c0_135], %308 {strides = array<i32>} : memref<2x64x64xf32, #tpu.memory_space<vmem>>, vector<1x64x64xf32>,
    %c0_136 = arith.constant 0 : index
    %c96 = arith.constant 96 : index
    %c0_137 = arith.constant 0 : index
    %309 = vector.load %arg5[%c0_136, %c96, %c0_137] : memref<1x128x128xf32, #tpu.memory_space<vmem>>, vector<1x32x128xf32>
    %310 = vector.shape_cast %309 : vector<1x32x128xf32> to vector<32x128xf32>
    %c0_138 = arith.constant 0 : index
    %c96_139 = arith.constant 96 : index
    %c0_140 = arith.constant 0 : index
    %311 = vector.load %arg2[%c0_138, %c96_139, %c0_140] : memref<1x128x128xbf16, #tpu.memory_space<vmem>>, vector<1x32x128xbf16>
    %312 = vector.shape_cast %311 : vector<1x32x128xbf16> to vector<32x128xbf16>
    %313 = arith.extf %312 : vector<32x128xbf16> to vector<32x128xf32>
    %c0_141 = arith.constant 0 : index
    %c96_142 = arith.constant 96 : index
    %c0_143 = arith.constant 0 : index
    %314 = vector.load %arg3[%c0_141, %c96_142, %c0_143] : memref<1x128x128xbf16, #tpu.memory_space<vmem>>, vector<1x32x128xbf16>
    %315 = vector.shape_cast %314 : vector<1x32x128xbf16> to vector<32x128xbf16>
    %316 = arith.extf %315 : vector<32x128xbf16> to vector<32x128xf32>
    %c0_144 = arith.constant 0 : index
    %c96_145 = arith.constant 96 : index
    %c0_146 = arith.constant 0 : index
    %317 = vector.load %arg4[%c0_144, %c96_145, %c0_146] : memref<1x128x128xbf16, #tpu.memory_space<vmem>>, vector<1x32x128xbf16>
    %318 = vector.shape_cast %317 : vector<1x32x128xbf16> to vector<32x128xbf16>
    %cst_147 = arith.constant dense<0.000000e+00> : vector<32x128xf32>
    %319 = tpu.matmul %7, %310, %cst_147 {dimension_numbers = #tpu.dot_dimension_numbers<[1], [0], [0], [1], [0, 0, 1, 1], [], []>} : vector<32x32xf32>, vector<32x128xf32>, vector<32x128xf32> -> vector<32x128xf32>
    %320 = arith.subf %319, %310 : vector<32x128xf32>
    %cst_148 = arith.constant 0.000000e+00 : f32
    %321 = vector.broadcast %cst_148 : f32 to vector<32x128xf32>
    %322 = arith.subf %321, %319 : vector<32x128xf32>
    %323 = math.exp %322 : vector<32x128xf32>
    %324 = vector.extract_strided_slice %323 {offsets = [31, 0], sizes = [1, 128], strides = [1, 1]} : vector<32x128xf32> to vector<1x128xf32>
    %325 = tpu.reciprocal %324 {approx = true} : vector<1x128xf32> -> vector<1x128xf32>
    %326 = math.exp %320 : vector<32x128xf32>
    %327 = arith.mulf %313, %326 : vector<32x128xf32>
    %328 = arith.truncf %327 : vector<32x128xf32> to vector<32x128xbf16>
    %329 = arith.mulf %316, %323 : vector<32x128xf32>
    %330 = arith.truncf %329 : vector<32x128xf32> to vector<32x128xbf16>
    %331 = vector.broadcast %325 : vector<1x128xf32> to vector<32x128xf32>
    %332 = arith.mulf %329, %331 : vector<32x128xf32>
    %333 = arith.truncf %332 : vector<32x128xf32> to vector<32x128xbf16>
    %334 = vector.broadcast %8 : vector<1x128xf32> to vector<32x128xf32>
    %335 = arith.mulf %313, %334 : vector<32x128xf32>
    %336 = arith.mulf %335, %316 : vector<32x128xf32>
    %337 = vector.extract_strided_slice %328 {offsets = [0, 0], sizes = [32, 64], strides = [1, 1]} : vector<32x128xbf16> to vector<32x64xbf16>
    %338 = vector.extract_strided_slice %330 {offsets = [0, 0], sizes = [32, 64], strides = [1, 1]} : vector<32x128xbf16> to vector<32x64xbf16>
    %cst_149 = arith.constant dense<0.000000e+00> : vector<32x32xf32>
    %339 = tpu.matmul %337, %338, %cst_149 {dimension_numbers = #tpu.dot_dimension_numbers<[1], [1], [0], [0], [0, 0, 1, 0], [], []>} : vector<32x64xbf16>, vector<32x64xbf16>, vector<32x32xf32> -> vector<32x32xf32>
    %340 = vector.extract_strided_slice %336 {offsets = [0, 0], sizes = [32, 64], strides = [1, 1]} : vector<32x128xf32> to vector<32x64xf32>
    %cst_150 = arith.constant dense<0.000000e+00> : vector<32xf32>
    %341 = vector.multi_reduction <add>, %340, %cst_150 [1] : vector<32x64xf32> to vector<32xf32>
    %342 = vector.shape_cast %341 : vector<32xf32> to vector<32x1xf32>
    %343 = arith.cmpi sgt, %3, %4 : vector<32x32xi32>
    %cst_151 = arith.constant 0.000000e+00 : f32
    %344 = vector.broadcast %cst_151 : f32 to vector<32x32xf32>
    %345 = arith.select %343, %339, %344 : vector<32x32xi1>, vector<32x32xf32>
    %346 = arith.cmpi eq, %3, %4 : vector<32x32xi32>
    %cst_152 = arith.constant 0.000000e+00 : f32
    %347 = vector.shape_cast %342 : vector<32x1xf32> to vector<32x1xf32>
    %348 = vector.broadcast %347 : vector<32x1xf32> to vector<32x32xf32>
    %349 = vector.broadcast %cst_152 : f32 to vector<32x32xf32>
    %350 = arith.select %346, %348, %349 : vector<32x32xi1>, vector<32x32xf32>
    %351 = arith.addf %345, %350 : vector<32x32xf32>
    %352 = vector.extract_strided_slice %318 {offsets = [0, 0], sizes = [32, 64], strides = [1, 1]} : vector<32x128xbf16> to vector<32x64xbf16>
    %c0_153 = arith.constant 0 : index
    %c0_154 = arith.constant 0 : index
    %c0_155 = arith.constant 0 : index
    %353 = vector.load %arg9[%c0_153, %c0_154, %c0_155] : memref<2x64x64xf32, #tpu.memory_space<vmem>>, vector<1x64x64xf32>
    %354 = vector.shape_cast %353 : vector<1x64x64xf32> to vector<64x64xf32>
    %355 = arith.truncf %351 : vector<32x32xf32> to vector<32x32xbf16>
    %cst_156 = arith.constant dense<0.000000e+00> : vector<32x64xf32>
    %356 = tpu.matmul %355, %352, %cst_156 {dimension_numbers = #tpu.dot_dimension_numbers<[1], [0], [0], [1], [0, 0, 1, 1], [], []>} : vector<32x32xbf16>, vector<32x64xbf16>, vector<32x64xf32> -> vector<32x64xf32>
    %357 = arith.truncf %354 : vector<64x64xf32> to vector<64x64xbf16>
    %cst_157 = arith.constant dense<0.000000e+00> : vector<32x64xf32>
    %358 = tpu.matmul %337, %357, %cst_157 {dimension_numbers = #tpu.dot_dimension_numbers<[1], [1], [0], [0], [0, 0, 1, 0], [], []>} : vector<32x64xbf16>, vector<64x64xbf16>, vector<32x64xf32> -> vector<32x64xf32>
    %359 = arith.addf %356, %358 : vector<32x64xf32>
    %360 = arith.truncf %359 : vector<32x64xf32> to vector<32x64xbf16>
    %c0_158 = arith.constant 0 : index
    %c96_159 = arith.constant 96 : index
    %c0_160 = arith.constant 0 : index
    %361 = vector.load %arg8[%c0_158, %c96_159, %c0_160] : memref<1x128x128xbf16, #tpu.memory_space<vmem>>, vector<1x32x64xbf16>
    %362 = vector.shape_cast %361 : vector<1x32x64xbf16> to vector<32x64xbf16>
    %363 = vector.shape_cast %360 : vector<32x64xbf16> to vector<1x32x64xbf16>
    tpu.vector_store %arg8[%c0_158, %c96_159, %c0_160], %363 {strides = array<i32>} : memref<1x128x128xbf16, #tpu.memory_space<vmem>>, vector<1x32x64xbf16>,
    %364 = vector.extract_strided_slice %333 {offsets = [0, 0], sizes = [32, 64], strides = [1, 1]} : vector<32x128xbf16> to vector<32x64xbf16>
    %cst_161 = arith.constant dense<0.000000e+00> : vector<64x64xf32>
    %365 = tpu.matmul %352, %364, %cst_161 {dimension_numbers = #tpu.dot_dimension_numbers<[0], [0], [1], [1], [0, 1, 1, 1], [], []>} : vector<32x64xbf16>, vector<32x64xbf16>, vector<64x64xf32> -> vector<64x64xf32>
    %366 = vector.extract_strided_slice %325 {offsets = [0, 0], sizes = [1, 64], strides = [1, 1]} : vector<1x128xf32> to vector<1x64xf32>
    %367 = vector.broadcast %366 : vector<1x64xf32> to vector<64x64xf32>
    %368 = arith.mulf %367, %354 : vector<64x64xf32>
    %369 = arith.addf %368, %365 : vector<64x64xf32>
    %c0_162 = arith.constant 0 : index
    %c0_163 = arith.constant 0 : index
    %c0_164 = arith.constant 0 : index
    %370 = vector.load %arg9[%c0_162, %c0_163, %c0_164] : memref<2x64x64xf32, #tpu.memory_space<vmem>>, vector<1x64x64xf32>
    %371 = vector.shape_cast %370 : vector<1x64x64xf32> to vector<64x64xf32>
    %372 = vector.shape_cast %369 : vector<64x64xf32> to vector<1x64x64xf32>
    tpu.vector_store %arg9[%c0_162, %c0_163, %c0_164], %372 {strides = array<i32>} : memref<2x64x64xf32, #tpu.memory_space<vmem>>, vector<1x64x64xf32>,
    %373 = vector.extract_strided_slice %328 {offsets = [0, 64], sizes = [32, 64], strides = [1, 1]} : vector<32x128xbf16> to vector<32x64xbf16>
    %374 = vector.extract_strided_slice %330 {offsets = [0, 64], sizes = [32, 64], strides = [1, 1]} : vector<32x128xbf16> to vector<32x64xbf16>
    %cst_165 = arith.constant dense<0.000000e+00> : vector<32x32xf32>
    %375 = tpu.matmul %373, %374, %cst_165 {dimension_numbers = #tpu.dot_dimension_numbers<[1], [1], [0], [0], [0, 0, 1, 0], [], []>} : vector<32x64xbf16>, vector<32x64xbf16>, vector<32x32xf32> -> vector<32x32xf32>
    %376 = vector.extract_strided_slice %336 {offsets = [0, 64], sizes = [32, 64], strides = [1, 1]} : vector<32x128xf32> to vector<32x64xf32>
    %cst_166 = arith.constant dense<0.000000e+00> : vector<32xf32>
    %377 = vector.multi_reduction <add>, %376, %cst_166 [1] : vector<32x64xf32> to vector<32xf32>
    %378 = vector.shape_cast %377 : vector<32xf32> to vector<32x1xf32>
    %379 = arith.cmpi sgt, %3, %4 : vector<32x32xi32>
    %cst_167 = arith.constant 0.000000e+00 : f32
    %380 = vector.broadcast %cst_167 : f32 to vector<32x32xf32>
    %381 = arith.select %379, %375, %380 : vector<32x32xi1>, vector<32x32xf32>
    %382 = arith.cmpi eq, %3, %4 : vector<32x32xi32>
    %cst_168 = arith.constant 0.000000e+00 : f32
    %383 = vector.shape_cast %378 : vector<32x1xf32> to vector<32x1xf32>
    %384 = vector.broadcast %383 : vector<32x1xf32> to vector<32x32xf32>
    %385 = vector.broadcast %cst_168 : f32 to vector<32x32xf32>
    %386 = arith.select %382, %384, %385 : vector<32x32xi1>, vector<32x32xf32>
    %387 = arith.addf %381, %386 : vector<32x32xf32>
    %388 = vector.extract_strided_slice %318 {offsets = [0, 64], sizes = [32, 64], strides = [1, 1]} : vector<32x128xbf16> to vector<32x64xbf16>
    %c1_169 = arith.constant 1 : index
    %c0_170 = arith.constant 0 : index
    %c0_171 = arith.constant 0 : index
    %389 = vector.load %arg9[%c1_169, %c0_170, %c0_171] : memref<2x64x64xf32, #tpu.memory_space<vmem>>, vector<1x64x64xf32>
    %390 = vector.shape_cast %389 : vector<1x64x64xf32> to vector<64x64xf32>
    %391 = arith.truncf %387 : vector<32x32xf32> to vector<32x32xbf16>
    %cst_172 = arith.constant dense<0.000000e+00> : vector<32x64xf32>
    %392 = tpu.matmul %391, %388, %cst_172 {dimension_numbers = #tpu.dot_dimension_numbers<[1], [0], [0], [1], [0, 0, 1, 1], [], []>} : vector<32x32xbf16>, vector<32x64xbf16>, vector<32x64xf32> -> vector<32x64xf32>
    %393 = arith.truncf %390 : vector<64x64xf32> to vector<64x64xbf16>
    %cst_173 = arith.constant dense<0.000000e+00> : vector<32x64xf32>
    %394 = tpu.matmul %373, %393, %cst_173 {dimension_numbers = #tpu.dot_dimension_numbers<[1], [1], [0], [0], [0, 0, 1, 0], [], []>} : vector<32x64xbf16>, vector<64x64xbf16>, vector<32x64xf32> -> vector<32x64xf32>
    %395 = arith.addf %392, %394 : vector<32x64xf32>
    %396 = arith.truncf %395 : vector<32x64xf32> to vector<32x64xbf16>
    %c0_174 = arith.constant 0 : index
    %c96_175 = arith.constant 96 : index
    %c64_176 = arith.constant 64 : index
    %397 = vector.load %arg8[%c0_174, %c96_175, %c64_176] : memref<1x128x128xbf16, #tpu.memory_space<vmem>>, vector<1x32x64xbf16>
    %398 = vector.shape_cast %397 : vector<1x32x64xbf16> to vector<32x64xbf16>
    %399 = vector.shape_cast %396 : vector<32x64xbf16> to vector<1x32x64xbf16>
    tpu.vector_store %arg8[%c0_174, %c96_175, %c64_176], %399 {strides = array<i32>} : memref<1x128x128xbf16, #tpu.memory_space<vmem>>, vector<1x32x64xbf16>,
    %400 = vector.extract_strided_slice %333 {offsets = [0, 64], sizes = [32, 64], strides = [1, 1]} : vector<32x128xbf16> to vector<32x64xbf16>
    %cst_177 = arith.constant dense<0.000000e+00> : vector<64x64xf32>
    %401 = tpu.matmul %388, %400, %cst_177 {dimension_numbers = #tpu.dot_dimension_numbers<[0], [0], [1], [1], [0, 1, 1, 1], [], []>} : vector<32x64xbf16>, vector<32x64xbf16>, vector<64x64xf32> -> vector<64x64xf32>
    %402 = vector.extract_strided_slice %325 {offsets = [0, 64], sizes = [1, 64], strides = [1, 1]} : vector<1x128xf32> to vector<1x64xf32>
    %403 = vector.broadcast %402 : vector<1x64xf32> to vector<64x64xf32>
    %404 = arith.mulf %403, %390 : vector<64x64xf32>
    %405 = arith.addf %404, %401 : vector<64x64xf32>
    %c1_178 = arith.constant 1 : index
    %c0_179 = arith.constant 0 : index
    %c0_180 = arith.constant 0 : index
    %406 = vector.load %arg9[%c1_178, %c0_179, %c0_180] : memref<2x64x64xf32, #tpu.memory_space<vmem>>, vector<1x64x64xf32>
    %407 = vector.shape_cast %406 : vector<1x64x64xf32> to vector<64x64xf32>
    %408 = vector.shape_cast %405 : vector<64x64xf32> to vector<1x64x64xf32>
    tpu.vector_store %arg9[%c1_178, %c0_179, %c0_180], %408 {strides = array<i32>} : memref<2x64x64xf32, #tpu.memory_space<vmem>>, vector<1x64x64xf32>,
    return
  }
  func.func @transform_0(%arg0: i32, %arg1: i32) -> (i32, i32, i32) {
    %c0_i32 = arith.constant 0 : i32
    %c0_i32_0 = arith.constant 0 : i32
    return %arg0, %arg1, %c0_i32 : i32, i32, i32
  }
  func.func @transform_1(%arg0: i32, %arg1: i32) -> (i32, i32, i32) {
    %c0_i32 = arith.constant 0 : i32
    %c0_i32_0 = arith.constant 0 : i32
    return %arg0, %arg1, %c0_i32 : i32, i32, i32
  }
  func.func @transform_2(%arg0: i32, %arg1: i32) -> (i32, i32, i32) {
    %c0_i32 = arith.constant 0 : i32
    %c0_i32_0 = arith.constant 0 : i32
    return %arg0, %arg1, %c0_i32 : i32, i32, i32
  }
  func.func @transform_3(%arg0: i32, %arg1: i32) -> (i32, i32, i32) {
    %c0_i32 = arith.constant 0 : i32
    %c0_i32_0 = arith.constant 0 : i32
    return %arg0, %arg1, %c0_i32 : i32, i32, i32
  }
  func.func @transform_4(%arg0: i32, %arg1: i32) -> (i32, i32) {
    %c0_i32 = arith.constant 0 : i32
    %c0_i32_0 = arith.constant 0 : i32
    %c0_i32_1 = arith.constant 0 : i32
    return %c0_i32, %c0_i32_0 : i32, i32
  }
  func.func @transform_5(%arg0: i32, %arg1: i32) -> (i32, i32, i32) {
    %c0_i32 = arith.constant 0 : i32
    %c0_i32_0 = arith.constant 0 : i32
    %c0_i32_1 = arith.constant 0 : i32
    %c0_i32_2 = arith.constant 0 : i32
    return %c0_i32, %c0_i32_0, %c0_i32_1 : i32, i32, i32
  }
  func.func @transform_6(%arg0: i32, %arg1: i32) -> (i32, i32, i32) {
    %c0_i32 = arith.constant 0 : i32
    %c0_i32_0 = arith.constant 0 : i32
    return %arg0, %arg1, %c0_i32 : i32, i32, i32
  }
}

</mosaic_0001>

<bundles_post_ra>
// kernel: tpu_custom_call.1
= control target key start
LH: loop header
LB: loop body
LE: loop exit
PB: predicated region body
PF: predicated region fallthrough
CT: control target
= control target key end

     0   :  { %s8476_s0 = inlined_call_operand.hbm [shape: bf16[2,128,128], index: 0, kind: input, shape index: {}]   ;;  %s8477_s1 = inlined_call_operand.hbm [shape: bf16[2,128,128], index: 1, kind: input, shape index: {}]   ;;  %s8478_s2 = inlined_call_operand.hbm [shape: bf16[2,128,128], index: 2, kind: input, shape index: {}]   ;;  %s8479_s3 = inlined_call_operand.hbm [shape: f32[2,128,128], index: 3, kind: input, shape index: {}]   ;;  %s8480_s4 = inlined_call_operand.vmem [shape: f32[1,128], index: 4, kind: input, shape index: {}]   ;;  %s8481_s5 = inlined_call_operand.hbm [shape: f32[2,64,64], index: 5, kind: input, shape index: {}]   ;;  %s8482_s6 = inlined_call_operand.hbm [shape: bf16[2,128,128], index: 6, kind: output, shape index: {}]  }
   0x1   :  { %8523 = sst [smem:[#allocation36_spill]] %s8476_s0 }
   0x2   :  { %8524 = sst [smem:[#allocation37_spill]] %s8477_s1 }
   0x3   :  { %8525 = sst [smem:[#allocation38_spill]] %s8481_s5 }
   0x4   :  { %8526 = sst [smem:[#allocation39_spill]] %s8482_s6 }
   0x5   :  { %11 = vsyncpa [#allocation4], 0 }
   0x6   :  { %13 = vsyncpa [#allocation4 + $0x1], 0 }
   0x7   :  { %14 = vsyncpa [#allocation7], 0 }
   0x8   :  { %16 = vsyncpa [#allocation7 + $0x1], 0 }
   0x9   :  { %17 = vsyncpa [#allocation10], 0 }
   0xa   :  { %19 = vsyncpa [#allocation10 + $0x1], 0 }
   0xb   :  { %20 = vsyncpa [#allocation5], 0 }
   0xc   :  { %22 = vsyncpa [#allocation5 + $0x1], 0  ;;  %s6251_s21 = smov 0   ;;  %s6253_s22 = smov 0  }
   0xd   :  { %s6255_s23 = smov 0   ;;  %s6257_s24 = smov 0  }
   0xe   :  { %s6259_s25 = smov 0   ;;  %s6261_s26 = smov 0  }
   0xf LB: > { %8527 = sst [smem:[#allocation18_spill]] %s6181_s21  ;;  %s6282_s27 = sadd.s32 4294967295, %s6201_s26   ;;  %s6201_s26 = sphi %s6261_s26, %s28_s26   ;;  %s6197_s25 = sphi %s6259_s25, %s8635_s25   ;;  %s6193_s24 = sphi %s6257_s24, %s8634_s24   ;;  %s6189_s23 = sphi %s6255_s23, %s8630_s23   ;;  %s6185_s22 = sphi %s6253_s22, %s8633_s22   ;;  %s6181_s21 = sphi %s6251_s21, %s8632_s21  }
  0x10   : > { %8528 = sst [smem:[#allocation19_spill]] %s6189_s23  ;;  %s4817_s28 = sadd.s32 4294967294, %s6201_s26  }
  0x11   : > { %p56_p0 = scmp.ne.s32.totalorder %s6189_s23, %s6185_s22  ;;  %p57_p1 = scmp.eq.s32.totalorder %s6201_s26, 0 }
  0x12   : > { %p62_p2 = scmp.ne.s32.totalorder %s6185_s22, %s6181_s21  ;;  %p8483_p3 = scmp.eq.s32.totalorder %s6282_s27, 0 }
  0x13   : > { %p214_p4 = scmp.eq.s32.totalorder %s6282_s27, 1  ;;  %p6293_p5 = por %p57_p1, %p56_p0 }
  0x14   : > { %p220_p6 = scmp.eq.s32.totalorder %s4817_s28, 1  ;;  %p6299_p7 = por %p8483_p3, %p62_p2 }
  0x15   : > { %s8529_s30 = scalar_select %p6293_p5, 1, 0 }
  0x16   : > { %s8530_s7 = scalar_select %p6299_p7, 1, 0 }
  0x17   : > { %p6303_p8 = por %p214_p4, %p56_p0  ;;  %p6307_p9 = por %p220_p6, %p62_p2 }
  0x18   : > { %p4818_p10 = scmp.ge.s32.totalorder %s6201_s26, 1  ;;  %p227_p11 = scmp.lt.s32.totalorder %s6201_s26, 3 }
  0x19   : > { %s8531_s8 = scalar_select %p6303_p8, 1, 0 }
  0x1a   : > { %s8532_s9 = scalar_select %p6307_p9, 1, 0 }
  0x1b   : > { %p6313_p12 = pnand %p4818_p10, %p227_p11  ;;  %s6203_s11 = smov [#allocation11]  }
  0x1c   : > { %8533 = sst [smem:[#allocation20_spill]] %s8532_s9  ;;  %s242_s12 = sshll.u32 %s6203_s11, 4  ;;  %s6317_s12 = int_to_ptr.vmem [resolvable:$true] %s242_s12 }
  0x1d   : > { %s8534_s10 = scalar_select %p6313_p12, 1, 0 }
  0x1e   : > { %p5795_p13 = pneg %p6313_p12  ;;  %s40_s14 = sadd.s32 1, %s6197_s25 }
  0x1f   : > { %s6331_s15 = sand.u32 1, %s6189_s23   ;;  %p6333_p4 = scmp.ge.s32.totalorder %s40_s14, 2 }
  0x20   : > { %p6325_p2 = pnand %p5795_p13, %p8483_p3  ;;  %s8537_s5 = sld [smem:[#allocation38_spill]] }
  0x21   : > { %s8536_s16 = scalar_select %p6333_p4, 1, 0 }
  0x22   : > { %p5961_p10 = pneg %p6325_p2 }
  0x26   : > { %s5959_s19 = scalar_lea.hbm %s8537_s5, 2048 }
  0x27   : > { %p5960_p6 = scmp.ne.s32.totalorder %s8537_s5, %s5959_s19  ;;  %p5966_p0 = scmp.lt.u32.totalorder %s5959_s19, %s8537_s5 }
  0x29   : > { %p5962_p11 = pnand %p5961_p10, %p5960_p6 }
  0x2b   : > { %p5963_p13 = pneg %p5962_p11 }
  0x2d   : > { %p5968_p3 = pnand %p5966_p0, %p5963_p13 }
  0x2f   : > { %5971 = shalt.err (!%p5968_p3)
}
  0x30   : > { %s5972_s9 = scalar_lea.vmem %s6317_s12, 2048  ;;  %p5980_p7 = scmp.lt.s32.totalorder %s6317_s12, %s6317_s12 }
  0x31   : > { %p5973_p1 = scmp.ne.s32.totalorder %s6317_s12, %s5972_s9  ;;  %p5981_p12 = scmp.lt.s32.totalorder %s5972_s9, %s5972_s9 }
  0x33   : > { %p5975_p9 = pnand %p5973_p1, %p5961_p10  ;;  %p5982_p5 = por %p5981_p12, %p5980_p7 }
  0x35   : > { %p5976_p8 = pneg %p5975_p9 }
  0x37   : > { %p5983_p4 = pnand %p5982_p5, %p5976_p8 }
  0x39   : > { %5986 = shalt.err (!%p5983_p4)
}
  0x3a   : > { %s8488_s17 = smov 128   ;;  %s8489_s29 = smov 8  }
  0x3b   : > { %5798 = dma.hbm_to_vmem [thread:$0]  (!%p6325_p2), %s8537_s5, 2048, %s6317_s12, [#allocation10], %s8488_s17, %s8488_s17, %s8489_s29  }
  0x3c   : > { %p8538_p3 = scmp.ne.s32.totalorder %s8536_s16, 0  ;;  %s6366_s19 = sshll.u32 %s6331_s15, 6 }
  0x3d   : > { %s6369_s20 = sshll.u32 %s6197_s25, 10  ;;  %p8540_p5 = scmp.ne.s32.totalorder %s8529_s30, 0 }
  0x3e   : > { %s8637_s14 = smov (%p8538_p3, %s40_s14), 0  ;;  %p8541_p7 = scmp.lt.s32.totalorder %s6201_s26, 2 }
  0x3f   : > { %8539 = sst [smem:[#allocation21_spill]] %s8637_s14  ;;  %s44_s28 = ssub.s32 %s6197_s25, %s8637_s14 }
  0x40   : > { %p6377_p8 = pnand %p8541_p7, %p8540_p5  ;;  %p47_p9 = scmp.eq.s32.totalorder %s44_s28, 0 }
  0x41   : > { %s8543_s12 = sadd.s32 1, %s6189_s23  ;;  %s8491_s11 = sand.u32 1, %s6201_s26  }
  0x42   : > { %s6384_s16 = scalar_select %p47_p9, %s6189_s23, %s8543_s12  }
  0x43   : > { %s8545_s1 = sld [smem:[#allocation37_spill]]  ;;  %s283_s30 = scalar_lea.vmem [#allocation6], %s6366_s19 }
  0x44   : > { %8544 = sst [smem:[#allocation22_spill]] %s6384_s16  ;;  %s292_s29 = sshll.u32 %s283_s30, 4  ;;  %s6394_s29 = int_to_ptr.vmem [resolvable:$true] %s292_s29 }
  0x45   : > { %s6398_s5 = scalar_lea.sflag [#allocation7], %s8491_s11  ;;  %p6404_p0 = pneg %p6377_p8 }
  0x49   : > { %s6391_s17 = scalar_lea.hbm %s8545_s1, %s6369_s20  ;;  %s5992_s30 = scalar_lea.hbm %s8545_s1, 2048 }
  0x4a   : > { %s5987_s28 = scalar_lea.hbm %s6391_s17, 1024  ;;  %p5993_p4 = scmp.lt.u32.totalorder %s6391_s17, %s8545_s1 }
  0x4b   : > { %p5988_p12 = scmp.ne.s32.totalorder %s6391_s17, %s5987_s28  ;;  %p5994_p6 = scmp.lt.u32.totalorder %s5992_s30, %s5987_s28 }
  0x4c   : > { %p5996_p11 = scmp.lt.u32.totalorder %s5987_s28, %s6391_s17 }
  0x4d   : > { %p5990_p1 = pnand %p6404_p0, %p5988_p12  ;;  %p5995_p10 = por %p5994_p6, %p5993_p4 }
  0x4f   : > { %p5991_p2 = pneg %p5990_p1  ;;  %p5997_p13 = por %p5996_p11, %p5995_p10 }
  0x51   : > { %p5998_p3 = pnand %p5997_p13, %p5991_p2 }
  0x53   : > { %6001 = shalt.err (!%p5998_p3)
}
  0x54   : > { %s6002_s11 = scalar_lea.vmem %s6394_s29, 1024  ;;  %s6206_s9 = smov [#allocation6]  }
  0x55   : > { %p6003_p5 = scmp.ne.s32.totalorder %s6394_s29, %s6002_s11  ;;  %s6007_s18 = sshll.u32 %s6206_s9, 4  ;;  %s6008_s18 = int_to_ptr.vmem [resolvable:$false] %s6007_s18 }
  0x56   : > { %s6009_s14 = scalar_lea.vmem %s6008_s18, 2048  ;;  %p6010_p12 = scmp.lt.s32.totalorder %s6394_s29, %s6008_s18 }
  0x57   : > { %p6005_p7 = pnand %p6003_p5, %p6404_p0  ;;  %p6011_p1 = scmp.lt.s32.totalorder %s6009_s14, %s6002_s11 }
  0x59   : > { %p6006_p9 = pneg %p6005_p7  ;;  %p6012_p4 = por %p6011_p1, %p6010_p12 }
  0x5b   : > { %p6013_p6 = pnand %p6012_p4, %p6006_p9 }
  0x5d   : > { %6016 = shalt.err (!%p6013_p6)
}
  0x5e   : > { %s8495_s16 = smov 64   ;;  %s8497_s28 = smov 4  }
  0x5f   : > { %5805 = dma.hbm_to_vmem [thread:$0]  (!%p6377_p8), %s6391_s17, 1024, %s6394_s29, %s6398_s5, %s8495_s16, %s8495_s16, %s8497_s28  }
  0x60   : > { %s8547_s0 = sld [smem:[#allocation36_spill]]  ;;  %s260_s18 = scalar_lea.vmem [#allocation3], %s6366_s19 }
  0x61   : > { %s269_s14 = sshll.u32 %s260_s18, 4  ;;  %s6444_s21 = scalar_lea.hbm %s8478_s2, %s6369_s20  ;;  %s6438_s14 = int_to_ptr.vmem [resolvable:$true] %s269_s14 }
  0x62   : > { %s257_s6 = scalar_lea.sflag [#allocation4], %s6331_s15 }
  0x66   : > { %s6435_s9 = scalar_lea.hbm %s8547_s0, %s6369_s20  ;;  %s6022_s30 = scalar_lea.hbm %s8547_s0, 2048 }
  0x67   : > { %s6017_s17 = scalar_lea.hbm %s6435_s9, 1024  ;;  %p6023_p13 = scmp.lt.u32.totalorder %s6435_s9, %s8547_s0 }
  0x68   : > { %p6018_p2 = scmp.ne.s32.totalorder %s6435_s9, %s6017_s17  ;;  %p6024_p3 = scmp.lt.u32.totalorder %s6022_s30, %s6017_s17 }
  0x69   : > { %p6026_p7 = scmp.lt.u32.totalorder %s6017_s17, %s6435_s9 }
  0x6a   : > { %p6020_p10 = pnand %p6018_p2, %p6404_p0  ;;  %p6025_p5 = por %p6024_p3, %p6023_p13 }
  0x6c   : > { %p6021_p11 = pneg %p6020_p10  ;;  %p6027_p9 = por %p6026_p7, %p6025_p5 }
  0x6e   : > { %p6028_p12 = pnand %p6027_p9, %p6021_p11 }
  0x70   : > { %6031 = shalt.err (!%p6028_p12)
}
  0x71   : > { %s6032_s1 = scalar_lea.vmem %s6438_s14, 1024  ;;  %s6209_s23 = smov [#allocation3]  }
  0x72   : > { %p6033_p1 = scmp.ne.s32.totalorder %s6438_s14, %s6032_s1  ;;  %s6037_s20 = sshll.u32 %s6209_s23, 4  ;;  %s6038_s20 = int_to_ptr.vmem [resolvable:$false] %s6037_s20 }
  0x73   : > { %s6039_s16 = scalar_lea.vmem %s6038_s20, 2048  ;;  %p6040_p2 = scmp.lt.s32.totalorder %s6438_s14, %s6038_s20 }
  0x74   : > { %p6035_p4 = pnand %p6033_p1, %p6404_p0  ;;  %p6041_p10 = scmp.lt.s32.totalorder %s6039_s16, %s6032_s1 }
  0x76   : > { %p6036_p6 = pneg %p6035_p4  ;;  %p6042_p13 = por %p6041_p10, %p6040_p2 }
  0x78   : > { %p6043_p3 = pnand %p6042_p13, %p6036_p6 }
  0x7a   : > { %6046 = shalt.err (!%p6043_p3)
}
  0x7b   : > { %s8548_s28 = smov 4   ;;  %s8549_s18 = smov 64  }
  0x7c   : > { %5802 = dma.hbm_to_vmem [thread:$0]  (!%p6377_p8), %s6435_s9, 1024, %s6438_s14, %s257_s6, %s8549_s18, %s8549_s18, %s8548_s28  }
  0x7d   : > { %s306_s17 = scalar_lea.vmem [#allocation8], %s6366_s19  ;;  %s4830_s11 = sshll.u32 %s6331_s15, 7 }
  0x7e   : > { %s315_s29 = sshll.u32 %s306_s17, 4  ;;  %s6047_s30 = scalar_lea.hbm %s6444_s21, 1024  ;;  %s6475_s29 = int_to_ptr.vmem [resolvable:$true] %s315_s29 }
  0x7f   : > { %p6048_p11 = scmp.ne.s32.totalorder %s6444_s21, %s6047_s30  ;;  %s6052_s20 = scalar_lea.hbm %s8478_s2, 2048 }
  0x80   : > { %p6053_p9 = scmp.lt.u32.totalorder %s6444_s21, %s8478_s2  ;;  %p6054_p12 = scmp.lt.u32.totalorder %s6052_s20, %s6047_s30 }
  0x81   : > { %p6050_p5 = pnand %p6048_p11, %p6404_p0  ;;  %p6056_p4 = scmp.lt.u32.totalorder %s6047_s30, %s6444_s21 }
  0x82   : > { %p6055_p1 = por %p6054_p12, %p6053_p9 }
  0x83   : > { %p6051_p7 = pneg %p6050_p5 }
  0x84   : > { %p6057_p6 = por %p6056_p4, %p6055_p1 }
  0x86   : > { %p6058_p2 = pnand %p6057_p6, %p6051_p7 }
  0x88   : > { %6061 = shalt.err (!%p6058_p2)
}
  0x89   : > { %s6062_s6 = scalar_lea.vmem %s6475_s29, 1024  ;;  %s6210_s19 = smov [#allocation8]  }
  0x8a   : > { %p6063_p10 = scmp.ne.s32.totalorder %s6475_s29, %s6062_s6  ;;  %s6067_s9 = sshll.u32 %s6210_s19, 4  ;;  %s6068_s9 = int_to_ptr.vmem [resolvable:$false] %s6067_s9 }
  0x8b   : > { %s6069_s0 = scalar_lea.vmem %s6068_s9, 2048  ;;  %p6070_p11 = scmp.lt.s32.totalorder %s6475_s29, %s6068_s9 }
  0x8c   : > { %p6065_p13 = pnand %p6063_p10, %p6404_p0  ;;  %p6071_p5 = scmp.lt.s32.totalorder %s6069_s0, %s6062_s6 }
  0x8e   : > { %p6066_p3 = pneg %p6065_p13  ;;  %p6072_p9 = por %p6071_p5, %p6070_p11 }
  0x90   : > { %p6073_p12 = pnand %p6072_p9, %p6066_p3 }
  0x92   : > { %6076 = shalt.err (!%p6073_p12)
}
  0x93   : > { %5808 = dma.hbm_to_vmem [thread:$0]  (!%p6377_p8), %s6444_s21, 1024, %s6475_s29, %s6398_s5, %s8549_s18, %s8549_s18, %s8548_s28  }
  0x94   : > { %s4989_s14 = sshll.u32 %s6197_s25, 11  ;;  %s329_s17 = scalar_lea.vmem [#allocation9], %s4830_s11 }
  0x95   : > { %s338_s30 = sshll.u32 %s329_s17, 4  ;;  %s6508_s20 = scalar_lea.hbm %s8479_s3, %s4989_s14  ;;  %s6510_s30 = int_to_ptr.vmem [resolvable:$true] %s338_s30 }
  0x96   : > { %s8550_s16 = sand.u32 1, %s6201_s26   ;;  %s6077_s19 = scalar_lea.hbm %s6508_s20, 2048 }
  0x97   : > { %s6514_s6 = scalar_lea.sflag [#allocation10], %s8550_s16  ;;  %p6078_p7 = scmp.ne.s32.totalorder %s6508_s20, %s6077_s19 }
  0x98   : > { %s6082_s15 = scalar_lea.hbm %s8479_s3, 4096  ;;  %p6083_p6 = scmp.lt.u32.totalorder %s6508_s20, %s8479_s3 }
  0x99   : > { %p6080_p1 = pnand %p6078_p7, %p6404_p0  ;;  %p6084_p2 = scmp.lt.u32.totalorder %s6082_s15, %s6077_s19 }
  0x9a   : > { %p6086_p13 = scmp.lt.u32.totalorder %s6077_s19, %s6508_s20 }
  0x9b   : > { %p6081_p4 = pneg %p6080_p1  ;;  %p6085_p10 = por %p6084_p2, %p6083_p6 }
  0x9d   : > { %p6087_p3 = por %p6086_p13, %p6085_p10 }
  0x9f   : > { %p6088_p11 = pnand %p6087_p3, %p6081_p4 }
  0xa1   : > { %6091 = shalt.err (!%p6088_p11)
}
  0xa2   : > { %s6092_s29 = scalar_lea.vmem %s6510_s30, 2048  ;;  %s6211_s11 = smov [#allocation9]  }
  0xa3   : > { %p6093_p5 = scmp.ne.s32.totalorder %s6510_s30, %s6092_s29  ;;  %s6097_s9 = sshll.u32 %s6211_s11, 4  ;;  %s6098_s9 = int_to_ptr.vmem [resolvable:$false] %s6097_s9 }
  0xa4   : > { %s6099_s0 = scalar_lea.vmem %s6098_s9, 4096  ;;  %p6100_p7 = scmp.lt.s32.totalorder %s6510_s30, %s6098_s9 }
  0xa5   : > { %p6095_p9 = pnand %p6093_p5, %p6404_p0  ;;  %p6101_p1 = scmp.lt.s32.totalorder %s6099_s0, %s6092_s29 }
  0xa7   : > { %p6096_p12 = pneg %p6095_p9  ;;  %p6102_p6 = por %p6101_p1, %p6100_p7 }
  0xa9   : > { %p6103_p2 = pnand %p6102_p6, %p6096_p12 }
  0xab   : > { %6106 = shalt.err (!%p6103_p2)
}
  0xac   : > { %s8551_s14 = smov 8   ;;  %s8552_s17 = smov 128  }
  0xad   : > { %5811 = dma.hbm_to_vmem [thread:$0]  (!%p6377_p8), %s6508_s20, 2048, %s6510_s30, %s6514_s6, %s8552_s17, %s8552_s17, %s8551_s14  }
  0xae   : > { %p8553_p0 = scmp.ne.s32.totalorder %s8534_s10, 0 }
  0xb0   : > { %350 = sbr.rel (%p8553_p0) target bundleno = 2780 (0xadc), region = 44 }
  0xb7   : > { %s6544_s12 = sand.u32 1, %s6185_s22   ;;  %p8554_p4 = scmp.ne.s32.totalorder %s8530_s7, 0 }
  0xb8   : > { %s6547_s1 = sshll.u32 %s6544_s12, 6  ;;  %s353_s13 = scalar_lea.sflag [#allocation4], %s6544_s12 }
  0xb9   : > { %s6551_s23 = scalar_lea.vmem [#allocation3], %s6547_s1 }
  0xba   : > { %6160 = dma.done.wait (%p8554_p4), %s353_s13, 1024  }
  0xbb   : > { %6162 = vsyncadd (%p8554_p4), %s353_s13, 4294966272  ;;  %s361_s10 = sand.u32 1, %s6282_s27   ;;  %s6559_s20 = scalar_lea.vmem [#allocation6], %s6547_s1 }
  0xbc   : > { %s362_s30 = scalar_lea.sflag [#allocation7], %s361_s10 }
  0xbd   : > { %6164 = dma.done.wait (%p8554_p4), %s362_s30, 2048  }
  0xbe   : > { %6166 = vsyncadd (%p8554_p4), %s362_s30, 4294965248  ;;  %s4837_s16 = sshll.u32 %s6544_s12, 7  ;;  %s6567_s6 = scalar_lea.vmem [#allocation8], %s6547_s1 }
  0xbf   : > { %s380_s19 = scalar_lea.sflag [#allocation10], %s361_s10  ;;  %s6569_s5 = scalar_lea.vmem [#allocation9], %s4837_s16 }
  0xc0   : > { %6168 = dma.done.wait (%p8554_p4), %s380_s19, 2048  }
  0xc1   : > { %6170 = vsyncadd (%p8554_p4), %s380_s19, 4294965248  ;;  %p8555_p8 = scmp.eq.s32.totalorder %s6282_s27, 0 }
  0xc3   : > { %6172 = dma.done.wait (%p8555_p8), [#allocation10], 2048   ;;  %p8556_p10 = pmov %p8555_p8 }
  0xc4   : > { %v474_v0 = vlaneseq  ;;  %vm518_vm0 = vcmask 261120   ;;  %v6212_v3 = vmov 0.0   ;;  %v6593_v6 = vld [vmem:[%s6569_s5] sm:$0xff]  ;;  %v6596_v7 = vld [vmem:[%s6569_s5 + $0x8] sm:$0xff]  ;;  %v6599_v8 = vld [vmem:[%s6569_s5 + $0x10] sm:$0xff]  ;;  %vm457_vm2 = vcmask 523264  }
  0xc5   : > { %6174 = vsyncadd (%p8556_p10), [#allocation10], 4294965248  ;;  %v5669_v9 = vpack.c.bf16 %v6596_v7, %v6593_v6  ;;  %v6604_v10 = vld [vmem:[%s6569_s5 + $0x18] sm:$0xff]  ;;  %v6614_v13 = vld [vmem:[%s6567_s6] sm:$0xff]   ;;  %s6213_s27 = smov 64   ;;  %vm929_vm14 = vcmask 519168  }
  0xc6   : > { %v6579_v1 = vshrl.u32 %v474_v0, 7  ;;  %v6581_v2 = vand.u32 127, %v474_v0  ;;  %v5673_v11 = vpack.c.bf16 %v6604_v10, %v6599_v8  ;;  %1240 = vrot.lane.b32.xlu0 %v6614_v13, %s6213_s27  ;;  %v6619_v14 = vld [vmem:[%s6567_s6 + $0x8] sm:$0xff]   ;;  %v441_v15 = vld [vmem:[#allocation11] sm:$0xff]  ;;  %v443_v40 = vld [vmem:[#allocation11 + $0x10] sm:$0xff]  ;;  %s7135_s15 = scalar_lea.vmem [#allocation12], %s6547_s1 }
  0xc7   : > { %5670 = vmatprep.subr.bf16.mxu1 %v5669_v9  ;;  %v442_v16 = vld [vmem:[#allocation11 + $0x8] sm:$0xff]  ;;  %v6629_v19 = vld [vmem:[%s8480_s4] ss:$0 sm:$0xff]  ;;  %458 = vst.msk [vmem:[#allocation2] sm:$0xff] %vm457_vm2, %v441_v15  ;;  %v444_v41 = vld [vmem:[#allocation11 + $0x18] sm:$0xff]  ;;  %vm1325_vm15 = vcmask 1043968  }
  0xc8   : > { %vm481_vm1 = vcmp.ge.s32.totalorder %v6579_v1, %v6581_v2  ;;  %v6588_v5 = vadd.s32 8, %v6579_v1  ;;  %v6611_v12 = vadd.s32 16, %v6579_v1  ;;  %5672 = vmatpush3.bf16.msra.mxu1 %v5669_v9  ;;  %v6624_v18 = vadd.s32 24, %v6579_v1  ;;  %459 = vst.msk [vmem:[#allocation2 + $0x8] sm:$0xff] %vm457_vm2, %v442_v16  ;;  %v6634_v20 = vld [vmem:[%s6551_s23] sm:$0xff]   ;;  %v6675_v33 = vld [vmem:[%s6551_s23 + $0x8] sm:$0xff]  }
  0xc9   : > { %v6585_v4 = vsel %vm481_vm1, 1.0, %v6212_v3  ;;  %5674 = vmatprep.subr.bf16.mxu1 %v5673_v11  ;;  %v6637_v21 = vld [vmem:[%s6559_s20] sm:$0xff]   ;;  %v5025_v22 = vunpack.c.l.bf16 %v6634_v20  ;;  %v5029_v34 = vunpack.c.l.bf16 %v6675_v33  ;;  %v6679_v35 = vld [vmem:[%s6559_s20 + $0x8] sm:$0xff]   ;;  %460 = vst.msk [vmem:[#allocation2 + $0x10] sm:$0xff] %vm457_vm2, %v443_v40  ;;  %461 = vst.msk [vmem:[#allocation2 + $0x18] sm:$0xff] %vm457_vm2, %v444_v41  ;;  %v5026_v42 = vunpack.c.h.bf16 %v6634_v20  ;;  %s5022_s9 = sshll.u32 %s6193_s24, 10 }
  0xca   : > { %5301 = vmatprep.mubr.msk.f32.mxu1 %vm518_vm0, %v6585_v4  ;;  %vm482_vm3 = vcmp.ge.s32.totalorder %v6588_v5, %v6581_v2  ;;  %vm483_vm4 = vcmp.ge.s32.totalorder %v6611_v12, %v6581_v2  ;;  %v5033_v23 = vunpack.c.l.bf16 %v6637_v21  ;;  %1242 = vrot.lane.b32.xlu0 %v6619_v14, %s6213_s27  ;;  %vm484_vm5 = vcmp.ge.s32.totalorder %v6624_v18, %v6581_v2  ;;  %v445_v52 = vld [vmem:[#allocation11 + $0x20] sm:$0xff]  ;;  %v446_v54 = vld [vmem:[#allocation11 + $0x28] sm:$0xff]  ;;  %v447_v59 = vld [vmem:[#allocation11 + $0x30] sm:$0xff]  ;;  %s4645_s0 = sshll.u32 %s7135_s15, 4  ;;  %s8623_s1 = sld [smem:[#allocation39_spill]]  ;;  %s8415_s0 = int_to_ptr.vmem [resolvable:$true] %s4645_s0 }
  0xcb   : > { %v6621_v17 = vsel %vm482_vm3, 1.0, %v6212_v3  ;;  %v669_v24 = vmul.f32 %v5025_v22, %v6629_v19  ;;  %v6648_v25 = vsel %vm483_vm4, 1.0, %v6212_v3  ;;  %v6660_v27 = vsel %vm484_vm5, 1.0, %v6212_v3  ;;  %462 = vst.msk [vmem:[#allocation2 + $0x20] sm:$0xff] %vm457_vm2, %v445_v52  ;;  %463 = vst.msk [vmem:[#allocation2 + $0x28] sm:$0xff] %vm457_vm2, %v446_v54  ;;  %v448_v60 = vld [vmem:[#allocation11 + $0x38] sm:$0xff] }
  0xcc   : > { %5676 = vmatpush3.bf16.msra.mxu1 %v5673_v11  ;;  %v5037_v36 = vunpack.c.l.bf16 %v6679_v35  ;;  %v671_v37 = vmul.f32 %v5029_v34, %v6629_v19  ;;  %v5034_v43 = vunpack.c.h.bf16 %v6637_v21  ;;  %v670_v44 = vmul.f32 %v5026_v42, %v6629_v19  ;;  %464 = vst.msk [vmem:[#allocation2 + $0x30] sm:$0xff] %vm457_vm2, %v447_v59  ;;  %465 = vst.msk [vmem:[#allocation2 + $0x38] sm:$0xff] %vm457_vm2, %v448_v60  ;;  %s4630_s24 = scalar_lea.sflag [#allocation5], %s6544_s12  ;;  %p8624_p3 = scmp.ne.s32.totalorder %s8531_s8, 0 }
  0xcd   : > { %v6654_v26 = vmul.f32 %v5033_v23, %v669_v24  ;;  %v5030_v46 = vunpack.c.h.bf16 %v6675_v33  ;;  %v5038_v50 = vunpack.c.h.bf16 %v6679_v35  ;;  %vm6887_vm6 = vcmp.gt.s32.totalorder %v6611_v12, %v6581_v2  ;;  %s6214_s10 = smov [#allocation12]  }
  0xce   : > { %v6662_v28 = vld [vmem:[#allocation2] sm:$0xff]  ;;  %v6687_v38 = vmul.f32 %v5037_v36, %v671_v37  ;;  %v6700_v45 = vmul.f32 %v5034_v43, %v670_v44  ;;  %vm6893_vm7 = vcmp.eq.s32.totalorder %v6611_v12, %v6581_v2  ;;  %vm6900_vm8 = vcmp.eq.s32.totalorder %v6579_v1, %v6581_v2  ;;  %s6111_s30 = sshll.u32 %s6214_s10, 4  ;;  %s6112_s30 = int_to_ptr.vmem [resolvable:$false] %s6111_s30 }
  0xcf   : > { %5302 = vmatmul.mubr.msk.f32.vlgmr.msra.gmra.mrb[0].mxu1 %vm518_vm0, %v6621_v17  ;;  %v6664_v29 = vld [vmem:[#allocation2 + $0x8] sm:$0xff]  ;;  %v739_v30 = vsel %vm457_vm2, %v6654_v26, 0.0  ;;  %v672_v51 = vmul.f32 %v5030_v46, %v6629_v19  ;;  %vm6907_vm9 = vcmp.gt.s32.totalorder %v6579_v1, %v6581_v2  ;;  %vm6913_vm10 = vcmp.gt.s32.totalorder %v6624_v18, %v6581_v2  ;;  %p6114_p9 = scmp.lt.s32.totalorder %s8415_s0, %s6112_s30 }
  0xd0   : > { %5304 = vmatprep.mubr.msk.f32.mxu1 %vm518_vm0, %v6648_v25  ;;  %v781_v31 = vpack.c.bf16 %v6664_v29, %v6662_v28  ;;  %740 = vadd.xlane.f32.xlu1 %v739_v30  ;;  %v745_v39 = vsel %vm457_vm2, %v6687_v38, 0.0  ;;  %v742_v47 = vsel %vm457_vm2, %v6700_v45, 0.0  ;;  %v6705_v48 = vld [vmem:[#allocation2 + $0x10] sm:$0xff]  ;;  %v6707_v49 = vld [vmem:[#allocation2 + $0x18] sm:$0xff]  ;;  %vm6919_vm11 = vcmp.eq.s32.totalorder %v6624_v18, %v6581_v2  ;;  %s8411_s13 = scalar_lea.hbm %s8623_s1, %s5022_s9 }
  0xd1   : > { %v782_v53 = vpack.c.bf16 %v6707_v49, %v6705_v48  ;;  %v6718_v55 = vmul.f32 %v5038_v50, %v672_v51  ;;  %vm6925_vm12 = vcmp.gt.s32.totalorder %v6588_v5, %v6581_v2  ;;  %vm6931_vm13 = vcmp.eq.s32.totalorder %v6588_v5, %v6581_v2 }
  0xd2   : > { %5735 = vmatprep.subr.msk.bf16.mxu0 %vm457_vm2, %v781_v31  ;;  %v786_v32 = vsel %vm457_vm2, %v781_v31, 0  ;;  %v6725_v58 = vld [vmem:[#allocation2 + $0x20] sm:$0xff]  ;;  %v6727_v61 = vld [vmem:[#allocation2 + $0x28] sm:$0xff] }
  0xd3   : > { %5305 = vmatmul.mubr.msk.f32.gmra.mrb[2].mxu1 %vm518_vm0, %v6660_v27  ;;  %5316 = vmatpush3.bf16.xpose.msra.mxu0 %v786_v32  ;;  %v789_v56 = vsel %vm457_vm2, %v782_v53, 0  ;;  %v748_v57 = vsel %vm457_vm2, %v6718_v55, 0.0  ;;  %v783_v62 = vpack.c.bf16 %v6727_v61, %v6725_v58  ;;  %v6735_v0 = vld [vmem:[#allocation2 + $0x30] sm:$0xff]  ;;  %v6737_v3 = vld [vmem:[#allocation2 + $0x38] sm:$0xff] }
  0xd4   : > { %743 = vadd.xlane.f32.xlu1 %v742_v47  ;;  %5736 = vmatprep.subr.msk.bf16.mxu0 %vm457_vm2, %v782_v53  ;;  %v784_v9 = vpack.c.bf16 %v6737_v3, %v6735_v0 }
  0xd5   : > { %v792_v63 = vsel %vm457_vm2, %v783_v62, 0 }
  0xd6   : > { %v795_v11 = vsel %vm457_vm2, %v784_v9, 0 }
  0xd8   : > { %749 = vadd.xlane.f32.xlu1 %v748_v57 }
  0xdb   : > { %5318 = vmatpush3.bf16.xpose.msra.mxu0 %v789_v56 }
  0xdc   : > { %5737 = vmatprep.subr.msk.bf16.mxu0 %vm457_vm2, %v783_v62 }
  0xe3   : > { %5320 = vmatpush3.bf16.xpose.msra.mxu0 %v792_v63 }
  0xe4   : > { %5738 = vmatprep.subr.msk.bf16.mxu0 %vm457_vm2, %v784_v9 }
  0xe9   : > { %746 = vadd.xlane.f32.xlu0 %v745_v39 }
  0xeb   : > { %5322 = vmatpush3.bf16.xpose.msra.mxu0 %v795_v11 }
  0xec   : > { %5327 = vmatprep.subr.bf16.mxu0 %v6614_v13 }
 0x1a2   : > { %v5303_v15 = vpop.f32.mrb[0].mxu1 }
 0x1a3   : > { %v617_v16 = vsub.f32 %v5303_v15, %v6596_v7  ;;  %v621_v24 = vsub.f32 0.0, %v5303_v15  ;;  %v597_v30 = vpop.f32.mrb[1].mxu1 }
 0x1a4   : > { %v616_v31 = vsub.f32 %v597_v30, %v6593_v6  ;;  %v620_v32 = vsub.f32 0.0, %v597_v30 }
 0x1a5   : > { %v626_v37 = vmul.f32 1.442695, %v621_v24  ;;  %v635_v39 = vmul.f32 1.442695, %v617_v16 }
 0x1a6   : > { %v624_v40 = vmul.f32 1.442695, %v620_v32  ;;  %v633_v41 = vmul.f32 1.442695, %v616_v31  ;;  %v5306_v44 = vpop.f32.mrb[2].mxu1 }
 0x1a7   : > { %5885 = vpow2.f32 %v626_v37  ;;  %v619_v47 = vsub.f32 %v5306_v44, %v6604_v10  ;;  %v623_v51 = vsub.f32 0.0, %v5306_v44  ;;  %v607_v52 = vpop.f32.mrb[3].mxu1 }
 0x1a8   : > { %5887 = vpow2.f32 %v635_v39  ;;  %v618_v53 = vsub.f32 %v607_v52, %v6599_v8  ;;  %v622_v54 = vsub.f32 0.0, %v607_v52  ;;  %v450_v52 = vld [vmem:[#allocation11 + $0x48] sm:$0xff] }
 0x1a9   : > { %5889 = vpow2.f32 %v624_v40  ;;  %v630_v7 = vmul.f32 1.442695, %v623_v51  ;;  %v639_v56 = vmul.f32 1.442695, %v619_v47  ;;  %v6799_v47 = vpop.permute.xlu0 %1240  ;;  %v449_v51 = vld [vmem:[#allocation11 + $0x40] sm:$0xff]  ;;  %467 = vst.msk [vmem:[#allocation2 + $0x48] sm:$0xff] %vm457_vm2, %v450_v52 }
 0x1aa   : > { %5891 = vpow2.f32 %v633_v41  ;;  %v628_v6 = vmul.f32 1.442695, %v622_v54  ;;  %v637_v57 = vmul.f32 1.442695, %v618_v53  ;;  %466 = vst.msk [vmem:[#allocation2 + $0x40] sm:$0xff] %vm457_vm2, %v449_v51  ;;  %v452_v53 = vld [vmem:[#allocation11 + $0x58] sm:$0xff] }
 0x1ab   : > { %5893 = vpow2.f32 %v630_v7  ;;  %469 = vst.msk [vmem:[#allocation2 + $0x58] sm:$0xff] %vm457_vm2, %v452_v53  ;;  %v455_v54 = vld [vmem:[#allocation11 + $0x70] sm:$0xff]  ;;  %v456_v7 = vld [vmem:[#allocation11 + $0x78] sm:$0xff] }
 0x1ac   : > { %5895 = vpow2.f32 %v639_v56  ;;  %472 = vst.msk [vmem:[#allocation2 + $0x70] sm:$0xff] %vm457_vm2, %v455_v54  ;;  %473 = vst.msk [vmem:[#allocation2 + $0x78] sm:$0xff] %vm457_vm2, %v456_v7 }
 0x1ad   : > { %5897 = vpow2.f32 %v628_v6  ;;  %v6817_v6 = vpop.xlane.xlu1 %740 }
 0x1ae   : > { %5899 = vpow2.f32 %v637_v57 }
 0x1b1   : > { %v5886_v59 = vpop.eup %5885 }
 0x1b2   : > { %v5888_v60 = vpop.eup %5887  ;;  %v648_v10 = vmul.f32 %v5886_v59, %v5034_v43 }
 0x1b3   : > { %v5890_v62 = vpop.eup %5889  ;;  %v642_v8 = vmul.f32 %v5888_v60, %v5026_v42  ;;  %v6876_v54 = vld [vmem:[#allocation2 + $0x78] sm:$0xff] }
 0x1b4   : > { %v5892_v63 = vpop.eup %5891  ;;  %v647_v9 = vmul.f32 %v5890_v62, %v5033_v23 }
 0x1b5   : > { %v5894_v11 = vpop.eup %5893  ;;  %v641_v15 = vmul.f32 %v5892_v63, %v5025_v22 }
 0x1b6   : > { %v5896_v16 = vpop.eup %5895  ;;  %5901 = vrcp.f32 %v5894_v11  ;;  %v651_v24 = vpack.c.bf16 %v648_v10, %v647_v9  ;;  %v650_v30 = vmul.f32 %v5894_v11, %v5038_v50  ;;  %v6772_v50 = vsub.s32 7, %v6579_v1 }
 0x1b7   : > { %v5898_v31 = vpop.eup %5897  ;;  %v644_v43 = vmul.f32 %v5896_v16, %v5030_v46  ;;  %v645_v32 = vpack.c.bf16 %v642_v8, %v641_v15 }
 0x1b8   : > { %v5900_v42 = vpop.eup %5899  ;;  %5733 = vmatprep.subr.msk.bf16.mxu1 %vm457_vm2, %v651_v24  ;;  %1059 = vrot.lane.b32.xlu0 %v651_v24, %s6213_s27  ;;  %v685_v21 = vsel %vm457_vm2, %v651_v24, 0  ;;  %v649_v20 = vmul.f32 %v5898_v31, %v5037_v36 }
 0x1b9   : > { %5311 = vmatprep.mubr.msk.bf16.mxu1 %vm457_vm2, %v645_v32  ;;  %5323 = vmatprep.mubr.msk.bf16.mxu0 %vm457_vm2, %v645_v32  ;;  %v643_v22 = vmul.f32 %v5900_v42, %v5029_v34 }
 0x1ba   : > { %5308 = vmatpush3.bf16.xpose.msra.mxu1 %v685_v21  ;;  %v652_v23 = vpack.c.bf16 %v650_v30, %v649_v20 }
 0x1bb   : > { %v646_v46 = vpack.c.bf16 %v644_v43, %v643_v22 }
 0x1bc   : > { %1061 = vrot.lane.b32.xlu0 %v652_v23, %s6213_s27  ;;  %5734 = vmatprep.subr.msk.bf16.mxu1 %vm457_vm2, %v652_v23  ;;  %v688_v35 = vsel %vm457_vm2, %v652_v23, 0 }
 0x1bd   : > { %5324 = vmatmul.mubr.msk.bf16.vlgmr.msra.gmra.mrb[0].mxu0 %vm457_vm2, %v646_v46 }
 0x1be   : > { %5328 = vmatpush3.bf16.msra.mxu0 %v6614_v13 }
 0x1bf   : > { %5329 = vmatprep.subr.bf16.mxu0 %v6619_v14 }
 0x1c0   : > { %v5902_v33 = vpop.eup %5901  ;;  %1053 = vrot.lane.b32.xlu0 %v645_v32, %s6213_s27 }
 0x1c1   : > { %v6780_v34 = vrot.slane %v5902_v33, %v6772_v50  ;;  %v6847_v33 = vld [vmem:[#allocation2 + $0x48] sm:$0xff] }
 0x1c2   : > { %5310 = vmatpush3.bf16.xpose.msra.mxu1 %v688_v35  ;;  %5330 = vmatpush3.bf16.msra.mxu0 %v6619_v14  ;;  %v6845_v35 = vld [vmem:[#allocation2 + $0x40] sm:$0xff] }
 0x1c3   : > { %v657_v36 = vmul.f32 %v6780_v34, %v647_v9  ;;  %v658_v37 = vmul.f32 %v6780_v34, %v648_v10  ;;  %v659_v39 = vmul.f32 %v6780_v34, %v649_v20  ;;  %v660_v40 = vmul.f32 %v6780_v34, %v650_v30 }
 0x1c4   : > { %1055 = vrot.lane.b32.xlu0 %v646_v46, %s6213_s27 }
 0x1c5   : > { %v661_v41 = vpack.c.bf16 %v658_v37, %v657_v36  ;;  %v662_v44 = vpack.c.bf16 %v660_v40, %v659_v39  ;;  %v1175_v36 = vpack.c.bf16 %v6847_v33, %v6845_v35 }
 0x1c7   : > { %5335 = vmatprep.subr.bf16.mxu1 %v661_v41  ;;  %1348 = vrot.lane.b32.xlu1 %v661_v41, %s6213_s27 }
 0x1c8   : > { %1128 = vrot.lane.b32.xlu0 %v6654_v26, %s6213_s27  ;;  %v6802_v26 = vpop.permute.xlu0 %1242 }
 0x1c9   : > { %5312 = vmatmul.mubr.msk.bf16.vlgmr.msra.gmra.mrb[4].mxu1 %vm457_vm2, %v646_v46 }
 0x1ca   : > { %5336 = vmatpush3.bf16.msra.mxu1 %v661_v41  ;;  %v6858_v41 = vld [vmem:[#allocation2 + $0x58] sm:$0xff] }
 0x1cb   : > { %5337 = vmatprep.subr.bf16.mxu1 %v662_v44  ;;  %1350 = vrot.lane.b32.xlu1 %v662_v44, %s6213_s27 }
 0x1cc   : > { %1130 = vrot.lane.b32.xlu0 %v6700_v45, %s6213_s27  ;;  %v451_v45 = vld [vmem:[#allocation11 + $0x50] sm:$0xff]  ;;  %v6815_v56 = vpop.xlane.xlu0 %746 }
 0x1cd   : > { %468 = vst.msk [vmem:[#allocation2 + $0x50] sm:$0xff] %vm457_vm2, %v451_v45  ;;  %v765_v18 = vsel %vm6893_vm7, %v6815_v56, 0.0 }
 0x1ce   : > { %5338 = vmatpush3.bf16.msra.mxu1 %v662_v44  ;;  %v1180_v44 = vsel %vm457_vm2, %v1175_v36, 0 }
 0x1d0   : > { %1132 = vrot.lane.b32.xlu0 %v6687_v38, %s6213_s27  ;;  %v453_v38 = vld [vmem:[#allocation11 + $0x60] sm:$0xff] }
 0x1d1   : > { %470 = vst.msk [vmem:[#allocation2 + $0x60] sm:$0xff] %vm457_vm2, %v453_v38 }
 0x1d4   : > { %1134 = vrot.lane.b32.xlu0 %v6718_v55, %s6213_s27  ;;  %v454_v55 = vld [vmem:[#allocation11 + $0x68] sm:$0xff]  ;;  %v6856_v40 = vld [vmem:[#allocation2 + $0x50] sm:$0xff] }
 0x1d5   : > { %471 = vst.msk [vmem:[#allocation2 + $0x68] sm:$0xff] %vm457_vm2, %v454_v55  ;;  %v1176_v51 = vpack.c.bf16 %v6858_v41, %v6856_v40  ;;  %v6874_v55 = vld [vmem:[#allocation2 + $0x70] sm:$0xff] }
 0x1d7   : > { %v1183_v53 = vsel %vm457_vm2, %v1176_v51, 0 }
 0x1d8   : > { %v6866_v52 = vld [vmem:[#allocation2 + $0x60] sm:$0xff] }
 0x1dc   : > { %v6868_v45 = vld [vmem:[#allocation2 + $0x68] sm:$0xff] }
 0x1dd   : > { %v1177_v38 = vpack.c.bf16 %v6868_v45, %v6866_v52 }
 0x1df   : > { %v1186_v7 = vsel %vm457_vm2, %v1177_v38, 0 }
 0x1ee   : > { %1330 = vxpose.xlu1.c.b16.start [1/2] (short) (narrow) %v6799_v47, 64 }
 0x1f2   : > { %1331 = vxpose.xlu1.c.b16.end [2/2] (short) (narrow) %v6802_v26, 64 }
 0x1fb   : > { %934 = vxpose.xlu1.c.b16.start [1/2] (short) (narrow) %v6614_v13, 64  ;;  %v6820_v13 = vpop.xlane.xlu1 %743 }
 0x1ff   : > { %935 = vxpose.xlu1.c.b16.end [2/2] (short) (narrow) %v6619_v14, 64  ;;  %v6822_v60 = vpop.xlane.xlu1 %749 }
 0x200   : > { %v766_v5 = vsel %vm6919_vm11, %v6822_v60, 0.0  ;;  %v6958_v60 = vld [vmem:[%s6569_s5 + $0x20] sm:$0xff] }
 0x22a   : > { %v1060_v57 = vpop.permute.xlu0 %1059 }
 0x22b   : > { %5739 = vmatprep.subr.msk.bf16.mxu1 %vm457_vm2, %v1060_v57  ;;  %v1070_v23 = vsel %vm457_vm2, %v1060_v57, 0  ;;  %v1178_v57 = vpack.c.bf16 %v6876_v54, %v6874_v55 }
 0x22e   : > { %v1062_v14 = vpop.permute.xlu0 %1061 }
 0x22f   : > { %v1073_v39 = vsel %vm457_vm2, %v1062_v14, 0 }
 0x232   : > { %v1054_v59 = vpop.permute.xlu0 %1053 }
 0x236   : > { %v1056_v10 = vpop.permute.xlu0 %1055 }
 0x239   : > { %v6824_v62 = vpop.permute.xlu1 %1348 }
 0x23a   : > { %5375 = vmatprep.subr.bf16.mxu0 %v6824_v62  ;;  %v1129_v8 = vpop.permute.xlu0 %1128 }
 0x23b   : > { %v1140_v63 = vsel %vm457_vm2, %v1129_v8, 0.0 }
 0x23c   : > { %1141 = vadd.xlane.f32.xlu1 %v1140_v63 }
 0x23d   : > { %v6831_v31 = vpop.permute.xlu1 %1350 }
 0x23e   : > { %v1131_v9 = vpop.permute.xlu0 %1130 }
 0x23f   : > { %v1143_v15 = vsel %vm457_vm2, %v1131_v9, 0.0 }
 0x240   : > { %1144 = vadd.xlane.f32.xlu0 %v1143_v15 }
 0x242   : > { %v1133_v11 = vpop.permute.xlu0 %1132 }
 0x243   : > { %v1146_v16 = vsel %vm457_vm2, %v1133_v11, 0.0 }
 0x244   : > { %1147 = vadd.xlane.f32.xlu1 %v1146_v16 }
 0x246   : > { %v1135_v24 = vpop.permute.xlu0 %1134 }
 0x247   : > { %v1149_v30 = vsel %vm457_vm2, %v1135_v24, 0.0  ;;  %v763_v24 = vsel %vm6900_vm8, %v6817_v6, 0.0  ;;  %v764_v6 = vsel %vm6931_vm13, %v6820_v13, 0.0 }
 0x248   : > { %1150 = vadd.xlane.f32.xlu1 %v1149_v30 }
 0x254   : > { %v6833_v43 = vpop.trf.xlu1 }
 0x258   : > { %v6835_v32 = vpop.trf.xlu1 }
 0x25c   : > { %v6837_v42 = vpop.trf.xlu1 }
 0x260   : > { %v6839_v21 = vpop.trf.xlu1 }
 0x264   : > { %v942_v20 = vpop.trf.xlu1 }
 0x265   : > { %5339 = vmatprep.mubr.msk.bf16.mxu1 %vm518_vm0, %v942_v20 }
 0x268   : > { %v943_v22 = vpop.trf.xlu1 }
 0x269   : > { %5340 = vmatmul.mubr.msk.bf16.vlgmr.msra.gmra.mrb[8].mxu1 %vm518_vm0, %v943_v22 }
 0x26a   : > { %5348 = vmatpush3.bf16.xpose.msra.mxu1 %v1070_v23 }
 0x26b   : > { %5740 = vmatprep.subr.msk.bf16.mxu1 %vm457_vm2, %v1062_v14  ;;  %v1189_v14 = vsel %vm457_vm2, %v1178_v57, 0 }
 0x26c   : > { %v944_v46 = vpop.trf.xlu1 }
 0x26d   : > { %5343 = vmatprep.mubr.msk.bf16.mxu1 %vm518_vm0, %v944_v46 }
 0x270   : > { %v945_v37 = vpop.trf.xlu1 }
 0x271   : > { %5344 = vmatmul.mubr.msk.bf16.gmra.mrb[12].mxu1 %vm518_vm0, %v945_v37 }
 0x272   : > { %5350 = vmatpush3.bf16.xpose.msra.mxu1 %v1073_v39  ;;  %5351 = vmatprep.mubr.msk.bf16.mxu1 %vm457_vm2, %v1054_v59 }
 0x273   : > { %5741 = vmatprep.subr.msk.bf16.mxu1 %vm457_vm2, %v1175_v36 }
 0x279   : > { %5352 = vmatmul.mubr.msk.bf16.vlgmr.msra.gmra.mrb[16].mxu1 %vm457_vm2, %v1056_v10 }
 0x27a   : > { %5356 = vmatpush3.bf16.xpose.msra.mxu1 %v1180_v44  ;;  %5363 = vmatprep.mubr.msk.bf16.mxu1 %vm457_vm2, %v1054_v59  ;;  %v6961_v44 = vld [vmem:[%s6569_s5 + $0x28] sm:$0xff] }
 0x27b   : > { %5742 = vmatprep.subr.msk.bf16.mxu1 %vm457_vm2, %v1176_v51  ;;  %v5677_v13 = vpack.c.bf16 %v6961_v44, %v6958_v60  ;;  %v6971_v51 = vld [vmem:[%s6569_s5 + $0x30] sm:$0xff] }
 0x282   : > { %5358 = vmatpush3.bf16.xpose.msra.mxu1 %v1183_v53  ;;  %v6974_v53 = vld [vmem:[%s6569_s5 + $0x38] sm:$0xff] }
 0x283   : > { %5743 = vmatprep.subr.msk.bf16.mxu1 %vm457_vm2, %v1177_v38 }
 0x28a   : > { %5360 = vmatpush3.bf16.xpose.msra.mxu1 %v1186_v7 }
 0x28b   : > { %5744 = vmatprep.subr.msk.bf16.mxu1 %vm457_vm2, %v1178_v57 }
 0x292   : > { %5362 = vmatpush3.bf16.xpose.msra.mxu1 %v1189_v14  ;;  %v7019_v14 = vld [vmem:[%s6551_s23 + $0x18] sm:$0xff]  }
 0x293   : > { %5367 = vmatprep.subr.bf16.mxu1 %v6799_v47 }
 0x299   : > { %5364 = vmatmul.mubr.msk.bf16.vlgmr.msra.gmra.mrb[20].mxu1 %vm457_vm2, %v1056_v10 }
 0x29a   : > { %5368 = vmatpush3.bf16.msra.mxu1 %v6799_v47 }
 0x29b   : > { %5369 = vmatprep.subr.bf16.mxu1 %v6802_v26 }
 0x29c   : > { %v5313_v9 = vpop.f32.mrb[4].mxu1 }
 0x29d   : > { %v757_v15 = vsel %vm6887_vm6, %v5313_v9, 0.0  ;;  %v724_v16 = vpop.f32.mrb[5].mxu1  ;;  %v8499_v9 = vunpack.c.l.bf16 %v7019_v14 }
 0x29e   : > { %v755_v30 = vsel %vm6907_vm9, %v724_v16, 0.0  ;;  %v5314_v2 = vpop.f32.mrb[6].mxu1  ;;  %5370 = vmatpush3.bf16.msra.mxu1 %v6802_v26  ;;  %v769_v23 = vadd.f32 %v765_v18, %v757_v15  ;;  %v7025_v15 = vld [vmem:[%s6559_s20 + $0x18] sm:$0xff]  }
 0x29f   : > { %v767_v56 = vadd.f32 %v763_v24, %v755_v30  ;;  %v758_v20 = vsel %vm6913_vm10, %v5314_v2, 0.0  ;;  %v727_v22 = vpop.f32.mrb[7].mxu1  ;;  %v8500_v16 = vunpack.c.l.bf16 %v7025_v15  ;;  %v1709_v24 = vmul.f32 %v8499_v9, %v6629_v19 }
 0x2a0   : > { %v770_v46 = vadd.f32 %v766_v5, %v758_v20  ;;  %v756_v26 = vsel %vm6925_vm12, %v727_v22, 0.0  ;;  %v8501_v5 = vunpack.c.h.bf16 %v7019_v14 }
 0x2a1   : > { %v768_v36 = vadd.f32 %v764_v6, %v756_v26  ;;  %v7033_v30 = vmul.f32 %v8500_v16, %v1709_v24  ;;  %v8502_v6 = vunpack.c.h.bf16 %v7025_v15 }
 0x2a2   : > { %v780_v37 = vpack.c.bf16 %v770_v46, %v769_v23  ;;  %v1710_v23 = vmul.f32 %v8501_v5, %v6629_v19 }
 0x2a3   : > { %v779_v39 = vpack.c.bf16 %v768_v36, %v767_v56  ;;  %v1782_v56 = vsel %vm457_vm2, %v7033_v30, 0.0 }
 0x2a4   : > { %v7053_v26 = vmul.f32 %v8502_v6, %v1710_v23 }
 0x2a5   : > { %5331 = vmatprep.mubr.msk.bf16.mxu0 %vm518_vm0, %v779_v39  ;;  %v1029_v39 = vmul.f32 %v6705_v48, %v6780_v34 }
 0x2a6   : > { %5332 = vmatmul.mubr.msk.bf16.vlgmr.msra.gmra.mrb[0].mxu0 %vm518_vm0, %v780_v37  ;;  %v1785_v37 = vsel %vm457_vm2, %v7053_v26, 0.0 }
 0x2a7   : > { %5376 = vmatpush3.bf16.msra.mxu0 %v6824_v62  ;;  %5379 = vmatprep.mubr.msk.bf16.mxu0 %vm518_vm0, %v6833_v43  ;;  %v5681_v62 = vpack.c.bf16 %v6974_v53, %v6971_v51  ;;  %v6999_v43 = vld [vmem:[%s6567_s6 + $0x18] sm:$0xff]  }
 0x2a8   : > { %5377 = vmatprep.subr.bf16.mxu0 %v6831_v31  ;;  %2269 = vrot.lane.b32.xlu0 %v6999_v43, %s6213_s27 }
 0x2ab   : > { %5378 = vmatpush3.bf16.msra.mxu0 %v6831_v31  ;;  %v6994_v31 = vld [vmem:[%s6567_s6 + $0x10] sm:$0xff]  }
 0x2ac   : > { %5678 = vmatprep.subr.bf16.mxu0 %v5677_v13  ;;  %2267 = vrot.lane.b32.xlu1 %v6994_v31, %s6213_s27 }
 0x2ae   : > { %5380 = vmatmul.mubr.msk.bf16.vlgmr.msra.gmra.mrb[4].mxu0 %vm518_vm0, %v6835_v32  ;;  %v7004_v32 = vld [vmem:[%s6551_s23 + $0x10] sm:$0xff]  }
 0x2af   : > { %5680 = vmatpush3.bf16.msra.mxu0 %v5677_v13  ;;  %5383 = vmatprep.mubr.msk.bf16.mxu0 %vm518_vm0, %v6837_v42  ;;  %v8503_v42 = vunpack.c.l.bf16 %v7004_v32  ;;  %v8505_v2 = vunpack.c.h.bf16 %v7004_v32  ;;  %v1027_v13 = vmul.f32 %v6662_v28, %v6780_v34  ;;  %v1033_v28 = vmul.f32 %v6735_v0, %v6780_v34 }
 0x2b0   : > { %5682 = vmatprep.subr.bf16.mxu0 %v5681_v62 }
 0x2b1   : > { %v1707_v7 = vmul.f32 %v8503_v42, %v6629_v19  ;;  %v1708_v22 = vmul.f32 %v8505_v2, %v6629_v19 }
 0x2b3   : > { %5684 = vmatpush3.bf16.msra.mxu0 %v5681_v62 }
 0x2b6   : > { %5384 = vmatmul.mubr.msk.bf16.gmra.mrb[8].mxu0 %vm518_vm0, %v6839_v21  ;;  %v7008_v21 = vld [vmem:[%s6559_s20 + $0x10] sm:$0xff]  }
 0x2b7   : > { %5395 = vmatprep.mubr.msk.f32.mxu0 %vm518_vm0, %v6585_v4  ;;  %v8504_v38 = vunpack.c.l.bf16 %v7008_v21  ;;  %v8506_v20 = vunpack.c.h.bf16 %v7008_v21 }
 0x2b9   : > { %v7016_v57 = vmul.f32 %v8504_v38, %v1707_v7  ;;  %v7049_v46 = vmul.f32 %v8506_v20, %v1708_v22  ;;  %v1028_v22 = vmul.f32 %v6664_v29, %v6780_v34 }
 0x2bb   : > { %v1776_v18 = vsel %vm457_vm2, %v7016_v57, 0.0  ;;  %v1779_v36 = vsel %vm457_vm2, %v7049_v46, 0.0 }
 0x2be   : > { %5396 = vmatmul.mubr.msk.f32.vlgmr.msra.gmra.mrb[12].mxu0 %vm518_vm0, %v6621_v17 }
 0x2bf   : > { %5398 = vmatprep.mubr.msk.f32.mxu0 %vm518_vm0, %v6648_v25 }
 0x2c2   : > { %5399 = vmatmul.mubr.msk.f32.gmra.mrb[14].mxu0 %vm518_vm0, %v6660_v27 }
 0x2c7   : > { %1780 = vadd.xlane.f32.xlu0 %v1779_v36 }
 0x2c9   : > { %v1142_v23 = vpop.xlane.xlu1 %1141 }
 0x2d0   : > { %1777 = vadd.xlane.f32.xlu1 %v1776_v18  ;;  %v1030_v18 = vmul.f32 %v6707_v49, %v6780_v34 }
 0x2d1   : > { %v1148_v29 = vpop.xlane.xlu1 %1147 }
 0x2d4   : > { %1783 = vadd.xlane.f32.xlu1 %v1782_v56 }
 0x2d8   : > { %1786 = vadd.xlane.f32.xlu1 %v1785_v37 }
 0x33c   : > { %v5341_v19 = vpop.f32.mrb[8].mxu1 }
 0x33d   : > { %v1037_v62 = vadd.f32 %v5341_v19, %v1029_v39  ;;  %v996_v7 = vpop.f32.mrb[9].mxu1  ;;  %v1031_v39 = vmul.f32 %v6725_v58, %v6780_v34 }
 0x33e   : > { %v1035_v24 = vadd.f32 %v1027_v13, %v996_v7  ;;  %v5342_v56 = vpop.f32.mrb[10].mxu1 }
 0x33f   : > { %1045 = vst.msk [vmem:[#allocation2 + $0x10] sm:$0xff] %vm457_vm2, %v1037_v62  ;;  %v1038_v36 = vadd.f32 %v5342_v56, %v1030_v18  ;;  %v999_v37 = vpop.f32.mrb[11].mxu1  ;;  %v1034_v62 = vmul.f32 %v6737_v3, %v6780_v34 }
 0x340   : > { %1043 = vst.msk [vmem:[#allocation2] sm:$0xff] %vm457_vm2, %v1035_v24  ;;  %v1036_v48 = vadd.f32 %v1028_v22, %v999_v37  ;;  %v1032_v24 = vmul.f32 %v6727_v61, %v6780_v34  ;;  %v1151_v37 = vpop.xlane.xlu1 %1150  ;;  %v1145_v61 = vpop.xlane.xlu0 %1144 }
 0x341   : > { %1046 = vst.msk [vmem:[#allocation2 + $0x18] sm:$0xff] %vm457_vm2, %v1038_v36 }
 0x342   : > { %1044 = vst.msk [vmem:[#allocation2 + $0x8] sm:$0xff] %vm457_vm2, %v1036_v48 }
 0x344   : > { %v5345_v49 = vpop.f32.mrb[12].mxu1 }
 0x345   : > { %v1041_v19 = vadd.f32 %v5345_v49, %v1033_v28  ;;  %v1012_v13 = vpop.f32.mrb[13].mxu1  ;;  %v1158_v28 = vsel %vm6893_vm7, %v1148_v29, 0.0 }
 0x346   : > { %v1039_v7 = vadd.f32 %v1031_v39, %v1012_v13  ;;  %v5346_v18 = vpop.f32.mrb[14].mxu1  ;;  %v1156_v13 = vsel %vm6900_vm8, %v1142_v23, 0.0 }
 0x347   : > { %1049 = vst.msk [vmem:[#allocation2 + $0x30] sm:$0xff] %vm457_vm2, %v1041_v19  ;;  %v1042_v56 = vadd.f32 %v5346_v18, %v1034_v62  ;;  %v1015_v22 = vpop.f32.mrb[15].mxu1  ;;  %v7082_v58 = vld [vmem:[#allocation2] sm:$0xff]  ;;  %v1159_v19 = vsel %vm6919_vm11, %v1151_v37, 0.0  ;;  %v1157_v18 = vsel %vm6931_vm13, %v1145_v61, 0.0 }
 0x348   : > { %1047 = vst.msk [vmem:[#allocation2 + $0x20] sm:$0xff] %vm457_vm2, %v1039_v7  ;;  %v1040_v0 = vadd.f32 %v1032_v24, %v1015_v22  ;;  %v7106_v16 = vld [vmem:[#allocation2 + $0x18] sm:$0xff] }
 0x349   : > { %1050 = vst.msk [vmem:[#allocation2 + $0x38] sm:$0xff] %vm457_vm2, %v1042_v56  ;;  %v7084_v36 = vld [vmem:[#allocation2 + $0x8] sm:$0xff] }
 0x34a   : > { %1048 = vst.msk [vmem:[#allocation2 + $0x28] sm:$0xff] %vm457_vm2, %v1040_v0  ;;  %v1810_v3 = vpack.c.bf16 %v7084_v36, %v7082_v58 }
 0x34c   : > { %v5353_v48 = vpop.f32.mrb[16].mxu1  ;;  %5747 = vmatprep.subr.msk.bf16.mxu1 %vm457_vm2, %v1810_v3  ;;  %v1815_v61 = vsel %vm457_vm2, %v1810_v3, 0 }
 0x34d   : > { %v1154_v49 = vsel %vm6887_vm6, %v5353_v48, 0.0  ;;  %v1109_v39 = vpop.f32.mrb[17].mxu1 }
 0x34e   : > { %v1152_v62 = vsel %vm6907_vm9, %v1109_v39, 0.0  ;;  %v5354_v7 = vpop.f32.mrb[18].mxu1  ;;  %v1162_v56 = vadd.f32 %v1158_v28, %v1154_v49  ;;  %v7109_v39 = vld [vmem:[#allocation2 + $0x10] sm:$0xff] }
 0x34f   : > { %v1155_v29 = vsel %vm6913_vm10, %v5354_v7, 0.0  ;;  %v1112_v24 = vpop.f32.mrb[19].mxu1  ;;  %v1160_v37 = vadd.f32 %v1156_v13, %v1152_v62  ;;  %v1811_v28 = vpack.c.bf16 %v7106_v16, %v7109_v39  ;;  %v7126_v3 = vld [vmem:[#allocation2 + $0x30] sm:$0xff] }
 0x350   : > { %v1163_v22 = vadd.f32 %v1159_v19, %v1155_v29  ;;  %v1153_v0 = vsel %vm6925_vm12, %v1112_v24, 0.0  ;;  %v7118_v19 = vld [vmem:[#allocation2 + $0x20] sm:$0xff]  ;;  %8576 = vst [vmem:[#allocation26_spill] sm:$0xff] %v7126_v3 }
 0x351   : > { %v1161_v48 = vadd.f32 %v1157_v18, %v1153_v0  ;;  %v7116_v49 = vld [vmem:[#allocation2 + $0x28] sm:$0xff]  ;;  %8574 = vst [vmem:[#allocation24_spill] sm:$0xff] %v7118_v19  ;;  %v1818_v13 = vsel %vm457_vm2, %v1811_v28, 0 }
 0x352   : > { %v1174_v9 = vpack.c.bf16 %v1163_v22, %v1162_v56  ;;  %8573 = vst [vmem:[#allocation23_spill] sm:$0xff] %v7116_v49  ;;  %v1812_v62 = vpack.c.bf16 %v7116_v49, %v7118_v19 }
 0x353   : > { %v1173_v23 = vpack.c.bf16 %v1161_v48, %v1160_v37 }
 0x354   : > { %v1821_v7 = vsel %vm457_vm2, %v1812_v62, 0 }
 0x355   : > { %5371 = vmatprep.mubr.msk.bf16.mxu1 %vm518_vm0, %v1173_v23 }
 0x356   : > { %5372 = vmatmul.mubr.msk.bf16.vlgmr.msra.gmra.mrb[20].mxu1 %vm518_vm0, %v1174_v9  ;;  %v7124_v9 = vld [vmem:[#allocation2 + $0x38] sm:$0xff] }
 0x357   : > { %5410 = vmatpush3.bf16.xpose.msra.mxu1 %v1815_v61  ;;  %8575 = vst [vmem:[#allocation25_spill] sm:$0xff] %v7124_v9  ;;  %v1813_v18 = vpack.c.bf16 %v7124_v9, %v7126_v3 }
 0x358   : > { %5748 = vmatprep.subr.msk.bf16.mxu1 %vm457_vm2, %v1811_v28 }
 0x359   : > { %v1824_v29 = vsel %vm457_vm2, %v1813_v18, 0 }
 0x35f   : > { %5412 = vmatpush3.bf16.xpose.msra.mxu1 %v1818_v13 }
 0x360   : > { %5749 = vmatprep.subr.msk.bf16.mxu1 %vm457_vm2, %v1812_v62 }
 0x367   : > { %5414 = vmatpush3.bf16.xpose.msra.mxu1 %v1821_v7 }
 0x368   : > { %5750 = vmatprep.subr.msk.bf16.mxu1 %vm457_vm2, %v1813_v18 }
 0x36f   : > { %5416 = vmatpush3.bf16.xpose.msra.mxu1 %v1824_v29 }
 0x370   : > { %5421 = vmatprep.subr.bf16.mxu1 %v6994_v31 }
 0x379   : > { %v5333_v24 = vpop.f32.mrb[0].mxu0 }
 0x37a   : > { %v4992_v56 = vpack.c.bf16 %v5333_v24, %v5333_v24  ;;  %v898_v22 = vpop.f32.mrb[1].mxu0 }
 0x37b   : > { %v4990_v0 = vpack.c.bf16 %v898_v22, %v898_v22  ;;  %v5334_v37 = vpop.f32.mrb[2].mxu0 }
 0x37c   : > { %932 = vst.msk [vmem:[%s7135_s15 + $0x8] sm:$0xf] %vm929_vm14, %v4992_v56  ;;  %v4993_v48 = vpack.c.bf16 %v5334_v37, %v5334_v37  ;;  %v901_v23 = vpop.f32.mrb[3].mxu0 }
 0x37d   : > { %930 = vst.msk [vmem:[%s7135_s15] sm:$0xf] %vm929_vm14, %v4990_v0  ;;  %v4991_v61 = vpack.c.bf16 %v901_v23, %v901_v23 }
 0x37e   : > { %933 = vst.msk [vmem:[%s7135_s15 + $0xc] sm:$0xf] %vm929_vm14, %v4993_v48 }
 0x37f   : > { %931 = vst.msk [vmem:[%s7135_s15 + $0x4] sm:$0xf] %vm929_vm14, %v4991_v61 }
 0x381   : > { %v7145_v28 = vpop.f32.mrb[4].mxu0 }
 0x382   : > { %v7147_v13 = vpop.f32.mrb[5].mxu0 }
 0x383   : > { %v7149_v62 = vpop.f32.mrb[6].mxu0 }
 0x384   : > { %v7151_v7 = vpop.f32.mrb[7].mxu0 }
 0x389   : > { %v7153_v18 = vpop.f32.mrb[8].mxu0 }
 0x38a   : > { %v7155_v29 = vpop.f32.mrb[9].mxu0 }
 0x38b   : > { %v7157_v24 = vpop.f32.mrb[10].mxu0 }
 0x38c   : > { %v7159_v56 = vpop.f32.mrb[11].mxu0 }
 0x391   : > { %v5397_v22 = vpop.f32.mrb[12].mxu0 }
 0x392   : > { %v1661_v0 = vsub.f32 %v5397_v22, %v6961_v44  ;;  %v1665_v37 = vsub.f32 0.0, %v5397_v22  ;;  %v1641_v48 = vpop.f32.mrb[13].mxu0 }
 0x393   : > { %v1660_v23 = vsub.f32 %v1641_v48, %v6958_v60  ;;  %v1664_v61 = vsub.f32 0.0, %v1641_v48 }
 0x394   : > { %v1670_v5 = vmul.f32 1.442695, %v1665_v37  ;;  %v1679_v6 = vmul.f32 1.442695, %v1661_v0 }
 0x395   : > { %v1668_v42 = vmul.f32 1.442695, %v1664_v61  ;;  %v1677_v38 = vmul.f32 1.442695, %v1660_v23  ;;  %v5400_v2 = vpop.f32.mrb[14].mxu0  ;;  %v8581_v23 = vunpack.c.h.bf16 %v7025_v15 }
 0x396   : > { %5903 = vpow2.f32 %v1670_v5  ;;  %v1663_v20 = vsub.f32 %v5400_v2, %v6974_v53  ;;  %v1667_v49 = vsub.f32 0.0, %v5400_v2  ;;  %v1651_v9 = vpop.f32.mrb[15].mxu0  ;;  %v8577_v53 = vunpack.c.h.bf16 %v7008_v21 }
 0x397   : > { %5905 = vpow2.f32 %v1679_v6  ;;  %v1662_v19 = vsub.f32 %v1651_v9, %v6971_v51  ;;  %v1666_v3 = vsub.f32 0.0, %v1651_v9  ;;  %v8578_v6 = vunpack.c.h.bf16 %v7004_v32 }
 0x398   : > { %5907 = vpow2.f32 %v1668_v42  ;;  %v1674_v44 = vmul.f32 1.442695, %v1667_v49  ;;  %v1683_v22 = vmul.f32 1.442695, %v1663_v20  ;;  %v8579_v42 = vunpack.c.l.bf16 %v7008_v21 }
 0x399   : > { %5909 = vpow2.f32 %v1677_v38  ;;  %v1672_v60 = vmul.f32 1.442695, %v1666_v3  ;;  %v1681_v48 = vmul.f32 1.442695, %v1662_v19  ;;  %v8580_v49 = vunpack.c.l.bf16 %v7004_v32 }
 0x39a   : > { %5911 = vpow2.f32 %v1674_v44 }
 0x39b   : > { %5913 = vpow2.f32 %v1683_v22 }
 0x39c   : > { %5915 = vpow2.f32 %v1672_v60  ;;  %v8582_v60 = vunpack.c.h.bf16 %v7019_v14 }
 0x39d   : > { %5917 = vpow2.f32 %v1681_v48 }
 0x3a0   : > { %v5904_v0 = vpop.eup %5903 }
 0x3a1   : > { %v5906_v5 = vpop.eup %5905  ;;  %v1692_v2 = vmul.f32 %v5904_v0, %v8577_v53  ;;  %v8583_v53 = vunpack.c.l.bf16 %v7025_v15 }
 0x3a2   : > { %v5908_v37 = vpop.eup %5907  ;;  %v1686_v51 = vmul.f32 %v5906_v5, %v8578_v6 }
 0x3a3   : > { %v5910_v9 = vpop.eup %5909  ;;  %v1691_v20 = vmul.f32 %v5908_v37, %v8579_v42  ;;  %v8584_v37 = vunpack.c.l.bf16 %v7019_v14 }
 0x3a4   : > { %v5912_v38 = vpop.eup %5911  ;;  %v1685_v19 = vmul.f32 %v5910_v9, %v8580_v49 }
 0x3a5   : > { %v5914_v3 = vpop.eup %5913  ;;  %5919 = vrcp.f32 %v5912_v38  ;;  %v1694_v61 = vmul.f32 %v5912_v38, %v8581_v23  ;;  %v1695_v44 = vpack.c.bf16 %v1692_v2, %v1691_v20 }
 0x3a6   : > { %v5916_v22 = vpop.eup %5915  ;;  %v1688_v48 = vmul.f32 %v5914_v3, %v8582_v60  ;;  %v1689_v0 = vpack.c.bf16 %v1686_v51, %v1685_v19 }
 0x3a7   : > { %v5918_v5 = vpop.eup %5917  ;;  %5745 = vmatprep.subr.msk.bf16.mxu0 %vm457_vm2, %v1695_v44  ;;  %v1722_v21 = vsel %vm457_vm2, %v1695_v44, 0  ;;  %v1693_v32 = vmul.f32 %v5916_v22, %v8583_v53 }
 0x3a8   : > { %v1687_v6 = vmul.f32 %v5918_v5, %v8584_v37  ;;  %5405 = vmatprep.mubr.msk.bf16.mxu0 %vm457_vm2, %v1689_v0  ;;  %5417 = vmatprep.mubr.msk.bf16.mxu1 %vm457_vm2, %v1689_v0 }
 0x3a9   : > { %5402 = vmatpush3.bf16.xpose.msra.mxu0 %v1722_v21  ;;  %v1696_v9 = vpack.c.bf16 %v1694_v61, %v1693_v32 }
 0x3aa   : > { %v1690_v42 = vpack.c.bf16 %v1688_v48, %v1687_v6 }
 0x3ab   : > { %5746 = vmatprep.subr.msk.bf16.mxu0 %vm457_vm2, %v1696_v9  ;;  %v1725_v51 = vsel %vm457_vm2, %v1696_v9, 0 }
 0x3ac   : > { %5418 = vmatmul.mubr.msk.bf16.vlgmr.msra.gmra.mrb[24].mxu1 %vm457_vm2, %v1690_v42 }
 0x3ad   : > { %5422 = vmatpush3.bf16.msra.mxu1 %v6994_v31 }
 0x3ae   : > { %5423 = vmatprep.subr.bf16.mxu1 %v6999_v43 }
 0x3af   : > { %v5920_v15 = vpop.eup %5919 }
 0x3b0   : > { %v7191_v14 = vrot.slane %v5920_v15, %v6772_v50 }
 0x3b1   : > { %5404 = vmatpush3.bf16.xpose.msra.mxu0 %v1725_v51  ;;  %5424 = vmatpush3.bf16.msra.mxu1 %v6999_v43 }
 0x3b2   : > { %v1701_v38 = vmul.f32 %v7191_v14, %v1691_v20  ;;  %v1702_v49 = vmul.f32 %v7191_v14, %v1692_v2  ;;  %v1703_v19 = vmul.f32 %v7191_v14, %v1693_v32  ;;  %v1704_v3 = vmul.f32 %v7191_v14, %v1694_v61  ;;  %v7205_v2 = vpop.permute.xlu1 %2267  ;;  %v7208_v20 = vpop.permute.xlu0 %2269 }
 0x3b4   : > { %v1705_v23 = vpack.c.bf16 %v1702_v49, %v1701_v38  ;;  %v1706_v22 = vpack.c.bf16 %v1704_v3, %v1703_v19 }
 0x3b6   : > { %2374 = vrot.lane.b32.xlu0 %v1705_v23, %s6213_s27  ;;  %2376 = vrot.lane.b32.xlu1 %v1706_v22, %s6213_s27 }
 0x3b7   : > { %5429 = vmatprep.subr.bf16.mxu0 %v1705_v23 }
 0x3b8   : > { %5406 = vmatmul.mubr.msk.bf16.vlgmr.msra.gmra.mrb[16].mxu0 %vm457_vm2, %v1690_v42 }
 0x3b9   : > { %5430 = vmatpush3.bf16.msra.mxu0 %v1705_v23 }
 0x3ba   : > { %5431 = vmatprep.subr.bf16.mxu0 %v1706_v22  ;;  %2087 = vrot.lane.b32.xlu0 %v1695_v44, %s6213_s27 }
 0x3bd   : > { %5432 = vmatpush3.bf16.msra.mxu0 %v1706_v22 }
 0x3be   : > { %2089 = vrot.lane.b32.xlu0 %v1696_v9, %s6213_s27 }
 0x3c2   : > { %2081 = vrot.lane.b32.xlu0 %v1689_v0, %s6213_s27 }
 0x3c6   : > { %2083 = vrot.lane.b32.xlu0 %v1690_v42, %s6213_s27 }
 0x3d9   : > { %2356 = vxpose.xlu1.c.b16.start [1/2] (short) (narrow) %v7205_v2, 64 }
 0x3dd   : > { %2357 = vxpose.xlu1.c.b16.end [2/2] (short) (narrow) %v7208_v20, 64 }
 0x3e4   : > { %1962 = vxpose.xlu0.c.b16.start [1/2] (short) (narrow) %v6994_v31, 64 }
 0x3e8   : > { %1963 = vxpose.xlu0.c.b16.end [2/2] (short) (narrow) %v6999_v43, 64 }
 0x3e9   : > { %1439 = vrot.lane.b32.xlu1 %v6845_v35, %s6213_s27  ;;  %v7253_v35 = vpop.xlane.xlu0 %1780 }
 0x3ed   : > { %1441 = vrot.lane.b32.xlu1 %v6847_v33, %s6213_s27 }
 0x3f1   : > { %1481 = vrot.lane.b32.xlu1 %v7151_v7, %s6213_s27 }
 0x3f5   : > { %1443 = vrot.lane.b32.xlu1 %v6856_v40, %s6213_s27 }
 0x3f9   : > { %1445 = vrot.lane.b32.xlu1 %v6858_v41, %s6213_s27  ;;  %1479 = vrot.lane.b32.xlu0 %v7147_v13, %s6213_s27 }
 0x3fd   : > { %1483 = vrot.lane.b32.xlu1 %v7145_v28, %s6213_s27  ;;  %1485 = vrot.lane.b32.xlu0 %v7149_v62, %s6213_s27 }
 0x401   : > { %1447 = vrot.lane.b32.xlu1 %v6866_v52, %s6213_s27  ;;  %1449 = vrot.lane.b32.xlu0 %v6868_v45, %s6213_s27 }
 0x405   : > { %1487 = vrot.lane.b32.xlu1 %v7155_v29, %s6213_s27  ;;  %1489 = vrot.lane.b32.xlu0 %v7159_v56, %s6213_s27 }
 0x409   : > { %1451 = vrot.lane.b32.xlu1 %v6874_v55, %s6213_s27  ;;  %1453 = vrot.lane.b32.xlu0 %v6876_v54, %s6213_s27  ;;  %v7266_v54 = vpop.xlane.xlu1 %1777 }
 0x40d   : > { %1491 = vrot.lane.b32.xlu1 %v7153_v18, %s6213_s27  ;;  %1493 = vrot.lane.b32.xlu0 %v7157_v24, %s6213_s27  ;;  %v1784_v31 = vpop.xlane.xlu1 %1783 }
 0x411   : > { %2156 = vrot.lane.b32.xlu1 %v7016_v57, %s6213_s27  ;;  %2158 = vrot.lane.b32.xlu0 %v7049_v46, %s6213_s27  ;;  %v1787_v43 = vpop.xlane.xlu1 %1786 }
 0x415   : > { %2160 = vrot.lane.b32.xlu1 %v7033_v30, %s6213_s27  ;;  %2162 = vrot.lane.b32.xlu0 %v7053_v26, %s6213_s27 }
 0x428   : > { %v7255_v33 = vpop.permute.xlu0 %2374  ;;  %v7269_v30 = vpop.permute.xlu1 %2376 }
 0x429   : > { %5469 = vmatprep.subr.bf16.mxu1 %v7255_v33  ;;  %v7258_v40 = vpop.f32.mrb[20].mxu1 }
 0x42a   : > { %8585 = vst [vmem:[#allocation27_spill] sm:$0xff] %v7258_v40  ;;  %v7260_v41 = vpop.f32.mrb[21].mxu1 }
 0x42b   : > { %8586 = vst [vmem:[#allocation28_spill] sm:$0xff] %v7260_v41  ;;  %v7262_v52 = vpop.f32.mrb[22].mxu1  ;;  %v7326_v41 = vld [vmem:[%s6569_s5 + $0x48] sm:$0xff] }
 0x42c   : > { %8587 = vst [vmem:[#allocation29_spill] sm:$0xff] %v7262_v52  ;;  %v2088_v45 = vpop.permute.xlu0 %2087  ;;  %v7264_v55 = vpop.f32.mrb[23].mxu1 }
 0x42d   : > { %8588 = vst [vmem:[#allocation30_spill] sm:$0xff] %v7264_v55  ;;  %5751 = vmatprep.subr.msk.bf16.mxu0 %vm457_vm2, %v2088_v45  ;;  %v2098_v18 = vsel %vm457_vm2, %v2088_v45, 0 }
 0x430   : > { %v2090_v57 = vpop.permute.xlu0 %2089 }
 0x431   : > { %v2101_v44 = vsel %vm457_vm2, %v2090_v57, 0 }
 0x434   : > { %v2082_v46 = vpop.permute.xlu0 %2081 }
 0x438   : > { %v7273_v28 = vpop.permute.xlu0 %2083 }
 0x43f   : > { %v7271_v26 = vpop.trf.xlu1 }
 0x443   : > { %v7275_v13 = vpop.trf.xlu1 }
 0x447   : > { %v7280_v29 = vpop.trf.xlu1 }
 0x44a   : > { %v1970_v62 = vpop.trf.xlu0 }
 0x44b   : > { %5433 = vmatprep.mubr.msk.bf16.mxu0 %vm518_vm0, %v1970_v62  ;;  %v7284_v56 = vpop.trf.xlu1 }
 0x44e   : > { %v1971_v7 = vpop.trf.xlu0 }
 0x44f   : > { %5434 = vmatmul.mubr.msk.bf16.vlgmr.msra.gmra.mrb[20].mxu0 %vm518_vm0, %v1971_v7  ;;  %v1793_v7 = vsel %vm6931_vm13, %v7253_v35, 0.0  ;;  %v1792_v35 = vsel %vm6900_vm8, %v7266_v54, 0.0 }
 0x450   : > { %5442 = vmatpush3.bf16.xpose.msra.mxu0 %v2098_v18 }
 0x451   : > { %5752 = vmatprep.subr.msk.bf16.mxu0 %vm457_vm2, %v2090_v57 }
 0x452   : > { %v1972_v24 = vpop.trf.xlu0 }
 0x453   : > { %5437 = vmatprep.mubr.msk.bf16.mxu0 %vm518_vm0, %v1972_v24 }
 0x456   : > { %v1973_v61 = vpop.trf.xlu0 }
 0x457   : > { %5438 = vmatmul.mubr.msk.bf16.gmra.mrb[24].mxu0 %vm518_vm0, %v1973_v61  ;;  %v1794_v61 = vsel %vm6893_vm7, %v1784_v31, 0.0 }
 0x458   : > { %5444 = vmatpush3.bf16.xpose.msra.mxu0 %v2101_v44  ;;  %5445 = vmatprep.mubr.msk.bf16.mxu0 %vm457_vm2, %v2082_v46  ;;  %v1795_v44 = vsel %vm6919_vm11, %v1787_v43, 0.0 }
 0x45b   : > { %v1440_v60 = vpop.permute.xlu1 %1439 }
 0x45c   : > { %v1463_v54 = vmul.f32 %v1440_v60, %v6780_v34 }
 0x45f   : > { %v1442_v48 = vpop.permute.xlu1 %1441  ;;  %5446 = vmatmul.mubr.msk.bf16.vlgmr.msra.gmra.mrb[28].mxu0 %vm457_vm2, %v7273_v28 }
 0x460   : > { %5457 = vmatprep.mubr.msk.bf16.mxu0 %vm457_vm2, %v2082_v46 }
 0x463   : > { %v7292_v0 = vpop.permute.xlu1 %1481 }
 0x467   : > { %v1444_v5 = vpop.permute.xlu1 %1443 }
 0x468   : > { %v1465_v40 = vmul.f32 %v1444_v5, %v6780_v34 }
 0x46b   : > { %v1446_v21 = vpop.permute.xlu1 %1445  ;;  %v1480_v53 = vpop.permute.xlu0 %1479 }
 0x46c   : > { %v1466_v5 = vmul.f32 %v1446_v21, %v6780_v34 }
 0x46f   : > { %v1484_v32 = vpop.permute.xlu1 %1483  ;;  %v1486_v37 = vpop.permute.xlu0 %1485 }
 0x470   : > { %v1505_v55 = vadd.f32 %v1484_v32, %v1465_v40  ;;  %v1506_v32 = vadd.f32 %v1486_v37, %v1466_v5 }
 0x473   : > { %v1448_v6 = vpop.permute.xlu1 %1447  ;;  %v7294_v9 = vpop.permute.xlu0 %1449 }
 0x477   : > { %v7296_v42 = vpop.permute.xlu1 %1487  ;;  %v7298_v51 = vpop.permute.xlu0 %1489 }
 0x47b   : > { %v1452_v15 = vpop.permute.xlu1 %1451  ;;  %v1454_v38 = vpop.permute.xlu0 %1453 }
 0x47f   : > { %v1492_v49 = vpop.permute.xlu1 %1491  ;;  %v1494_v19 = vpop.permute.xlu0 %1493 }
 0x483   : > { %v2157_v3 = vpop.permute.xlu1 %2156  ;;  %v2159_v23 = vpop.permute.xlu0 %2158 }
 0x484   : > { %v2168_v22 = vsel %vm457_vm2, %v2157_v3, 0.0  ;;  %v2171_v45 = vsel %vm457_vm2, %v2159_v23, 0.0 }
 0x485   : > { %2169 = vadd.xlane.f32.xlu1 %v2168_v22  ;;  %2172 = vadd.xlane.f32.xlu0 %v2171_v45 }
 0x48b   : > { %v5407_v57 = vpop.f32.mrb[16].mxu0 }
 0x48c   : > { %v1790_v46 = vsel %vm6887_vm6, %v5407_v57, 0.0  ;;  %v1761_v62 = vpop.f32.mrb[17].mxu0 }
 0x48d   : > { %v1788_v18 = vsel %vm6907_vm9, %v1761_v62, 0.0  ;;  %v5408_v24 = vpop.f32.mrb[18].mxu0  ;;  %v1798_v22 = vadd.f32 %v1794_v61, %v1790_v46  ;;  %v7339_v46 = vld [vmem:[%s6569_s5 + $0x50] sm:$0xff] }
 0x48e   : > { %v1791_v3 = vsel %vm6913_vm10, %v5408_v24, 0.0  ;;  %v1764_v23 = vpop.f32.mrb[19].mxu0  ;;  %v1796_v62 = vadd.f32 %v1792_v35, %v1788_v18  ;;  %v7323_v24 = vld [vmem:[%s6569_s5 + $0x40] sm:$0xff] }
 0x48f   : > { %v1799_v45 = vadd.f32 %v1795_v44, %v1791_v3  ;;  %v1789_v57 = vsel %vm6925_vm12, %v1764_v23, 0.0  ;;  %v5685_v40 = vpack.c.bf16 %v7326_v41, %v7323_v24  ;;  %v5957_v18 = vld [vmem:[%s8480_s4] ss:$0 sm:$0xff]  ;;  %v7407_v23 = vld [vmem:[%s6551_s23 + $0x28] sm:$0xff]  }
 0x490   : > { %v1797_v52 = vadd.f32 %v1793_v7, %v1789_v57  ;;  %v7342_v7 = vld [vmem:[%s6569_s5 + $0x58] sm:$0xff]  ;;  %v8513_v57 = vunpack.c.h.bf16 %v7407_v23 }
 0x491   : > { %v1809_v31 = vpack.c.bf16 %v1799_v45, %v1798_v22  ;;  %v5689_v60 = vpack.c.bf16 %v7342_v7, %v7339_v46  ;;  %v8511_v45 = vunpack.c.l.bf16 %v7407_v23 }
 0x492   : > { %v1808_v43 = vpack.c.bf16 %v1797_v52, %v1796_v62  ;;  %v1503_v52 = vadd.f32 %v1480_v53, %v1463_v54  ;;  %v1467_v53 = vmul.f32 %v1448_v6, %v6780_v34  ;;  %v7420_v62 = vld [vmem:[%s6559_s20 + $0x28] sm:$0xff]  }
 0x493   : > { %v8512_v54 = vunpack.c.l.bf16 %v7420_v62  ;;  %v2735_v5 = vmul.f32 %v5957_v18, %v8511_v45 }
 0x494   : > { %5425 = vmatprep.mubr.msk.bf16.mxu1 %vm518_vm0, %v1808_v43 }
 0x495   : > { %5426 = vmatmul.mubr.msk.bf16.vlgmr.msra.gmra.mrb[24].mxu1 %vm518_vm0, %v1809_v31 }
 0x496   : > { %5470 = vmatpush3.bf16.msra.mxu1 %v7255_v33  ;;  %1523 = vrot.lane.b32.xlu1 %v1505_v55, %s6213_s27  ;;  %v1469_v33 = vmul.f32 %v1452_v15, %v6780_v34  ;;  %v1464_v55 = vmul.f32 %v1442_v48, %v6780_v34  ;;  %v1507_v48 = vadd.f32 %v7296_v42, %v1467_v53  ;;  %v7383_v42 = vld [vmem:[%s6567_s6 + $0x20] sm:$0xff]  }
 0x497   : > { %5471 = vmatprep.subr.bf16.mxu1 %v7269_v30  ;;  %5473 = vmatprep.mubr.msk.bf16.mxu1 %vm518_vm0, %v7271_v26 }
 0x498   : > { %v1509_v26 = vadd.f32 %v1492_v49, %v1469_v33  ;;  %v1504_v21 = vadd.f32 %v7292_v0, %v1464_v55  ;;  %v7395_v49 = vld [vmem:[%s6559_s20 + $0x20] sm:$0xff]  }
 0x499   : > { %v8516_v44 = vunpack.c.l.bf16 %v7395_v49 }
 0x49a   : > { %5472 = vmatpush3.bf16.msra.mxu1 %v7269_v30  ;;  %1519 = vrot.lane.b32.xlu1 %v1503_v52, %s6213_s27  ;;  %v1470_v30 = vmul.f32 %v1454_v38, %v6780_v34  ;;  %v2736_v52 = vmul.f32 %v5957_v18, %v8513_v57 }
 0x49b   : > { %5686 = vmatprep.subr.bf16.mxu1 %v5685_v40  ;;  %1525 = vrot.lane.b32.xlu0 %v1506_v32, %s6213_s27  ;;  %v7434_v32 = vmul.f32 %v8512_v54, %v2735_v5 }
 0x49c   : > { %v1510_v37 = vadd.f32 %v1494_v19, %v1470_v30  ;;  %v8518_v19 = vunpack.c.h.bf16 %v7395_v49 }
 0x49d   : > { %5474 = vmatmul.mubr.msk.bf16.vlgmr.msra.gmra.mrb[28].mxu1 %vm518_vm0, %v7275_v13  ;;  %v1468_v13 = vmul.f32 %v7294_v9, %v6780_v34  ;;  %v2161_v34 = vpop.permute.xlu1 %2160  ;;  %v7380_v9 = vld [vmem:[%s6567_s6 + $0x28] sm:$0xff]   ;;  %v2808_v55 = vsel %vm457_vm2, %v7434_v32, 0.0 }
 0x49e   : > { %5688 = vmatpush3.bf16.msra.mxu1 %v5685_v40  ;;  %1531 = vrot.lane.b32.xlu1 %v1509_v26, %s6213_s27  ;;  %v8514_v40 = vunpack.c.h.bf16 %v7420_v62 }
 0x49f   : > { %1521 = vrot.lane.b32.xlu0 %v1504_v21, %s6213_s27  ;;  %5477 = vmatprep.mubr.msk.bf16.mxu1 %vm518_vm0, %v7280_v29  ;;  %v1508_v0 = vadd.f32 %v7298_v51, %v1468_v13  ;;  %v2163_v29 = vpop.permute.xlu0 %2162  ;;  %v7390_v51 = vld [vmem:[%s6551_s23 + $0x20] sm:$0xff]  }
 0x4a0   : > { %5690 = vmatprep.subr.bf16.mxu1 %v5689_v60  ;;  %v2177_v6 = vsel %vm457_vm2, %v2163_v29, 0.0  ;;  %v8517_v15 = vunpack.c.h.bf16 %v7390_v51  ;;  %v8515_v38 = vunpack.c.l.bf16 %v7390_v51  ;;  %v7438_v33 = vmul.f32 %v8514_v40, %v2736_v52 }
 0x4a2   : > { %1527 = vrot.lane.b32.xlu1 %v1507_v48, %s6213_s27  ;;  %5692 = vmatpush3.bf16.msra.mxu1 %v5689_v60  ;;  %v2734_v61 = vmul.f32 %v5957_v18, %v8517_v15  ;;  %v2733_v3 = vmul.f32 %v5957_v18, %v8515_v38  ;;  %v2811_v26 = vsel %vm457_vm2, %v7438_v33, 0.0 }
 0x4a3   : > { %1533 = vrot.lane.b32.xlu0 %v1510_v37, %s6213_s27 }
 0x4a4   : > { %v7411_v35 = vmul.f32 %v8518_v19, %v2734_v61  ;;  %v7415_v22 = vmul.f32 %v8516_v44, %v2733_v3 }
 0x4a5   : > { %5478 = vmatmul.mubr.msk.bf16.gmra.mrb[32].mxu1 %vm518_vm0, %v7284_v56  ;;  %v2174_v56 = vsel %vm457_vm2, %v2161_v34, 0.0 }
 0x4a6   : > { %5489 = vmatprep.mubr.msk.f32.mxu1 %vm518_vm0, %v6585_v4  ;;  %v2805_v31 = vsel %vm457_vm2, %v7411_v35, 0.0  ;;  %v2802_v43 = vsel %vm457_vm2, %v7415_v22, 0.0 }
 0x4a7   : > { %1529 = vrot.lane.b32.xlu0 %v1508_v0, %s6213_s27 }
 0x4ad   : > { %5490 = vmatmul.mubr.msk.f32.vlgmr.msra.gmra.mrb[36].mxu1 %vm518_vm0, %v6621_v17 }
 0x4ae   : > { %5492 = vmatprep.mubr.msk.f32.mxu1 %vm518_vm0, %v6648_v25 }
 0x4b1   : > { %5493 = vmatmul.mubr.msk.f32.gmra.mrb[38].mxu1 %vm518_vm0, %v6660_v27 }
 0x4c6   : > { %2175 = vadd.xlane.f32.xlu0 %v2174_v56  ;;  %2178 = vadd.xlane.f32.xlu1 %v2177_v6  ;;  %v2057_v6 = vmul.f32 %v7109_v39, %v7191_v14  ;;  %v2058_v39 = vmul.f32 %v7106_v16, %v7191_v14 }
 0x4d7   : > { %3295 = vrot.lane.b32.xlu1 %v7380_v9, %s6213_s27 }
 0x4dc   : > { %3293 = vrot.lane.b32.xlu0 %v7383_v42, %s6213_s27 }
 0x4fb   : > { %2806 = vadd.xlane.f32.xlu0 %v2805_v31  ;;  %2803 = vadd.xlane.f32.xlu1 %v2802_v43  ;;  %v2055_v43 = vmul.f32 %v7082_v58, %v7191_v14 }
 0x4ff   : > { %2809 = vadd.xlane.f32.xlu0 %v2808_v55  ;;  %2812 = vadd.xlane.f32.xlu1 %v2811_v26 }
 0x512   : > { %v7444_v60 = vpop.xlane.xlu1 %2169  ;;  %v7446_v21 = vpop.xlane.xlu0 %2172 }
 0x516   : > { %v1524_v53 = vpop.permute.xlu1 %1523  ;;  %v1526_v30 = vpop.permute.xlu0 %1525 }
 0x517   : > { %1545 = vst.msk [vmem:[#allocation2 + $0x50] sm:$0xff] %vm457_vm2, %v1524_v53  ;;  %1546 = vst.msk [vmem:[#allocation2 + $0x58] sm:$0xff] %vm457_vm2, %v1526_v30  ;;  %v2056_v30 = vmul.f32 %v7084_v36, %v7191_v14  ;;  %v8589_v36 = vld [vmem:[#allocation26_spill] sm:$0xff] }
 0x51a   : > { %v1520_v48 = vpop.permute.xlu1 %1519  ;;  %v1522_v37 = vpop.permute.xlu0 %1521 }
 0x51b   : > { %1543 = vst.msk [vmem:[#allocation2 + $0x40] sm:$0xff] %vm457_vm2, %v1520_v48  ;;  %1544 = vst.msk [vmem:[#allocation2 + $0x48] sm:$0xff] %vm457_vm2, %v1522_v37 }
 0x51e   : > { %v1532_v13 = vpop.permute.xlu1 %1531  ;;  %v1534_v0 = vpop.permute.xlu0 %1533  ;;  %v7454_v34 = vld [vmem:[#allocation2 + $0x50] sm:$0xff]  ;;  %v7462_v3 = vld [vmem:[#allocation2 + $0x58] sm:$0xff] }
 0x51f   : > { %1549 = vst.msk [vmem:[#allocation2 + $0x70] sm:$0xff] %vm457_vm2, %v1532_v13  ;;  %1550 = vst.msk [vmem:[#allocation2 + $0x78] sm:$0xff] %vm457_vm2, %v1534_v0  ;;  %v2203_v58 = vpack.c.bf16 %v7462_v3, %v7454_v34  ;;  %v2061_v0 = vmul.f32 %v8589_v36, %v7191_v14 }
 0x522   : > { %v1528_v29 = vpop.permute.xlu1 %1527  ;;  %v1530_v56 = vpop.permute.xlu0 %1529  ;;  %v7458_v18 = vld [vmem:[#allocation2 + $0x40] sm:$0xff]  ;;  %v7460_v61 = vld [vmem:[#allocation2 + $0x48] sm:$0xff] }
 0x523   : > { %1547 = vst.msk [vmem:[#allocation2 + $0x60] sm:$0xff] %vm457_vm2, %v1528_v29  ;;  %1548 = vst.msk [vmem:[#allocation2 + $0x68] sm:$0xff] %vm457_vm2, %v1530_v56  ;;  %v5435_v31 = vpop.f32.mrb[20].mxu0  ;;  %v2202_v5 = vpack.c.bf16 %v7460_v61, %v7458_v18  ;;  %v8590_v56 = vld [vmem:[#allocation24_spill] sm:$0xff] }
 0x524   : > { %v2065_v52 = vadd.f32 %v5435_v31, %v2057_v6  ;;  %v2024_v55 = vpop.f32.mrb[21].mxu0  ;;  %v2059_v6 = vmul.f32 %v8590_v56, %v7191_v14 }
 0x525   : > { %v2063_v26 = vadd.f32 %v2055_v43, %v2024_v55  ;;  %v5436_v53 = vpop.f32.mrb[22].mxu0  ;;  %5753 = vmatprep.subr.msk.bf16.mxu0 %vm457_vm2, %v2202_v5  ;;  %v2207_v48 = vsel %vm457_vm2, %v2202_v5, 0  ;;  %v8591_v55 = vld [vmem:[#allocation25_spill] sm:$0xff] }
 0x526   : > { %2073 = vst.msk [vmem:[#allocation2 + $0x10] sm:$0xff] %vm457_vm2, %v2065_v52  ;;  %v2066_v37 = vadd.f32 %v5436_v53, %v2058_v39  ;;  %v2027_v13 = vpop.f32.mrb[23].mxu0  ;;  %5450 = vmatpush3.bf16.xpose.msra.mxu0 %v2207_v48  ;;  %v2062_v39 = vmul.f32 %v8591_v55, %v7191_v14  ;;  %v7503_v56 = vld [vmem:[#allocation2 + $0x70] sm:$0xff] }
 0x527   : > { %2071 = vst.msk [vmem:[#allocation2] sm:$0xff] %vm457_vm2, %v2063_v26  ;;  %v2064_v16 = vadd.f32 %v2056_v30, %v2027_v13  ;;  %5754 = vmatprep.subr.msk.bf16.mxu0 %vm457_vm2, %v2203_v58  ;;  %v8592_v30 = vld [vmem:[#allocation23_spill] sm:$0xff] }
 0x528   : > { %2074 = vst.msk [vmem:[#allocation2 + $0x18] sm:$0xff] %vm457_vm2, %v2066_v37  ;;  %v2060_v48 = vmul.f32 %v8592_v30, %v7191_v14 }
 0x529   : > { %2072 = vst.msk [vmem:[#allocation2 + $0x8] sm:$0xff] %vm457_vm2, %v2064_v16  ;;  %v2210_v16 = vsel %vm457_vm2, %v2203_v58, 0  ;;  %v2184_v58 = vsel %vm6900_vm8, %v7444_v60, 0.0 }
 0x52a   : > { %v5439_v29 = vpop.f32.mrb[24].mxu0  ;;  %v7487_v31 = vld [vmem:[#allocation2 + $0x60] sm:$0xff]  ;;  %v7489_v43 = vld [vmem:[#allocation2 + $0x68] sm:$0xff] }
 0x52b   : > { %v2069_v5 = vadd.f32 %v5439_v29, %v2061_v0  ;;  %v2040_v52 = vpop.f32.mrb[25].mxu0  ;;  %v2204_v36 = vpack.c.bf16 %v7489_v43, %v7487_v31 }
 0x52c   : > { %v2067_v26 = vadd.f32 %v2059_v6, %v2040_v52  ;;  %v5440_v53 = vpop.f32.mrb[26].mxu0  ;;  %v7505_v6 = vld [vmem:[#allocation2 + $0x78] sm:$0xff]  ;;  %v2185_v52 = vsel %vm6931_vm13, %v7446_v21, 0.0 }
 0x52d   : > { %2077 = vst.msk [vmem:[#allocation2 + $0x30] sm:$0xff] %vm457_vm2, %v2069_v5  ;;  %v2070_v37 = vadd.f32 %v5440_v53, %v2062_v39  ;;  %v2043_v13 = vpop.f32.mrb[27].mxu0  ;;  %v2213_v53 = vsel %vm457_vm2, %v2204_v36, 0  ;;  %v2205_v30 = vpack.c.bf16 %v7505_v6, %v7503_v56 }
 0x52e   : > { %2075 = vst.msk [vmem:[#allocation2 + $0x20] sm:$0xff] %vm457_vm2, %v2067_v26  ;;  %v2068_v0 = vadd.f32 %v2060_v48, %v2043_v13  ;;  %5452 = vmatpush3.bf16.xpose.msra.mxu0 %v2210_v16 }
 0x52f   : > { %2078 = vst.msk [vmem:[#allocation2 + $0x38] sm:$0xff] %vm457_vm2, %v2070_v37  ;;  %5755 = vmatprep.subr.msk.bf16.mxu0 %vm457_vm2, %v2204_v36  ;;  %v2216_v21 = vsel %vm457_vm2, %v2205_v30, 0  ;;  %v7530_v36 = vld [vmem:[#allocation2] sm:$0xff] }
 0x530   : > { %2076 = vst.msk [vmem:[#allocation2 + $0x28] sm:$0xff] %vm457_vm2, %v2068_v0  ;;  %v7527_v16 = vld [vmem:[#allocation2 + $0x8] sm:$0xff] }
 0x531   : > { %v2836_v0 = vpack.c.bf16 %v7527_v16, %v7530_v36 }
 0x532   : > { %v5447_v29 = vpop.f32.mrb[28].mxu0 }
 0x533   : > { %v2137_v5 = vpop.f32.mrb[29].mxu0 }
 0x534   : > { %v2180_v55 = vsel %vm6907_vm9, %v2137_v5, 0.0  ;;  %v5448_v39 = vpop.f32.mrb[30].mxu0 }
 0x535   : > { %v2140_v26 = vpop.f32.mrb[31].mxu0  ;;  %v2188_v37 = vadd.f32 %v2184_v58, %v2180_v55 }
 0x536   : > { %v2181_v48 = vsel %vm6925_vm12, %v2140_v26, 0.0  ;;  %5454 = vmatpush3.bf16.xpose.msra.mxu0 %v2213_v53 }
 0x537   : > { %v2189_v60 = vadd.f32 %v2185_v52, %v2181_v48  ;;  %5756 = vmatprep.subr.msk.bf16.mxu0 %vm457_vm2, %v2205_v30  ;;  %v7544_v30 = vld [vmem:[#allocation2 + $0x18] sm:$0xff]  ;;  %v7546_v48 = vld [vmem:[#allocation2 + $0x10] sm:$0xff] }
 0x539   : > { %v2200_v13 = vpack.c.bf16 %v2189_v60, %v2188_v37  ;;  %v7553_v37 = vld [vmem:[#allocation2 + $0x28] sm:$0xff]  ;;  %v7555_v60 = vld [vmem:[#allocation2 + $0x20] sm:$0xff] }
 0x53a   : > { %8593 = vst [vmem:[#allocation26_spill] sm:$0xff] %v7553_v37  ;;  %8594 = vst [vmem:[#allocation24_spill] sm:$0xff] %v7555_v60 }
 0x53e   : > { %5456 = vmatpush3.bf16.xpose.msra.mxu0 %v2216_v21  ;;  %v2838_v21 = vpack.c.bf16 %v7553_v37, %v7555_v60 }
 0x53f   : > { %5461 = vmatprep.subr.bf16.mxu0 %v7205_v2 }
 0x545   : > { %5458 = vmatmul.mubr.msk.bf16.vlgmr.msra.gmra.mrb[32].mxu0 %vm457_vm2, %v7273_v28  ;;  %v2183_v28 = vsel %vm6913_vm10, %v5448_v39, 0.0  ;;  %v2837_v39 = vpack.c.bf16 %v7544_v30, %v7546_v48 }
 0x546   : > { %5462 = vmatpush3.bf16.msra.mxu0 %v7205_v2  ;;  %5465 = vmatprep.mubr.msk.bf16.mxu0 %vm518_vm0, %v2200_v13  ;;  %v2182_v2 = vsel %vm6887_vm6, %v5447_v29, 0.0  ;;  %v2841_v29 = vsel %vm457_vm2, %v2836_v0, 0 }
 0x547   : > { %5463 = vmatprep.subr.bf16.mxu0 %v7208_v20  ;;  %v2844_v13 = vsel %vm457_vm2, %v2837_v39, 0 }
 0x54a   : > { %5464 = vmatpush3.bf16.msra.mxu0 %v7208_v20 }
 0x54b   : > { %5759 = vmatprep.subr.msk.bf16.mxu0 %vm457_vm2, %v2836_v0  ;;  %v7561_v0 = vld [vmem:[#allocation2 + $0x38] sm:$0xff] }
 0x54c   : > { %8595 = vst [vmem:[#allocation25_spill] sm:$0xff] %v7561_v0 }
 0x553   : > { %v2179_v5 = vpop.xlane.xlu1 %2178  ;;  %v2176_v58 = vpop.xlane.xlu0 %2175 }
 0x554   : > { %v2187_v52 = vsel %vm6919_vm11, %v2179_v5, 0.0  ;;  %v2186_v55 = vsel %vm6893_vm7, %v2176_v58, 0.0  ;;  %v7563_v58 = vld [vmem:[#allocation2 + $0x30] sm:$0xff] }
 0x555   : > { %v2191_v26 = vadd.f32 %v2187_v52, %v2183_v28  ;;  %v2190_v53 = vadd.f32 %v2186_v55, %v2182_v2  ;;  %8596 = vst [vmem:[#allocation23_spill] sm:$0xff] %v7563_v58  ;;  %v2847_v52 = vsel %vm457_vm2, %v2838_v21, 0  ;;  %v2839_v55 = vpack.c.bf16 %v7561_v0, %v7563_v58 }
 0x557   : > { %v2201_v20 = vpack.c.bf16 %v2191_v26, %v2190_v53 }
 0x559   : > { %5466 = vmatmul.mubr.msk.bf16.vlgmr.msra.gmra.mrb[32].mxu0 %vm518_vm0, %v2201_v20 }
 0x55a   : > { %5504 = vmatpush3.bf16.xpose.msra.mxu0 %v2841_v29 }
 0x55b   : > { %5760 = vmatprep.subr.msk.bf16.mxu0 %vm457_vm2, %v2837_v39 }
 0x562   : > { %5506 = vmatpush3.bf16.xpose.msra.mxu0 %v2844_v13 }
 0x563   : > { %5761 = vmatprep.subr.msk.bf16.mxu0 %vm457_vm2, %v2838_v21 }
 0x568   : > { %v5427_v5 = vpop.f32.mrb[24].mxu1 }
 0x569   : > { %v5000_v2 = vpack.c.bf16 %v5427_v5, %v5427_v5  ;;  %v1927_v28 = vpop.f32.mrb[25].mxu1  ;;  %v2850_v5 = vsel %vm457_vm2, %v2839_v55, 0 }
 0x56a   : > { %v4998_v26 = vpack.c.bf16 %v1927_v28, %v1927_v28  ;;  %v5428_v53 = vpop.f32.mrb[26].mxu1  ;;  %5508 = vmatpush3.bf16.xpose.msra.mxu0 %v2847_v52 }
 0x56b   : > { %1960 = vst.msk [vmem:[%s7135_s15 + $0x18] sm:$0xf] %vm929_vm14, %v5000_v2  ;;  %v5001_v20 = vpack.c.bf16 %v5428_v53, %v5428_v53  ;;  %v1930_v29 = vpop.f32.mrb[27].mxu1  ;;  %5762 = vmatprep.subr.msk.bf16.mxu0 %vm457_vm2, %v2839_v55 }
 0x56c   : > { %1958 = vst.msk [vmem:[%s7135_s15 + $0x10] sm:$0xf] %vm929_vm14, %v4998_v26  ;;  %v4999_v39 = vpack.c.bf16 %v1930_v29, %v1930_v29 }
 0x56d   : > { %1961 = vst.msk [vmem:[%s7135_s15 + $0x1c] sm:$0xf] %vm929_vm14, %v5001_v20 }
 0x56e   : > { %1959 = vst.msk [vmem:[%s7135_s15 + $0x14] sm:$0xf] %vm929_vm14, %v4999_v39 }
 0x570   : > { %v7577_v13 = vpop.f32.mrb[28].mxu1 }
 0x571   : > { %v7579_v21 = vpop.f32.mrb[29].mxu1 }
 0x572   : > { %v7582_v28 = vpop.f32.mrb[30].mxu1  ;;  %5510 = vmatpush3.bf16.xpose.msra.mxu0 %v2850_v5 }
 0x573   : > { %v7584_v2 = vpop.f32.mrb[31].mxu1  ;;  %5515 = vmatprep.subr.bf16.mxu0 %v7383_v42 }
 0x578   : > { %v7587_v52 = vpop.f32.mrb[32].mxu1 }
 0x579   : > { %v7589_v26 = vpop.f32.mrb[33].mxu1 }
 0x57a   : > { %v7591_v53 = vpop.f32.mrb[34].mxu1 }
 0x57b   : > { %v7593_v20 = vpop.f32.mrb[35].mxu1 }
 0x580   : > { %v5491_v29 = vpop.f32.mrb[36].mxu1 }
 0x581   : > { %v2687_v39 = vsub.f32 %v5491_v29, %v7326_v41  ;;  %v2691_v45 = vsub.f32 0.0, %v5491_v29  ;;  %v2667_v55 = vpop.f32.mrb[37].mxu1 }
 0x582   : > { %v2686_v54 = vsub.f32 %v2667_v55, %v7323_v24  ;;  %v2690_v5 = vsub.f32 0.0, %v2667_v55 }
 0x583   : > { %v2696_v57 = vmul.f32 1.442695, %v2691_v45  ;;  %v2705_v40 = vmul.f32 1.442695, %v2687_v39  ;;  %v8601_v39 = vunpack.c.h.bf16 %v7420_v62 }
 0x584   : > { %v2694_v38 = vmul.f32 1.442695, %v2690_v5  ;;  %v2703_v44 = vmul.f32 1.442695, %v2686_v54  ;;  %v5494_v15 = vpop.f32.mrb[38].mxu1 }
 0x585   : > { %5921 = vpow2.f32 %v2696_v57  ;;  %v2689_v19 = vsub.f32 %v5494_v15, %v7342_v7  ;;  %v2693_v37 = vsub.f32 0.0, %v5494_v15  ;;  %v2677_v0 = vpop.f32.mrb[39].mxu1  ;;  %v8597_v7 = vunpack.c.h.bf16 %v7395_v49 }
 0x586   : > { %5923 = vpow2.f32 %v2705_v40  ;;  %v2688_v60 = vsub.f32 %v2677_v0, %v7339_v46  ;;  %v2692_v58 = vsub.f32 0.0, %v2677_v0  ;;  %v8598_v40 = vunpack.c.h.bf16 %v7390_v51 }
 0x587   : > { %5925 = vpow2.f32 %v2694_v38  ;;  %v2700_v41 = vmul.f32 1.442695, %v2693_v37  ;;  %v2709_v29 = vmul.f32 1.442695, %v2689_v19  ;;  %v8599_v38 = vunpack.c.l.bf16 %v7395_v49 }
 0x588   : > { %5927 = vpow2.f32 %v2703_v44  ;;  %v2698_v24 = vmul.f32 1.442695, %v2692_v58  ;;  %v2707_v55 = vmul.f32 1.442695, %v2688_v60  ;;  %v8600_v37 = vunpack.c.l.bf16 %v7390_v51 }
 0x589   : > { %5929 = vpow2.f32 %v2700_v41 }
 0x58a   : > { %5931 = vpow2.f32 %v2709_v29 }
 0x58b   : > { %5933 = vpow2.f32 %v2698_v24  ;;  %v8602_v24 = vunpack.c.h.bf16 %v7407_v23 }
 0x58c   : > { %5935 = vpow2.f32 %v2707_v55 }
 0x58f   : > { %v5922_v45 = vpop.eup %5921 }
 0x590   : > { %v5924_v57 = vpop.eup %5923  ;;  %v2718_v15 = vmul.f32 %v5922_v45, %v8597_v7  ;;  %v8603_v7 = vunpack.c.l.bf16 %v7420_v62 }
 0x591   : > { %v5926_v54 = vpop.eup %5925  ;;  %v2712_v46 = vmul.f32 %v5924_v57, %v8598_v40 }
 0x592   : > { %v5928_v0 = vpop.eup %5927  ;;  %v2717_v19 = vmul.f32 %v5926_v54, %v8599_v38  ;;  %v8604_v54 = vunpack.c.l.bf16 %v7407_v23 }
 0x593   : > { %v5930_v44 = vpop.eup %5929  ;;  %v2711_v60 = vmul.f32 %v5928_v0, %v8600_v37 }
 0x594   : > { %v5932_v58 = vpop.eup %5931  ;;  %5937 = vrcp.f32 %v5930_v44  ;;  %v2720_v5 = vmul.f32 %v5930_v44, %v8601_v39  ;;  %v2721_v41 = vpack.c.bf16 %v2718_v15, %v2717_v19 }
 0x595   : > { %v5934_v29 = vpop.eup %5933  ;;  %v2714_v55 = vmul.f32 %v5932_v58, %v8602_v24  ;;  %v2715_v45 = vpack.c.bf16 %v2712_v46, %v2711_v60  ;;  %v7648_v24 = vld [vmem:[%s6567_s6 + $0x38] sm:$0xff]  }
 0x596   : > { %v5936_v57 = vpop.eup %5935  ;;  %5757 = vmatprep.subr.msk.bf16.mxu1 %vm457_vm2, %v2721_v41  ;;  %v2748_v49 = vsel %vm457_vm2, %v2721_v41, 0  ;;  %v2719_v51 = vmul.f32 %v5934_v29, %v8603_v7 }
 0x597   : > { %v2713_v40 = vmul.f32 %v5936_v57, %v8604_v54  ;;  %5499 = vmatprep.mubr.msk.bf16.mxu1 %vm457_vm2, %v2715_v45  ;;  %5511 = vmatprep.mubr.msk.bf16.mxu0 %vm457_vm2, %v2715_v45 }
 0x598   : > { %5496 = vmatpush3.bf16.xpose.msra.mxu1 %v2748_v49  ;;  %v2722_v0 = vpack.c.bf16 %v2720_v5, %v2719_v51 }
 0x599   : > { %v2716_v38 = vpack.c.bf16 %v2714_v55, %v2713_v40 }
 0x59a   : > { %5758 = vmatprep.subr.msk.bf16.mxu1 %vm457_vm2, %v2722_v0  ;;  %v2751_v46 = vsel %vm457_vm2, %v2722_v0, 0 }
 0x59b   : > { %5512 = vmatmul.mubr.msk.bf16.vlgmr.msra.gmra.mrb[36].mxu0 %vm457_vm2, %v2716_v38 }
 0x59c   : > { %5516 = vmatpush3.bf16.msra.mxu0 %v7383_v42 }
 0x59d   : > { %5517 = vmatprep.subr.bf16.mxu0 %v7380_v9 }
 0x59e   : > { %v5938_v62 = vpop.eup %5937 }
 0x59f   : > { %v7625_v23 = vrot.slane %v5938_v62, %v6772_v50 }
 0x5a0   : > { %5498 = vmatpush3.bf16.xpose.msra.mxu1 %v2751_v46  ;;  %5518 = vmatpush3.bf16.msra.mxu0 %v7380_v9 }
 0x5a1   : > { %v2727_v44 = vmul.f32 %v7625_v23, %v2717_v19  ;;  %v2728_v37 = vmul.f32 %v7625_v23, %v2718_v15  ;;  %v2729_v60 = vmul.f32 %v7625_v23, %v2719_v51  ;;  %v2730_v58 = vmul.f32 %v7625_v23, %v2720_v5  ;;  %v7636_v15 = vpop.permute.xlu0 %3293  ;;  %v7640_v19 = vpop.permute.xlu1 %3295  ;;  %v7644_v5 = vld [vmem:[%s6567_s6 + $0x30] sm:$0xff]  }
 0x5a3   : > { %v2731_v39 = vpack.c.bf16 %v2728_v37, %v2727_v44  ;;  %v2732_v29 = vpack.c.bf16 %v2730_v58, %v2729_v60 }
 0x5a5   : > { %3400 = vrot.lane.b32.xlu0 %v2731_v39, %s6213_s27  ;;  %3402 = vrot.lane.b32.xlu1 %v2732_v29, %s6213_s27 }
 0x5a6   : > { %5523 = vmatprep.subr.bf16.mxu1 %v2731_v39 }
 0x5a7   : > { %5500 = vmatmul.mubr.msk.bf16.vlgmr.msra.gmra.mrb[40].mxu1 %vm457_vm2, %v2716_v38 }
 0x5a8   : > { %5524 = vmatpush3.bf16.msra.mxu1 %v2731_v39 }
 0x5a9   : > { %5525 = vmatprep.subr.bf16.mxu1 %v2732_v29 }
 0x5ac   : > { %5526 = vmatpush3.bf16.msra.mxu1 %v2732_v29 }
 0x5c3   : > { %2988 = vxpose.xlu0.c.b16.start [1/2] (short) (narrow) %v7383_v42, 64 }
 0x5c7   : > { %2989 = vxpose.xlu0.c.b16.end [2/2] (short) (narrow) %v7380_v9, 64  ;;  %v7691_v9 = vpop.xlane.xlu0 %2806 }
 0x5c8   : > { %3382 = vxpose.xlu1.c.b16.start [1/2] (short) (narrow) %v7636_v15, 64 }
 0x5cb   : > { %v7697_v42 = vpop.xlane.xlu0 %2809 }
 0x5cc   : > { %3383 = vxpose.xlu1.c.b16.end [2/2] (short) (narrow) %v7640_v19, 64 }
 0x5d5   : > { %4014 = vxpose.xlu1.c.b16.start [1/2] (short) (narrow) %v7644_v5, 64 }
 0x5d8   : > { %3113 = vrot.lane.b32.xlu0 %v2721_v41, %s6213_s27 }
 0x5d9   : > { %4015 = vxpose.xlu1.c.b16.end [2/2] (short) (narrow) %v7648_v24, 64 }
 0x5dc   : > { %3115 = vrot.lane.b32.xlu0 %v2722_v0, %s6213_s27 }
 0x5e0   : > { %3107 = vrot.lane.b32.xlu0 %v2715_v45, %s6213_s27 }
 0x5e4   : > { %3109 = vrot.lane.b32.xlu0 %v2716_v38, %s6213_s27 }
 0x5e5   : > { %2465 = vrot.lane.b32.xlu1 %v7458_v18, %s6213_s27 }
 0x5e8   : > { %2505 = vrot.lane.b32.xlu0 %v7579_v21, %s6213_s27 }
 0x5e9   : > { %2467 = vrot.lane.b32.xlu1 %v7460_v61, %s6213_s27 }
 0x5ec   : > { %2509 = vrot.lane.b32.xlu0 %v7577_v13, %s6213_s27 }
 0x5ed   : > { %2507 = vrot.lane.b32.xlu1 %v7584_v2, %s6213_s27 }
 0x5f0   : > { %2475 = vrot.lane.b32.xlu0 %v7489_v43, %s6213_s27 }
 0x5f1   : > { %2469 = vrot.lane.b32.xlu1 %v7454_v34, %s6213_s27 }
 0x5f4   : > { %2515 = vrot.lane.b32.xlu0 %v7593_v20, %s6213_s27 }
 0x5f5   : > { %2471 = vrot.lane.b32.xlu1 %v7462_v3, %s6213_s27 }
 0x5f8   : > { %2479 = vrot.lane.b32.xlu0 %v7505_v6, %s6213_s27 }
 0x5f9   : > { %2511 = vrot.lane.b32.xlu1 %v7582_v28, %s6213_s27 }
 0x5fc   : > { %2517 = vrot.lane.b32.xlu0 %v7587_v52, %s6213_s27 }
 0x5fd   : > { %2473 = vrot.lane.b32.xlu1 %v7487_v31, %s6213_s27 }
 0x600   : > { %2519 = vrot.lane.b32.xlu0 %v7591_v53, %s6213_s27 }
 0x601   : > { %2513 = vrot.lane.b32.xlu1 %v7589_v26, %s6213_s27 }
 0x604   : > { %3182 = vrot.lane.b32.xlu0 %v7415_v22, %s6213_s27  ;;  %v7702_v22 = vpop.xlane.xlu1 %2803 }
 0x605   : > { %2477 = vrot.lane.b32.xlu1 %v7503_v56, %s6213_s27 }
 0x608   : > { %3184 = vrot.lane.b32.xlu0 %v7411_v35, %s6213_s27  ;;  %v7705_v35 = vpop.xlane.xlu1 %2812 }
 0x60c   : > { %3186 = vrot.lane.b32.xlu0 %v7434_v32, %s6213_s27 }
 0x610   : > { %3188 = vrot.lane.b32.xlu0 %v7438_v33, %s6213_s27 }
 0x617   : > { %v7699_v34 = vpop.permute.xlu0 %3400  ;;  %v7716_v56 = vpop.permute.xlu1 %3402 }
 0x618   : > { %5563 = vmatprep.subr.bf16.mxu0 %v7699_v34 }
 0x629   : > { %v2996_v18 = vpop.trf.xlu0 }
 0x62a   : > { %5527 = vmatprep.mubr.msk.bf16.mxu1 %vm518_vm0, %v2996_v18 }
 0x62c   : > { %v7707_v61 = vpop.f32.mrb[32].mxu0 }
 0x62d   : > { %8605 = vst [vmem:[#allocation31_spill] sm:$0xff] %v7707_v61  ;;  %v2997_v3 = vpop.trf.xlu0  ;;  %v7709_v32 = vpop.f32.mrb[33].mxu0 }
 0x62e   : > { %8606 = vst [vmem:[#allocation32_spill] sm:$0xff] %v7709_v32  ;;  %5528 = vmatmul.mubr.msk.bf16.vlgmr.msra.gmra.mrb[44].mxu1 %vm518_vm0, %v2997_v3  ;;  %v7712_v33 = vpop.f32.mrb[34].mxu0  ;;  %v7720_v13 = vpop.trf.xlu1 }
 0x62f   : > { %8607 = vst [vmem:[#allocation33_spill] sm:$0xff] %v7712_v33  ;;  %v7714_v31 = vpop.f32.mrb[35].mxu0 }
 0x630   : > { %8608 = vst [vmem:[#allocation34_spill] sm:$0xff] %v7714_v31 }
 0x631   : > { %v2998_v43 = vpop.trf.xlu0 }
 0x632   : > { %5531 = vmatprep.mubr.msk.bf16.mxu1 %vm518_vm0, %v2998_v43  ;;  %v7722_v21 = vpop.trf.xlu1  ;;  %v2820_v43 = vsel %vm6893_vm7, %v7697_v42, 0.0 }
 0x635   : > { %v2999_v6 = vpop.trf.xlu0 }
 0x636   : > { %5532 = vmatmul.mubr.msk.bf16.gmra.mrb[48].mxu1 %vm518_vm0, %v2999_v6  ;;  %v7724_v28 = vpop.trf.xlu1 }
 0x63a   : > { %v7726_v2 = vpop.trf.xlu1 }
 0x63e   : > { %v7730_v53 = vpop.trf.xlu1 }
 0x642   : > { %v7735_v45 = vpop.trf.xlu1 }
 0x646   : > { %v7739_v49 = vpop.trf.xlu1 }
 0x64a   : > { %v3114_v52 = vpop.permute.xlu0 %3113  ;;  %v7748_v54 = vpop.trf.xlu1 }
 0x64b   : > { %5763 = vmatprep.subr.msk.bf16.mxu1 %vm457_vm2, %v3114_v52  ;;  %v3124_v26 = vsel %vm457_vm2, %v3114_v52, 0  ;;  %8609 = vst [vmem:[#allocation35_spill] sm:$0xff] %v7748_v54 }
 0x64c   : > { %5536 = vmatpush3.bf16.xpose.msra.mxu1 %v3124_v26 }
 0x64e   : > { %v3116_v20 = vpop.permute.xlu0 %3115 }
 0x64f   : > { %5764 = vmatprep.subr.msk.bf16.mxu1 %vm457_vm2, %v3116_v20  ;;  %v3127_v55 = vsel %vm457_vm2, %v3116_v20, 0 }
 0x652   : > { %v3108_v41 = vpop.permute.xlu0 %3107 }
 0x653   : > { %5539 = vmatprep.mubr.msk.bf16.mxu1 %vm457_vm2, %v3108_v41 }
 0x654   : > { %5538 = vmatpush3.bf16.xpose.msra.mxu1 %v3127_v55  ;;  %v2818_v55 = vsel %vm6900_vm8, %v7702_v22, 0.0 }
 0x656   : > { %v7737_v57 = vpop.permute.xlu0 %3109 }
 0x657   : > { %v7752_v0 = vpop.permute.xlu1 %2465 }
 0x65a   : > { %v7741_v7 = vpop.permute.xlu0 %2505 }
 0x65b   : > { %5540 = vmatmul.mubr.msk.bf16.vlgmr.msra.gmra.mrb[52].mxu1 %vm457_vm2, %v7737_v57  ;;  %v7758_v62 = vpop.permute.xlu1 %2467 }
 0x65c   : > { %5551 = vmatprep.mubr.msk.bf16.mxu1 %vm457_vm2, %v3108_v41 }
 0x65e   : > { %v7746_v51 = vpop.permute.xlu0 %2509 }
 0x65f   : > { %v7762_v37 = vpop.permute.xlu1 %2507 }
 0x662   : > { %v7750_v40 = vpop.permute.xlu0 %2475 }
 0x663   : > { %v2470_v29 = vpop.permute.xlu1 %2469 }
 0x666   : > { %v7754_v38 = vpop.permute.xlu0 %2515 }
 0x66a   : > { %v7756_v46 = vpop.permute.xlu0 %2479 }
 0x66e   : > { %v7760_v44 = vpop.permute.xlu0 %2517 }
 0x672   : > { %v7764_v60 = vpop.permute.xlu0 %2519 }
 0x676   : > { %v3183_v58 = vpop.permute.xlu0 %3182 }
 0x677   : > { %v3194_v39 = vsel %vm457_vm2, %v3183_v58, 0.0  ;;  %v2821_v58 = vsel %vm6919_vm11, %v7705_v35, 0.0 }
 0x678   : > { %3195 = vadd.xlane.f32.xlu1 %v3194_v39 }
 0x67a   : > { %v5501_v18 = vpop.f32.mrb[40].mxu1  ;;  %v3185_v3 = vpop.permute.xlu0 %3184 }
 0x67b   : > { %v2816_v6 = vsel %vm6887_vm6, %v5501_v18, 0.0  ;;  %v2787_v52 = vpop.f32.mrb[41].mxu1  ;;  %v3197_v26 = vsel %vm457_vm2, %v3185_v3, 0.0  ;;  %v2819_v18 = vsel %vm6931_vm13, %v7691_v9, 0.0  ;;  %v2472_v3 = vpop.permute.xlu1 %2471 }
 0x67c   : > { %v2814_v20 = vsel %vm6907_vm9, %v2787_v52, 0.0  ;;  %v5502_v41 = vpop.f32.mrb[42].mxu1  ;;  %3198 = vadd.xlane.f32.xlu0 %v3197_v26  ;;  %v2824_v52 = vadd.f32 %v2820_v43, %v2816_v6  ;;  %v7792_v43 = vld [vmem:[%s6569_s5 + $0x60] sm:$0xff]  ;;  %v7795_v6 = vld [vmem:[%s6569_s5 + $0x68] sm:$0xff] }
 0x67d   : > { %v2817_v42 = vsel %vm6913_vm10, %v5502_v41, 0.0  ;;  %v2790_v39 = vpop.f32.mrb[43].mxu1  ;;  %v2822_v61 = vadd.f32 %v2818_v55, %v2814_v20  ;;  %v2489_v55 = vmul.f32 %v7752_v0, %v7191_v14  ;;  %v2496_v0 = vmul.f32 %v7756_v46, %v7191_v14 }
 0x67e   : > { %v2825_v26 = vadd.f32 %v2821_v58, %v2817_v42  ;;  %v2815_v22 = vsel %vm6925_vm12, %v2790_v39, 0.0  ;;  %v3187_v33 = vpop.permute.xlu0 %3186  ;;  %v3081_v46 = vmul.f32 %v7530_v36, %v7625_v23  ;;  %v8610_v36 = vld [vmem:[#allocation23_spill] sm:$0xff] }
 0x67f   : > { %v2823_v31 = vadd.f32 %v2819_v18, %v2815_v22  ;;  %v3200_v35 = vsel %vm457_vm2, %v3187_v33, 0.0  ;;  %v2512_v58 = vpop.permute.xlu1 %2511  ;;  %v7808_v33 = vld [vmem:[%s6569_s5 + $0x78] sm:$0xff] }
 0x680   : > { %v2835_v41 = vpack.c.bf16 %v2825_v26, %v2824_v52  ;;  %3201 = vadd.xlane.f32.xlu0 %v3200_v35  ;;  %v3087_v26 = vmul.f32 %v8610_v36, %v7625_v23  ;;  %v8611_v35 = vld [vmem:[#allocation24_spill] sm:$0xff] }
 0x681   : > { %v2834_v32 = vpack.c.bf16 %v2823_v31, %v2822_v61  ;;  %v5693_v61 = vpack.c.bf16 %v7795_v6, %v7792_v43 }
 0x682   : > { %v3189_v54 = vpop.permute.xlu0 %3188 }
 0x683   : > { %5519 = vmatprep.mubr.msk.bf16.mxu0 %vm518_vm0, %v2834_v32  ;;  %v3203_v9 = vsel %vm457_vm2, %v3189_v54, 0.0  ;;  %v7805_v32 = vld [vmem:[%s6569_s5 + $0x70] sm:$0xff]  ;;  %v2474_v31 = vpop.permute.xlu1 %2473 }
 0x684   : > { %5520 = vmatmul.mubr.msk.bf16.vlgmr.msra.gmra.mrb[36].mxu0 %vm518_vm0, %v2835_v41  ;;  %3204 = vadd.xlane.f32.xlu1 %v3203_v9  ;;  %v5697_v54 = vpack.c.bf16 %v7808_v33, %v7805_v32  ;;  %v2493_v20 = vmul.f32 %v2474_v31, %v7191_v14 }
 0x685   : > { %5564 = vmatpush3.bf16.msra.mxu0 %v7699_v34  ;;  %5567 = vmatprep.mubr.msk.bf16.mxu0 %vm518_vm0, %v7720_v13  ;;  %v2491_v34 = vmul.f32 %v2470_v29, %v7191_v14 }
 0x686   : > { %5565 = vmatprep.subr.bf16.mxu0 %v7716_v56 }
 0x687   : > { %v2514_v13 = vpop.permute.xlu1 %2513  ;;  %v2531_v42 = vadd.f32 %v7746_v51, %v2491_v34  ;;  %v8613_v34 = vld [vmem:[#allocation26_spill] sm:$0xff] }
 0x689   : > { %5566 = vmatpush3.bf16.msra.mxu0 %v7716_v56  ;;  %v2533_v56 = vadd.f32 %v2514_v13, %v2493_v20  ;;  %v3086_v13 = vmul.f32 %v8613_v34, %v7625_v23 }
 0x68a   : > { %5694 = vmatprep.subr.bf16.mxu0 %v5693_v61 }
 0x68b   : > { %v2478_v51 = vpop.permute.xlu1 %2477 }
 0x68c   : > { %5568 = vmatmul.mubr.msk.bf16.vlgmr.msra.gmra.mrb[40].mxu0 %vm518_vm0, %v7722_v21  ;;  %v2529_v21 = vadd.f32 %v7741_v7, %v2489_v55  ;;  %v2495_v7 = vmul.f32 %v2478_v51, %v7191_v14 }
 0x68d   : > { %5696 = vmatpush3.bf16.msra.mxu0 %v5693_v61  ;;  %5571 = vmatprep.mubr.msk.bf16.mxu0 %vm518_vm0, %v7724_v28  ;;  %v2492_v28 = vmul.f32 %v2472_v3, %v7191_v14 }
 0x68e   : > { %5698 = vmatprep.subr.bf16.mxu0 %v5697_v54 }
 0x68f   : > { %v2532_v29 = vadd.f32 %v2512_v58, %v2492_v28  ;;  %v8612_v58 = vld [vmem:[#allocation25_spill] sm:$0xff] }
 0x690   : > { %v3088_v61 = vmul.f32 %v8612_v58, %v7625_v23 }
 0x691   : > { %5700 = vmatpush3.bf16.msra.mxu0 %v5697_v54 }
 0x694   : > { %5572 = vmatmul.mubr.msk.bf16.gmra.mrb[44].mxu0 %vm518_vm0, %v7726_v2  ;;  %v2490_v2 = vmul.f32 %v7758_v62, %v7191_v14  ;;  %v2494_v62 = vmul.f32 %v7750_v40, %v7191_v14  ;;  %v3082_v40 = vmul.f32 %v7527_v16, %v7625_v23  ;;  %v3085_v16 = vmul.f32 %v8611_v35, %v7625_v23 }
 0x695   : > { %2553 = vrot.lane.b32.xlu1 %v2533_v56, %s6213_s27  ;;  %5583 = vmatprep.mubr.msk.f32.mxu0 %vm518_vm0, %v6585_v4 }
 0x696   : > { %2549 = vrot.lane.b32.xlu0 %v2531_v42, %s6213_s27  ;;  %v2530_v4 = vadd.f32 %v7762_v37, %v2490_v2  ;;  %v2534_v37 = vadd.f32 %v7754_v38, %v2494_v62 }
 0x69a   : > { %2545 = vrot.lane.b32.xlu0 %v2529_v21, %s6213_s27 }
 0x69c   : > { %5584 = vmatmul.mubr.msk.f32.vlgmr.msra.gmra.mrb[48].mxu0 %vm518_vm0, %v6621_v17  ;;  %v2535_v17 = vadd.f32 %v7760_v44, %v2495_v7 }
 0x69d   : > { %5586 = vmatprep.mubr.msk.f32.mxu0 %vm518_vm0, %v6648_v25  ;;  %v2536_v25 = vadd.f32 %v7764_v60, %v2496_v0  ;;  %v3084_v60 = vmul.f32 %v7544_v30, %v7625_v23 }
 0x69e   : > { %2551 = vrot.lane.b32.xlu0 %v2532_v29, %s6213_s27 }
 0x6a0   : > { %5587 = vmatmul.mubr.msk.f32.gmra.mrb[50].mxu0 %vm518_vm0, %v6660_v27  ;;  %v3083_v27 = vmul.f32 %v7546_v48, %v7625_v23 }
 0x6a2   : > { %2547 = vrot.lane.b32.xlu0 %v2530_v4, %s6213_s27 }
 0x6a6   : > { %2557 = vrot.lane.b32.xlu0 %v2535_v17, %s6213_s27 }
 0x6aa   : > { %2559 = vrot.lane.b32.xlu0 %v2536_v25, %s6213_s27 }
 0x6ae   : > { %2555 = vrot.lane.b32.xlu0 %v2534_v37, %s6213_s27 }
 0x701   : > { %v5529_v44 = vpop.f32.mrb[44].mxu1 }
 0x702   : > { %v3091_v39 = vadd.f32 %v5529_v44, %v3083_v27  ;;  %v3050_v18 = vpop.f32.mrb[45].mxu1 }
 0x703   : > { %v3089_v3 = vadd.f32 %v3081_v46, %v3050_v18  ;;  %v5530_v14 = vpop.f32.mrb[46].mxu1 }
 0x704   : > { %3099 = vst.msk [vmem:[#allocation2 + $0x10] sm:$0xff] %vm457_vm2, %v3091_v39  ;;  %v3092_v38 = vadd.f32 %v5530_v14, %v3084_v60  ;;  %v3053_v52 = vpop.f32.mrb[47].mxu1 }
 0x705   : > { %3097 = vst.msk [vmem:[#allocation2] sm:$0xff] %vm457_vm2, %v3089_v3  ;;  %v3090_v48 = vadd.f32 %v3082_v40, %v3053_v52  ;;  %v3196_v20 = vpop.xlane.xlu1 %3195 }
 0x706   : > { %3100 = vst.msk [vmem:[#allocation2 + $0x18] sm:$0xff] %vm457_vm2, %v3092_v38 }
 0x707   : > { %3098 = vst.msk [vmem:[#allocation2 + $0x8] sm:$0xff] %vm457_vm2, %v3090_v48  ;;  %v3210_v48 = vsel %vm6900_vm8, %v3196_v20, 0.0 }
 0x709   : > { %v7867_v30 = vpop.xlane.xlu0 %3198  ;;  %v5533_v22 = vpop.f32.mrb[48].mxu1 }
 0x70a   : > { %v3095_v41 = vadd.f32 %v5533_v22, %v3087_v26  ;;  %v3066_v9 = vpop.f32.mrb[49].mxu1  ;;  %v3211_v52 = vsel %vm6931_vm13, %v7867_v30, 0.0 }
 0x70b   : > { %v3093_v31 = vadd.f32 %v3085_v16, %v3066_v9  ;;  %v5534_v54 = vpop.f32.mrb[50].mxu1 }
 0x70c   : > { %3103 = vst.msk [vmem:[#allocation2 + $0x30] sm:$0xff] %vm457_vm2, %v3095_v41  ;;  %v3096_v56 = vadd.f32 %v5534_v54, %v3088_v61  ;;  %v3069_v55 = vpop.f32.mrb[51].mxu1 }
 0x70d   : > { %3101 = vst.msk [vmem:[#allocation2 + $0x20] sm:$0xff] %vm457_vm2, %v3093_v31  ;;  %v3094_v42 = vadd.f32 %v3086_v13, %v3069_v55  ;;  %v3202_v21 = vpop.xlane.xlu0 %3201 }
 0x70e   : > { %3104 = vst.msk [vmem:[#allocation2 + $0x38] sm:$0xff] %vm457_vm2, %v3096_v56  ;;  %v3212_v3 = vsel %vm6893_vm7, %v3202_v21, 0.0 }
 0x70f   : > { %3102 = vst.msk [vmem:[#allocation2 + $0x28] sm:$0xff] %vm457_vm2, %v3094_v42 }
 0x711   : > { %v3205_v28 = vpop.xlane.xlu1 %3204  ;;  %v2550_v29 = vpop.permute.xlu0 %2549 }
 0x712   : > { %2571 = vst.msk [vmem:[#allocation2 + $0x50] sm:$0xff] %vm457_vm2, %v2550_v29  ;;  %v3213_v14 = vsel %vm6919_vm11, %v3205_v28, 0.0  ;;  %v7934_v28 = vld [vmem:[%s6551_s23 + $0x30] sm:$0xff]  }
 0x713   : > { %v7937_v29 = vld [vmem:[%s6559_s20 + $0x30] sm:$0xff]  }
 0x715   : > { %v2554_v51 = vpop.permute.xlu1 %2553  ;;  %v2546_v2 = vpop.permute.xlu0 %2545 }
 0x716   : > { %2573 = vst.msk [vmem:[#allocation2 + $0x60] sm:$0xff] %vm457_vm2, %v2554_v51  ;;  %2569 = vst.msk [vmem:[#allocation2 + $0x40] sm:$0xff] %vm457_vm2, %v2546_v2  ;;  %v5073_v2 = vunpack.c.l.bf16 %v7934_v28 }
 0x719   : > { %v2552_v4 = vpop.permute.xlu0 %2551  ;;  %v7892_v44 = vld [vmem:[#allocation2 + $0x50] sm:$0xff] }
 0x71a   : > { %2572 = vst.msk [vmem:[#allocation2 + $0x58] sm:$0xff] %vm457_vm2, %v2552_v4  ;;  %v5081_v4 = vunpack.c.l.bf16 %v7937_v29 }
 0x71d   : > { %v2548_v7 = vpop.permute.xlu0 %2547  ;;  %v3218_v17 = vld [vmem:[#allocation2 + $0x40] sm:$0xff] }
 0x71e   : > { %2570 = vst.msk [vmem:[#allocation2 + $0x48] sm:$0xff] %vm457_vm2, %v2548_v7  ;;  %3491 = vrot.lane.b32.xlu0 %v3218_v17, %s6213_s27  ;;  %v7916_v41 = vld [vmem:[#allocation2 + $0x60] sm:$0xff] }
 0x71f   : > { %v7946_v7 = vld [vmem:[%s8480_s4] ss:$0 sm:$0xff] }
 0x721   : > { %v2558_v0 = vpop.permute.xlu0 %2557  ;;  %v7888_v37 = vld [vmem:[#allocation2 + $0x58] sm:$0xff] }
 0x722   : > { %2575 = vst.msk [vmem:[#allocation2 + $0x70] sm:$0xff] %vm457_vm2, %v2558_v0  ;;  %v3229_v39 = vpack.c.bf16 %v7888_v37, %v7892_v44 }
 0x724   : > { %v3236_v22 = vsel %vm457_vm2, %v3229_v39, 0 }
 0x725   : > { %v7886_v25 = vld [vmem:[#allocation2 + $0x48] sm:$0xff]  ;;  %v2560_v62 = vpop.permute.xlu0 %2559 }
 0x726   : > { %v3228_v27 = vpack.c.bf16 %v7886_v25, %v3218_v17  ;;  %2576 = vst.msk [vmem:[#allocation2 + $0x78] sm:$0xff] %vm457_vm2, %v2560_v62  ;;  %v3759_v17 = vmul.f32 %v7946_v7, %v5073_v2  ;;  %v7959_v62 = vld [vmem:[#allocation2 + $0x8] sm:$0xff] }
 0x728   : > { %5765 = vmatprep.subr.msk.bf16.mxu1 %vm457_vm2, %v3228_v27  ;;  %v3233_v46 = vsel %vm457_vm2, %v3228_v27, 0  ;;  %v7953_v0 = vmul.f32 %v5081_v4, %v3759_v17  ;;  %v7962_v27 = vld [vmem:[#allocation2] sm:$0xff] }
 0x729   : > { %v2556_v18 = vpop.permute.xlu0 %2555  ;;  %5544 = vmatpush3.bf16.xpose.msra.mxu1 %v3233_v46  ;;  %v7927_v55 = vld [vmem:[#allocation2 + $0x70] sm:$0xff]  ;;  %v3862_v46 = vpack.c.bf16 %v7959_v62, %v7962_v27 }
 0x72a   : > { %2574 = vst.msk [vmem:[#allocation2 + $0x68] sm:$0xff] %vm457_vm2, %v2556_v18  ;;  %5766 = vmatprep.subr.msk.bf16.mxu1 %vm457_vm2, %v3229_v39 }
 0x72b   : > { %v3867_v39 = vsel %vm457_vm2, %v3862_v46, 0 }
 0x72d   : > { %v7925_v56 = vld [vmem:[#allocation2 + $0x78] sm:$0xff] }
 0x72e   : > { %v5541_v60 = vpop.f32.mrb[52].mxu1  ;;  %v3231_v21 = vpack.c.bf16 %v7925_v56, %v7927_v55 }
 0x72f   : > { %v3208_v40 = vsel %vm6887_vm6, %v5541_v60, 0.0  ;;  %v3163_v38 = vpop.f32.mrb[53].mxu1 }
 0x730   : > { %v3206_v36 = vsel %vm6907_vm9, %v3163_v38, 0.0  ;;  %v5542_v26 = vpop.f32.mrb[54].mxu1  ;;  %v3216_v30 = vadd.f32 %v3212_v3, %v3208_v40  ;;  %v3242_v51 = vsel %vm457_vm2, %v3231_v21, 0 }
 0x731   : > { %v3209_v35 = vsel %vm6913_vm10, %v5542_v26, 0.0  ;;  %v3166_v16 = vpop.f32.mrb[55].mxu1  ;;  %5546 = vmatpush3.bf16.xpose.msra.mxu1 %v3236_v22  ;;  %v7918_v9 = vld [vmem:[#allocation2 + $0x68] sm:$0xff]  ;;  %v3214_v54 = vadd.f32 %v3210_v48, %v3206_v36  ;;  %v7985_v26 = vld [vmem:[%s6559_s20 + $0x38] sm:$0xff]   ;;  %s6113_s20 = scalar_lea.vmem %s6112_s30, 2048 }
 0x732   : > { %v3217_v58 = vadd.f32 %v3213_v14, %v3209_v35  ;;  %v3207_v61 = vsel %vm6925_vm12, %v3166_v16, 0.0  ;;  %v3230_v31 = vpack.c.bf16 %v7918_v9, %v7916_v41  ;;  %v7978_v14 = vld [vmem:[%s6551_s23 + $0x38] sm:$0xff]   ;;  %v7982_v36 = vld [vmem:[#allocation2 + $0x28] sm:$0xff]  ;;  %v7992_v16 = vld [vmem:[#allocation2 + $0x20] sm:$0xff]  ;;  %s6107_s23 = scalar_lea.vmem %s8415_s0, 1024 }
 0x733   : > { %v3215_v34 = vadd.f32 %v3211_v52, %v3207_v61  ;;  %v5078_v35 = vunpack.c.h.bf16 %v7978_v14  ;;  %v5086_v61 = vunpack.c.h.bf16 %v7985_v26  ;;  %p6108_p13 = scmp.ne.s32.totalorder %s8415_s0, %s6107_s23  ;;  %p6115_p12 = scmp.lt.s32.totalorder %s6113_s20, %s6107_s23 }
 0x734   : > { %v3227_v13 = vpack.c.bf16 %v3217_v58, %v3216_v30  ;;  %5767 = vmatprep.subr.msk.bf16.mxu1 %vm457_vm2, %v3230_v31  ;;  %v3239_v42 = vsel %vm457_vm2, %v3230_v31, 0  ;;  %v3864_v58 = vpack.c.bf16 %v7982_v36, %v7992_v16 }
 0x735   : > { %v3226_v20 = vpack.c.bf16 %v3215_v34, %v3214_v54  ;;  %v3762_v31 = vmul.f32 %v7946_v7, %v5078_v35  ;;  %p6109_p11 = pnand %p6108_p13, %p8624_p3  ;;  %p6116_p7 = por %p6115_p12, %p6114_p9 }
 0x736   : > { %v3873_v17 = vsel %vm457_vm2, %v3864_v58, 0 }
 0x737   : > { %v8006_v34 = vmul.f32 %v5086_v61, %v3762_v31  ;;  %p6110_p5 = pneg %p6109_p11 }
 0x739   : > { %5548 = vmatpush3.bf16.xpose.msra.mxu1 %v3239_v42  ;;  %p6117_p1 = pnand %p6116_p7, %p6110_p5 }
 0x73a   : > { %5768 = vmatprep.subr.msk.bf16.mxu1 %vm457_vm2, %v3231_v21  ;;  %v8012_v21 = vld [vmem:[#allocation2 + $0x38] sm:$0xff] }
 0x741   : > { %5550 = vmatpush3.bf16.xpose.msra.mxu1 %v3242_v51  ;;  %v8015_v51 = vld [vmem:[#allocation2 + $0x30] sm:$0xff] }
 0x742   : > { %5555 = vmatprep.subr.bf16.mxu1 %v7636_v15 }
 0x748   : > { %5552 = vmatmul.mubr.msk.bf16.vlgmr.msra.gmra.mrb[56].mxu1 %vm457_vm2, %v7737_v57  ;;  %v7968_v57 = vld [vmem:[#allocation2 + $0x18] sm:$0xff] }
 0x749   : > { %5556 = vmatpush3.bf16.msra.mxu1 %v7636_v15  ;;  %5559 = vmatprep.mubr.msk.bf16.mxu1 %vm518_vm0, %v3226_v20  ;;  %v7971_v15 = vld [vmem:[#allocation2 + $0x10] sm:$0xff] }
 0x74a   : > { %5557 = vmatprep.subr.bf16.mxu1 %v7640_v19  ;;  %v3863_v18 = vpack.c.bf16 %v7968_v57, %v7971_v15 }
 0x74c   : > { %v3870_v30 = vsel %vm457_vm2, %v3863_v18, 0 }
 0x74d   : > { %5558 = vmatpush3.bf16.msra.mxu1 %v7640_v19 }
 0x74e   : > { %5771 = vmatprep.subr.msk.bf16.mxu1 %vm457_vm2, %v3862_v46  ;;  %v3865_v46 = vpack.c.bf16 %v8012_v21, %v8015_v51 }
 0x754   : > { %5560 = vmatmul.mubr.msk.bf16.vlgmr.msra.gmra.mrb[56].mxu1 %vm518_vm0, %v3227_v13 }
 0x756   : > { %5598 = vmatpush3.bf16.xpose.msra.mxu1 %v3867_v39 }
 0x757   : > { %v5521_v60 = vpop.f32.mrb[36].mxu0  ;;  %5772 = vmatprep.subr.msk.bf16.mxu1 %vm457_vm2, %v3863_v18 }
 0x758   : > { %v5008_v19 = vpack.c.bf16 %v5521_v60, %v5521_v60  ;;  %v2953_v3 = vpop.f32.mrb[37].mxu0 }
 0x759   : > { %v5006_v40 = vpack.c.bf16 %v2953_v3, %v2953_v3  ;;  %v5522_v38 = vpop.f32.mrb[38].mxu0  ;;  %v3876_v3 = vsel %vm457_vm2, %v3865_v46, 0 }
 0x75a   : > { %2986 = vst.msk [vmem:[%s7135_s15 + $0x28] sm:$0xf] %vm929_vm14, %v5008_v19  ;;  %v5009_v52 = vpack.c.bf16 %v5522_v38, %v5522_v38  ;;  %v2956_v48 = vpop.f32.mrb[39].mxu0 }
 0x75b   : > { %2984 = vst.msk [vmem:[%s7135_s15 + $0x20] sm:$0xf] %vm929_vm14, %v5006_v40  ;;  %v5007_v22 = vpack.c.bf16 %v2956_v48, %v2956_v48 }
 0x75c   : > { %2987 = vst.msk [vmem:[%s7135_s15 + $0x2c] sm:$0xf] %vm929_vm14, %v5009_v52 }
 0x75d   : > { %2985 = vst.msk [vmem:[%s7135_s15 + $0x24] sm:$0xf] %vm929_vm14, %v5007_v22 }
 0x75e   : > { %5600 = vmatpush3.bf16.xpose.msra.mxu1 %v3870_v30 }
 0x75f   : > { %v5569_v54 = vpop.f32.mrb[40].mxu0  ;;  %5773 = vmatprep.subr.msk.bf16.mxu1 %vm457_vm2, %v3864_v58 }
 0x760   : > { %v8008_v13 = vpop.f32.mrb[41].mxu0 }
 0x761   : > { %v8010_v20 = vpop.f32.mrb[42].mxu0 }
 0x762   : > { %v3455_v42 = vpop.f32.mrb[43].mxu0 }
 0x763   : > { %3533 = vrot.lane.b32.xlu0 %v3455_v42, %s6213_s27 }
 0x766   : > { %5602 = vmatpush3.bf16.xpose.msra.mxu1 %v3873_v17 }
 0x767   : > { %3497 = vrot.lane.b32.xlu0 %v7888_v37, %s6213_s27  ;;  %v8022_v39 = vpop.f32.mrb[44].mxu0  ;;  %5774 = vmatprep.subr.msk.bf16.mxu1 %vm457_vm2, %v3865_v46 }
 0x768   : > { %v8025_v18 = vpop.f32.mrb[45].mxu0 }
 0x769   : > { %v8027_v60 = vpop.f32.mrb[46].mxu0 }
 0x76a   : > { %v3471_v19 = vpop.f32.mrb[47].mxu0 }
 0x76b   : > { %3535 = vrot.lane.b32.xlu0 %v5569_v54, %s6213_s27 }
 0x76e   : > { %5604 = vmatpush3.bf16.xpose.msra.mxu1 %v3876_v3 }
 0x76f   : > { %4321 = vrot.lane.b32.xlu0 %v7648_v24, %s6213_s27  ;;  %v5585_v40 = vpop.f32.mrb[48].mxu0  ;;  %5609 = vmatprep.subr.bf16.mxu1 %v7644_v5 }
 0x770   : > { %v3713_v37 = vsub.f32 %v5585_v40, %v7795_v6  ;;  %v3717_v38 = vsub.f32 0.0, %v5585_v40  ;;  %v3693_v52 = vpop.f32.mrb[49].mxu0 }
 0x771   : > { %v3712_v48 = vsub.f32 %v3693_v52, %v7792_v43  ;;  %v3716_v22 = vsub.f32 0.0, %v3693_v52 }
 0x772   : > { %v3722_v30 = vmul.f32 1.442695, %v3717_v38  ;;  %v3731_v58 = vmul.f32 1.442695, %v3713_v37 }
 0x773   : > { %v3720_v31 = vmul.f32 1.442695, %v3716_v22  ;;  %v3729_v54 = vmul.f32 1.442695, %v3712_v48  ;;  %3501 = vrot.lane.b32.xlu0 %v7918_v9, %s6213_s27  ;;  %v5588_v42 = vpop.f32.mrb[50].mxu0  ;;  %v5077_v9 = vunpack.c.l.bf16 %v7978_v14  ;;  %v5074_v22 = vunpack.c.h.bf16 %v7934_v28 }
 0x774   : > { %5939 = vpow2.f32 %v3722_v30  ;;  %v3715_v17 = vsub.f32 %v5588_v42, %v7808_v33  ;;  %v3719_v46 = vsub.f32 0.0, %v5588_v42  ;;  %v3703_v3 = vpop.f32.mrb[51].mxu0  ;;  %v5085_v33 = vunpack.c.l.bf16 %v7985_v26 }
 0x775   : > { %5941 = vpow2.f32 %v3731_v58  ;;  %v3714_v6 = vsub.f32 %v3703_v3, %v7805_v32  ;;  %v3718_v40 = vsub.f32 0.0, %v3703_v3  ;;  %v3761_v48 = vmul.f32 %v7946_v7, %v5077_v9 }
 0x776   : > { %5943 = vpow2.f32 %v3720_v31  ;;  %v3726_v43 = vmul.f32 1.442695, %v3719_v46  ;;  %v3735_v52 = vmul.f32 1.442695, %v3715_v17  ;;  %v5082_v32 = vunpack.c.h.bf16 %v7937_v29 }
 0x777   : > { %5945 = vpow2.f32 %v3729_v54  ;;  %v3724_v37 = vmul.f32 1.442695, %v3718_v40  ;;  %v3733_v38 = vmul.f32 1.442695, %v3714_v6  ;;  %3541 = vrot.lane.b32.xlu0 %v3471_v19, %s6213_s27  ;;  %v8046_v30 = vmul.f32 %v5085_v33, %v3761_v48 }
 0x778   : > { %5947 = vpow2.f32 %v3726_v43 }
 0x779   : > { %5949 = vpow2.f32 %v3735_v52 }
 0x77a   : > { %5951 = vpow2.f32 %v3724_v37 }
 0x77b   : > { %5953 = vpow2.f32 %v3733_v38 }
 0x77e   : > { %v5940_v58 = vpop.eup %5939 }
 0x77f   : > { %v5942_v31 = vpop.eup %5941  ;;  %v3744_v19 = vmul.f32 %v5940_v58, %v5082_v32 }
 0x780   : > { %v5944_v54 = vpop.eup %5943  ;;  %v3738_v42 = vmul.f32 %v5942_v31, %v5074_v22 }
 0x781   : > { %v5946_v17 = vpop.eup %5945  ;;  %v3743_v46 = vmul.f32 %v5944_v54, %v5081_v4 }
 0x782   : > { %v5948_v3 = vpop.eup %5947  ;;  %v3737_v6 = vmul.f32 %v5946_v17, %v5073_v2 }
 0x783   : > { %v5950_v40 = vpop.eup %5949  ;;  %5955 = vrcp.f32 %v5948_v3  ;;  %v3747_v43 = vpack.c.bf16 %v3744_v19, %v3743_v46  ;;  %v3746_v52 = vmul.f32 %v5948_v3, %v5086_v61 }
 0x784   : > { %v5952_v37 = vpop.eup %5951  ;;  %v3741_v38 = vpack.c.bf16 %v3738_v42, %v3737_v6  ;;  %v3740_v48 = vmul.f32 %v5950_v40, %v5078_v35 }
 0x785   : > { %v5954_v58 = vpop.eup %5953  ;;  %4139 = vrot.lane.b32.xlu1 %v3747_v43, %s6213_s27  ;;  %5769 = vmatprep.subr.msk.bf16.mxu0 %vm457_vm2, %v3747_v43  ;;  %v3774_v4 = vsel %vm457_vm2, %v3747_v43, 0  ;;  %v3745_v28 = vmul.f32 %v5952_v37, %v5085_v33 }
 0x786   : > { %5593 = vmatprep.mubr.msk.bf16.mxu0 %vm457_vm2, %v3741_v38  ;;  %5605 = vmatprep.mubr.msk.bf16.mxu1 %vm457_vm2, %v3741_v38  ;;  %v3739_v2 = vmul.f32 %v5954_v58, %v5077_v9 }
 0x787   : > { %5590 = vmatpush3.bf16.xpose.msra.mxu0 %v3774_v4  ;;  %v3748_v26 = vpack.c.bf16 %v3746_v52, %v3745_v28 }
 0x788   : > { %v3742_v61 = vpack.c.bf16 %v3740_v48, %v3739_v2 }
 0x789   : > { %3493 = vrot.lane.b32.xlu1 %v7886_v25, %s6213_s27  ;;  %4141 = vrot.lane.b32.xlu0 %v3748_v26, %s6213_s27  ;;  %v3777_v14 = vsel %vm457_vm2, %v3748_v26, 0 }
 0x78a   : > { %5770 = vmatprep.subr.msk.bf16.mxu0 %vm457_vm2, %v3748_v26  ;;  %5606 = vmatmul.mubr.msk.bf16.vlgmr.msra.gmra.mrb[60].mxu1 %vm457_vm2, %v3742_v61 }
 0x78b   : > { %5610 = vmatpush3.bf16.msra.mxu1 %v7644_v5 }
 0x78c   : > { %5611 = vmatprep.subr.bf16.mxu1 %v7648_v24 }
 0x78d   : > { %v5956_v35 = vpop.eup %5955  ;;  %3531 = vrot.lane.b32.xlu1 %v8008_v13, %s6213_s27  ;;  %4135 = vrot.lane.b32.xlu0 %v3742_v61, %s6213_s27 }
 0x78e   : > { %v8075_v25 = vrot.slane %v5956_v35, %v6772_v50  ;;  %v3760_v50 = vmul.f32 %v7946_v7, %v5074_v22  ;;  %v3837_v7 = vsel %vm457_vm2, %v8006_v34, 0.0 }
 0x78f   : > { %5592 = vmatpush3.bf16.xpose.msra.mxu0 %v3777_v14  ;;  %5612 = vmatpush3.bf16.msra.mxu1 %v7648_v24  ;;  %v8614_v24 = vld [vmem:[#allocation35_spill] sm:$0xff] }
 0x790   : > { %v3753_v9 = vmul.f32 %v8075_v25, %v3743_v46  ;;  %v3754_v33 = vmul.f32 %v8075_v25, %v3744_v19  ;;  %v3755_v31 = vmul.f32 %v8075_v25, %v3745_v28  ;;  %v3756_v54 = vmul.f32 %v8075_v25, %v3746_v52 }
 0x791   : > { %3495 = vrot.lane.b32.xlu1 %v7892_v44, %s6213_s27  ;;  %v3834_v46 = vsel %vm457_vm2, %v8046_v30, 0.0 }
 0x792   : > { %v8084_v13 = vpack.c.bf16 %v3754_v33, %v3753_v9  ;;  %v3758_v42 = vpack.c.bf16 %v3756_v54, %v3755_v31 }
 0x794   : > { %5617 = vmatprep.subr.bf16.mxu0 %v8084_v13 }
 0x795   : > { %4133 = vrot.lane.b32.xlu1 %v3741_v38, %s6213_s27 }
 0x796   : > { %5594 = vmatmul.mubr.msk.bf16.vlgmr.msra.gmra.mrb[52].mxu0 %vm457_vm2, %v3742_v61 }
 0x797   : > { %5618 = vmatpush3.bf16.msra.mxu0 %v8084_v13  ;;  %5621 = vmatprep.mubr.msk.bf16.mxu0 %vm518_vm0, %v7730_v53 }
 0x798   : > { %5619 = vmatprep.subr.bf16.mxu0 %v3758_v42 }
 0x799   : > { %4319 = vrot.lane.b32.xlu1 %v7644_v5, %s6213_s27  ;;  %v3764_v5 = vmul.f32 %v5082_v32, %v3760_v50 }
 0x79b   : > { %5620 = vmatpush3.bf16.msra.mxu0 %v3758_v42  ;;  %v3831_v53 = vsel %vm457_vm2, %v3764_v5, 0.0 }
 0x79d   : > { %3537 = vrot.lane.b32.xlu1 %v8010_v20, %s6213_s27 }
 0x79e   : > { %5622 = vmatmul.mubr.msk.bf16.vlgmr.msra.gmra.mrb[56].mxu0 %vm518_vm0, %v7735_v45  ;;  %v3828_v45 = vsel %vm457_vm2, %v7953_v0, 0.0 }
 0x79f   : > { %5625 = vmatprep.mubr.msk.bf16.mxu0 %vm518_vm0, %v7739_v49  ;;  %v3492_v49 = vpop.permute.xlu0 %3491 }
 0x7a0   : > { %v3515_v9 = vmul.f32 %v3492_v49, %v7625_v23 }
 0x7a1   : > { %3499 = vrot.lane.b32.xlu1 %v7916_v41, %s6213_s27 }
 0x7a5   : > { %3539 = vrot.lane.b32.xlu1 %v8025_v18, %s6213_s27 }
 0x7a6   : > { %5626 = vmatmul.mubr.msk.bf16.gmra.mrb[60].mxu0 %vm518_vm0, %v8614_v24 }
 0x7ac   : > { %3832 = vadd.xlane.f32.xlu0 %v3831_v53 }
 0x7c2   : > { %3503 = vrot.lane.b32.xlu0 %v7927_v55, %s6213_s27 }
 0x7c9   : > { %3829 = vadd.xlane.f32.xlu1 %v3828_v45 }
 0x7d5   : > { %v3534_v44 = vpop.permute.xlu0 %3533 }
 0x7d9   : > { %v3498_v41 = vpop.permute.xlu0 %3497 }
 0x7da   : > { %3505 = vrot.lane.b32.xlu1 %v7925_v56, %s6213_s27  ;;  %v3518_v4 = vmul.f32 %v3498_v41, %v7625_v23 }
 0x7dd   : > { %v3536_v29 = vpop.permute.xlu0 %3535 }
 0x7e1   : > { %3838 = vadd.xlane.f32.xlu0 %v3837_v7  ;;  %v8118_v20 = vpop.permute.xlu0 %4321 }
 0x7e5   : > { %v3502_v18 = vpop.permute.xlu0 %3501 }
 0x7e6   : > { %v3520_v55 = vmul.f32 %v3502_v18, %v7625_v23 }
 0x7e9   : > { %v3542_v32 = vpop.permute.xlu0 %3541 }
 0x7ea   : > { %v8121_v22 = vadd.f32 %v3542_v32, %v3520_v55  ;;  %v4109_v32 = vmul.f32 %v7971_v15, %v8075_v25 }
 0x7f7   : > { %v4140_v19 = vpop.permute.xlu1 %4139  ;;  %3543 = vrot.lane.b32.xlu0 %v8022_v39, %s6213_s27 }
 0x7f8   : > { %v4150_v17 = vsel %vm457_vm2, %v4140_v19, 0  ;;  %5775 = vmatprep.subr.msk.bf16.mxu0 %vm457_vm2, %v4140_v19 }
 0x7f9   : > { %5630 = vmatpush3.bf16.xpose.msra.mxu0 %v4150_v17  ;;  %v4107_v17 = vmul.f32 %v7962_v27, %v8075_v25 }
 0x7fb   : > { %v3494_v56 = vpop.permute.xlu1 %3493  ;;  %4210 = vrot.lane.b32.xlu0 %v3764_v5, %s6213_s27  ;;  %v4142_v3 = vpop.permute.xlu0 %4141 }
 0x7fc   : > { %v3516_v6 = vmul.f32 %v3494_v56, %v7625_v23  ;;  %5776 = vmatprep.subr.msk.bf16.mxu0 %vm457_vm2, %v4142_v3  ;;  %v4153_v39 = vsel %vm457_vm2, %v4142_v3, 0 }
 0x7fe   : > { %v8132_v40 = vadd.f32 %v3534_v44, %v3516_v6  ;;  %3835 = vadd.xlane.f32.xlu1 %v3834_v46  ;;  %v4110_v6 = vmul.f32 %v7968_v57, %v8075_v25  ;;  %v4113_v57 = vmul.f32 %v8015_v51, %v8075_v25 }
 0x7ff   : > { %v3532_v43 = vpop.permute.xlu1 %3531  ;;  %4214 = vrot.lane.b32.xlu0 %v8006_v34, %s6213_s27  ;;  %v8139_v48 = vpop.permute.xlu0 %4135 }
 0x801   : > { %5632 = vmatpush3.bf16.xpose.msra.mxu0 %v4153_v39 }
 0x803   : > { %v3496_v52 = vpop.permute.xlu1 %3495  ;;  %4428 = vrot.lane.b32.xlu0 %v3758_v42, %s6213_s27 }
 0x804   : > { %v3517_v37 = vmul.f32 %v3496_v52, %v7625_v23  ;;  %v4108_v52 = vmul.f32 %v7959_v62, %v8075_v25  ;;  %v4111_v62 = vmul.f32 %v7992_v16, %v8075_v25 }
 0x806   : > { %v3557_v38 = vadd.f32 %v3536_v29, %v3517_v37 }
 0x807   : > { %v4134_v58 = vpop.permute.xlu1 %4133 }
 0x808   : > { %3575 = vrot.lane.b32.xlu0 %v3557_v38, %s6213_s27  ;;  %5633 = vmatprep.mubr.msk.bf16.mxu0 %vm457_vm2, %v4134_v58 }
 0x809   : > { %5634 = vmatmul.mubr.msk.bf16.vlgmr.msra.gmra.mrb[64].mxu0 %vm457_vm2, %v8139_v48 }
 0x80a   : > { %5645 = vmatprep.mubr.msk.bf16.mxu0 %vm457_vm2, %v4134_v58 }
 0x80b   : > { %v8146_v34 = vpop.permute.xlu1 %4319 }
 0x80f   : > { %3545 = vrot.lane.b32.xlu1 %v8027_v60, %s6213_s27  ;;  %v3538_v28 = vpop.permute.xlu1 %3537  ;;  %v3555_v60 = vadd.f32 %v3532_v43, %v3515_v9 }
 0x810   : > { %v8151_v2 = vadd.f32 %v3538_v28, %v3518_v4 }
 0x813   : > { %4208 = vrot.lane.b32.xlu1 %v7953_v0, %s6213_s27  ;;  %v3500_v26 = vpop.permute.xlu1 %3499 }
 0x814   : > { %v3519_v61 = vmul.f32 %v3500_v26, %v7625_v23 }
 0x817   : > { %4212 = vrot.lane.b32.xlu1 %v8046_v30, %s6213_s27  ;;  %v3540_v14 = vpop.permute.xlu1 %3539 }
 0x818   : > { %v8158_v35 = vadd.f32 %v3540_v14, %v3519_v61  ;;  %v4114_v14 = vmul.f32 %v8012_v21, %v8075_v25 }
 0x81b   : > { %4426 = vrot.lane.b32.xlu1 %v8084_v13, %s6213_s27 }
 0x81f   : > { %3571 = vrot.lane.b32.xlu1 %v3555_v60, %s6213_s27 }
 0x827   : > { %v8164_v33 = vpop.f32.mrb[56].mxu1 }
 0x828   : > { %v8166_v0 = vpop.f32.mrb[57].mxu1 }
 0x829   : > { %v8168_v31 = vpop.f32.mrb[58].mxu1 }
 0x82a   : > { %v8170_v54 = vpop.f32.mrb[59].mxu1 }
 0x839   : > { %v3833_v30 = vpop.xlane.xlu0 %3832 }
 0x83a   : > { %v3845_v24 = vsel %vm6931_vm13, %v3833_v30, 0.0 }
 0x83d   : > { %v8174_v42 = vpop.permute.xlu0 %3503 }
 0x842   : > { %4408 = vxpose.xlu1.c.b16.start [1/2] (short) (narrow) %v8146_v34, 64 }
 0x846   : > { %4409 = vxpose.xlu1.c.b16.end [2/2] (short) (narrow) %v8118_v20, 64 }
 0x856   : > { %v3830_v13 = vpop.xlane.xlu1 %3829 }
 0x857   : > { %v3844_v44 = vsel %vm6900_vm8, %v3830_v13, 0.0  ;;  %v4112_v13 = vmul.f32 %v7982_v36, %v8075_v25 }
 0x869   : > { %v8176_v50 = vpop.f32.mrb[52].mxu0 }
 0x86a   : > { %v3813_v5 = vpop.f32.mrb[53].mxu0 }
 0x86b   : > { %v3840_v53 = vsel %vm6907_vm9, %v3813_v5, 0.0  ;;  %v5596_v45 = vpop.f32.mrb[54].mxu0 }
 0x86c   : > { %v3816_v49 = vpop.f32.mrb[55].mxu0  ;;  %v3848_v29 = vadd.f32 %v3844_v44, %v3840_v53  ;;  %v3506_v53 = vpop.permute.xlu1 %3505  ;;  %v3843_v36 = vsel %vm6913_vm10, %v5596_v45, 0.0  ;;  %v3842_v44 = vsel %vm6887_vm6, %v8176_v50, 0.0 }
 0x86d   : > { %v3841_v41 = vsel %vm6925_vm12, %v3816_v49, 0.0 }
 0x86e   : > { %v3849_v7 = vadd.f32 %v3845_v24, %v3841_v41  ;;  %v3839_v18 = vpop.xlane.xlu0 %3838 }
 0x86f   : > { %v3847_v49 = vsel %vm6919_vm11, %v3839_v18, 0.0 }
 0x870   : > { %v3860_v55 = vpack.c.bf16 %v3849_v7, %v3848_v29  ;;  %v3851_v41 = vadd.f32 %v3847_v49, %v3843_v36 }
 0x871   : > { %v5623_v19 = vpop.f32.mrb[56].mxu0 }
 0x872   : > { %v4117_v56 = vadd.f32 %v5623_v19, %v4109_v32  ;;  %5613 = vmatprep.mubr.msk.bf16.mxu1 %vm518_vm0, %v3860_v55  ;;  %v4076_v46 = vpop.f32.mrb[57].mxu0  ;;  %v8191_v3 = vpop.permute.xlu0 %3543 }
 0x873   : > { %v4115_v39 = vadd.f32 %v4107_v17, %v4076_v46  ;;  %v5624_v43 = vpop.f32.mrb[58].mxu0 }
 0x874   : > { %4125 = vst.msk [vmem:[#allocation2 + $0x10] sm:$0xff] %vm457_vm2, %v4117_v56  ;;  %v4118_v15 = vadd.f32 %v5624_v43, %v4110_v6  ;;  %v4079_v37 = vpop.f32.mrb[59].mxu0  ;;  %v3521_v43 = vmul.f32 %v8174_v42, %v7625_v23 }
 0x875   : > { %4123 = vst.msk [vmem:[#allocation2] sm:$0xff] %vm457_vm2, %v4115_v39  ;;  %v4116_v27 = vadd.f32 %v4108_v52, %v4079_v37 }
 0x876   : > { %4126 = vst.msk [vmem:[#allocation2 + $0x18] sm:$0xff] %vm457_vm2, %v4118_v15  ;;  %v4211_v38 = vpop.permute.xlu0 %4210  ;;  %v3561_v15 = vadd.f32 %v8191_v3, %v3521_v43 }
 0x877   : > { %4124 = vst.msk [vmem:[#allocation2 + $0x8] sm:$0xff] %vm457_vm2, %v4116_v27  ;;  %v4223_v58 = vsel %vm457_vm2, %v4211_v38, 0.0 }
 0x878   : > { %4224 = vadd.xlane.f32.xlu1 %v4223_v58 }
 0x879   : > { %v5627_v4 = vpop.f32.mrb[60].mxu0 }
 0x87a   : > { %v4121_v28 = vadd.f32 %v5627_v4, %v4113_v57  ;;  %v4092_v26 = vpop.f32.mrb[61].mxu0  ;;  %v4215_v61 = vpop.permute.xlu0 %4214 }
 0x87b   : > { %v4119_v9 = vadd.f32 %v4111_v62, %v4092_v26  ;;  %v4229_v60 = vsel %vm457_vm2, %v4215_v61, 0.0  ;;  %v5628_v30 = vpop.f32.mrb[62].mxu0 }
 0x87c   : > { %4129 = vst.msk [vmem:[#allocation2 + $0x30] sm:$0xff] %vm457_vm2, %v4121_v28  ;;  %v4122_v51 = vadd.f32 %v5628_v30, %v4114_v14  ;;  %v4095_v5 = vpop.f32.mrb[63].mxu0  ;;  %4230 = vadd.xlane.f32.xlu1 %v4229_v60 }
 0x87d   : > { %4127 = vst.msk [vmem:[#allocation2 + $0x20] sm:$0xff] %vm457_vm2, %v4119_v9  ;;  %v4120_v16 = vadd.f32 %v4112_v13, %v4095_v5 }
 0x87e   : > { %4130 = vst.msk [vmem:[#allocation2 + $0x38] sm:$0xff] %vm457_vm2, %v4122_v51  ;;  %v4429_v24 = vpop.permute.xlu0 %4428 }
 0x87f   : > { %4128 = vst.msk [vmem:[#allocation2 + $0x28] sm:$0xff] %vm457_vm2, %v4120_v16 }
 0x882   : > { %v3576_v21 = vpop.permute.xlu0 %3575 }
 0x883   : > { %3597 = vst.msk [vmem:[#allocation2 + $0x50] sm:$0xff] %vm457_vm2, %v3576_v21 }
 0x88a   : > { %v8225_v55 = vld [vmem:[#allocation2 + $0x50] sm:$0xff] }
 0x88b   : > { %v3836_v29 = vpop.xlane.xlu1 %3835 }
 0x88c   : > { %v3846_v7 = vsel %vm6893_vm7, %v3836_v29, 0.0 }
 0x88d   : > { %v3850_v32 = vadd.f32 %v3846_v7, %v3842_v44  ;;  %4521 = vrot.lane.b32.xlu1 %v8225_v55, %s6213_s27 }
 0x88f   : > { %v3861_v19 = vpack.c.bf16 %v3851_v41, %v3850_v32  ;;  %v3546_v45 = vpop.permute.xlu1 %3545 }
 0x891   : > { %5614 = vmatmul.mubr.msk.bf16.vlgmr.msra.gmra.mrb[60].mxu1 %vm518_vm0, %v3861_v19 }
 0x893   : > { %v4209_v18 = vpop.permute.xlu1 %4208 }
 0x894   : > { %v4220_v17 = vsel %vm457_vm2, %v4209_v18, 0.0 }
 0x895   : > { %4221 = vadd.xlane.f32.xlu0 %v4220_v17 }
 0x897   : > { %v4213_v50 = vpop.permute.xlu1 %4212 }
 0x89b   : > { %v4427_v56 = vpop.permute.xlu1 %4426 }
 0x89c   : > { %5657 = vmatprep.subr.bf16.mxu1 %v4427_v56 }
 0x89d   : > { %5658 = vmatpush3.bf16.msra.mxu1 %v4427_v56 }
 0x89e   : > { %5659 = vmatprep.subr.bf16.mxu1 %v4429_v24 }
 0x89f   : > { %v3572_v46 = vpop.permute.xlu1 %3571 }
 0x8a0   : > { %3595 = vst.msk [vmem:[#allocation2 + $0x40] sm:$0xff] %vm457_vm2, %v3572_v46 }
 0x8a1   : > { %5660 = vmatpush3.bf16.msra.mxu1 %v4429_v24 }
 0x8a7   : > { %v4244_v57 = vld [vmem:[#allocation2 + $0x40] sm:$0xff] }
 0x8a8   : > { %v4416_v6 = vpop.trf.xlu1 }
 0x8a9   : > { %5661 = vmatprep.mubr.msk.bf16.mxu1 %vm518_vm0, %v4416_v6 }
 0x8ab   : > { %3577 = vrot.lane.b32.xlu0 %v8151_v2, %s6213_s27  ;;  %v3522_v2 = vmul.f32 %v3506_v53, %v7625_v23 }
 0x8ac   : > { %v4417_v39 = vpop.trf.xlu1 }
 0x8ad   : > { %5662 = vmatmul.mubr.msk.bf16.vlgmr.msra.gmra.mrb[64].mxu1 %vm518_vm0, %v4417_v39  ;;  %v3562_v27 = vadd.f32 %v3546_v45, %v3522_v2 }
 0x8af   : > { %3573 = vrot.lane.b32.xlu0 %v8132_v40, %s6213_s27  ;;  %v4226_v40 = vsel %vm457_vm2, %v4213_v50, 0.0 }
 0x8b0   : > { %v4418_v52 = vpop.trf.xlu1 }
 0x8b1   : > { %5665 = vmatprep.mubr.msk.bf16.mxu1 %vm518_vm0, %v4418_v52 }
 0x8b3   : > { %3583 = vrot.lane.b32.xlu0 %v3561_v15, %s6213_s27 }
 0x8b4   : > { %v4419_v37 = vpop.trf.xlu1 }
 0x8b5   : > { %5666 = vmatmul.mubr.msk.bf16.gmra.mrb[68].mxu1 %vm518_vm0, %v4419_v37 }
 0x8b7   : > { %3579 = vrot.lane.b32.xlu0 %v8158_v35, %s6213_s27 }
 0x8bb   : > { %3585 = vrot.lane.b32.xlu0 %v3562_v27, %s6213_s27 }
 0x8bf   : > { %3581 = vrot.lane.b32.xlu0 %v8121_v22, %s6213_s27 }
 0x8dc   : > { %v8251_v42 = vpop.f32.mrb[64].mxu0 }
 0x8dd   : > { %v4189_v3 = vpop.f32.mrb[65].mxu0  ;;  %v4234_v6 = vsel %vm6887_vm6, %v8251_v42, 0.0  ;;  %v8615_v42 = vld [vmem:[#allocation28_spill] sm:$0xff] }
 0x8de   : > { %4227 = vadd.xlane.f32.xlu0 %v4226_v40  ;;  %v8253_v38 = vpop.f32.mrb[66].mxu0  ;;  %v4232_v62 = vsel %vm6907_vm9, %v4189_v3, 0.0  ;;  %v4994_v3 = vpack.c.bf16 %v8615_v42, %v8615_v42 }
 0x8df   : > { %v4192_v58 = vpop.f32.mrb[67].mxu0 }
 0x8e0   : > { %v4233_v4 = vsel %vm6925_vm12, %v4192_v58, 0.0 }
 0x8f4   : > { %4517 = vrot.lane.b32.xlu0 %v4244_v57, %s6213_s27 }
 0x905   : > { %v4225_v23 = vpop.xlane.xlu1 %4224 }
 0x906   : > { %v4237_v35 = vsel %vm6931_vm13, %v4225_v23, 0.0 }
 0x907   : > { %v4241_v26 = vadd.f32 %v4237_v35, %v4233_v4  ;;  %v8618_v35 = vld [vmem:[#allocation29_spill] sm:$0xff] }
 0x908   : > { %v4997_v4 = vpack.c.bf16 %v8618_v35, %v8618_v35 }
 0x922   : > { %v4222_v22 = vpop.xlane.xlu0 %4221 }
 0x923   : > { %v4236_v28 = vsel %vm6900_vm8, %v4222_v22, 0.0  ;;  %v8619_v22 = vld [vmem:[#allocation32_spill] sm:$0xff] }
 0x924   : > { %v4240_v61 = vadd.f32 %v4236_v28, %v4232_v62  ;;  %v5002_v62 = vpack.c.bf16 %v8619_v22, %v8619_v22  ;;  %v8620_v28 = vld [vmem:[#allocation34_spill] sm:$0xff] }
 0x926   : > { %v4252_v14 = vpack.c.bf16 %v4241_v26, %v4240_v61  ;;  %v3578_v9 = vpop.permute.xlu0 %3577  ;;  %v5003_v26 = vpack.c.bf16 %v8620_v28, %v8620_v28  ;;  %v8621_v61 = vld [vmem:[#allocation31_spill] sm:$0xff] }
 0x927   : > { %3598 = vst.msk [vmem:[#allocation2 + $0x58] sm:$0xff] %vm457_vm2, %v3578_v9  ;;  %v8622_v9 = vld [vmem:[#allocation33_spill] sm:$0xff] }
 0x92a   : > { %v3574_v60 = vpop.permute.xlu0 %3573 }
 0x92b   : > { %3596 = vst.msk [vmem:[#allocation2 + $0x48] sm:$0xff] %vm457_vm2, %v3574_v60  ;;  %v5005_v60 = vpack.c.bf16 %v8622_v9, %v8622_v9 }
 0x92e   : > { %v3584_v11 = vpop.permute.xlu0 %3583  ;;  %v4247_v30 = vld [vmem:[#allocation2 + $0x58] sm:$0xff] }
 0x92f   : > { %3601 = vst.msk [vmem:[#allocation2 + $0x70] sm:$0xff] %vm457_vm2, %v3584_v11  ;;  %4523 = vrot.lane.b32.xlu0 %v4247_v30, %s6213_s27  ;;  %v4255_v13 = vpack.c.bf16 %v4247_v30, %v8225_v55  ;;  %v5010_v11 = vpack.c.bf16 %v8166_v0, %v8166_v0  ;;  %v5011_v30 = vpack.c.bf16 %v8170_v54, %v8170_v54 }
 0x931   : > { %v4262_v53 = vsel %vm457_vm2, %v4255_v13, 0 }
 0x932   : > { %v3580_v10 = vpop.permute.xlu0 %3579  ;;  %v4245_v1 = vld [vmem:[#allocation2 + $0x48] sm:$0xff] }
 0x933   : > { %3599 = vst.msk [vmem:[#allocation2 + $0x60] sm:$0xff] %vm457_vm2, %v3580_v10  ;;  %4519 = vrot.lane.b32.xlu1 %v4245_v1, %s6213_s27  ;;  %v4254_v63 = vpack.c.bf16 %v4245_v1, %v4244_v57  ;;  %v8617_v57 = vld [vmem:[#allocation27_spill] sm:$0xff]  ;;  %v5012_v10 = vpack.c.bf16 %v8164_v33, %v8164_v33  ;;  %v5013_v1 = vpack.c.bf16 %v8168_v31, %v8168_v31 }
 0x934   : > { %v4996_v23 = vpack.c.bf16 %v8617_v57, %v8617_v57 }
 0x935   : > { %5777 = vmatprep.subr.msk.bf16.mxu0 %vm457_vm2, %v4254_v63  ;;  %v4259_v51 = vsel %vm457_vm2, %v4254_v63, 0 }
 0x936   : > { %v3586_v5 = vpop.permute.xlu0 %3585  ;;  %5638 = vmatpush3.bf16.xpose.msra.mxu0 %v4259_v51  ;;  %v4250_v16 = vld [vmem:[#allocation2 + $0x70] sm:$0xff] }
 0x937   : > { %3602 = vst.msk [vmem:[#allocation2 + $0x78] sm:$0xff] %vm457_vm2, %v3586_v5  ;;  %4529 = vrot.lane.b32.xlu1 %v4250_v16, %s6213_s27  ;;  %5778 = vmatprep.subr.msk.bf16.mxu0 %vm457_vm2, %v4255_v13 }
 0x93a   : > { %v3582_v24 = vpop.permute.xlu0 %3581  ;;  %v4248_v21 = vld [vmem:[#allocation2 + $0x60] sm:$0xff] }
 0x93b   : > { %3600 = vst.msk [vmem:[#allocation2 + $0x68] sm:$0xff] %vm457_vm2, %v3582_v24  ;;  %4525 = vrot.lane.b32.xlu1 %v4248_v21, %s6213_s27 }
 0x93e   : > { %5640 = vmatpush3.bf16.xpose.msra.mxu0 %v4262_v53  ;;  %v4251_v36 = vld [vmem:[#allocation2 + $0x78] sm:$0xff] }
 0x93f   : > { %4531 = vrot.lane.b32.xlu0 %v4251_v36, %s6213_s27  ;;  %v4257_v41 = vpack.c.bf16 %v4251_v36, %v4250_v16 }
 0x941   : > { %v4268_v7 = vsel %vm457_vm2, %v4257_v41, 0 }
 0x942   : > { %v4249_v49 = vld [vmem:[#allocation2 + $0x68] sm:$0xff] }
 0x943   : > { %4527 = vrot.lane.b32.xlu0 %v4249_v49, %s6213_s27  ;;  %v4256_v44 = vpack.c.bf16 %v4249_v49, %v4248_v21 }
 0x945   : > { %5779 = vmatprep.subr.msk.bf16.mxu0 %vm457_vm2, %v4256_v44  ;;  %v4265_v29 = vsel %vm457_vm2, %v4256_v44, 0 }
 0x946   : > { %5642 = vmatpush3.bf16.xpose.msra.mxu0 %v4265_v29 }
 0x947   : > { %5780 = vmatprep.subr.msk.bf16.mxu0 %vm457_vm2, %v4257_v41 }
 0x94e   : > { %5644 = vmatpush3.bf16.xpose.msra.mxu0 %v4268_v7 }
 0x94f   : > { %5649 = vmatprep.subr.bf16.mxu0 %v8146_v34 }
 0x955   : > { %5646 = vmatmul.mubr.msk.bf16.vlgmr.msra.gmra.mrb[68].mxu0 %vm457_vm2, %v8139_v48 }
 0x956   : > { %5650 = vmatpush3.bf16.msra.mxu0 %v8146_v34  ;;  %5653 = vmatprep.mubr.msk.bf16.mxu0 %vm518_vm0, %v4252_v14  ;;  %v4231_v34 = vpop.xlane.xlu1 %4230  ;;  %v5004_v14 = vpack.c.bf16 %v8621_v61, %v8621_v61 }
 0x957   : > { %5651 = vmatprep.subr.bf16.mxu0 %v8118_v20  ;;  %v4239_v56 = vsel %vm6919_vm11, %v4231_v34, 0.0 }
 0x95a   : > { %5652 = vmatpush3.bf16.msra.mxu0 %v8118_v20  ;;  %v4235_v20 = vsel %vm6913_vm10, %v8253_v38, 0.0  ;;  %v8616_v38 = vld [vmem:[#allocation30_spill] sm:$0xff]  ;;  %v4522_v0 = vpop.permute.xlu1 %4521 }
 0x95b   : > { %v4243_v43 = vadd.f32 %v4239_v56, %v4235_v20  ;;  %v4995_v58 = vpack.c.bf16 %v8616_v38, %v8616_v38  ;;  %v4543_v57 = vmul.f32 %v4522_v0, %v8075_v25 }
 0x964   : > { %v5615_v55 = vpop.f32.mrb[60].mxu1 }
 0x965   : > { %v5016_v32 = vpack.c.bf16 %v5615_v55, %v5615_v55  ;;  %v3979_v19 = vpop.f32.mrb[61].mxu1 }
 0x966   : > { %v5014_v45 = vpack.c.bf16 %v3979_v19, %v3979_v19  ;;  %v5616_v18 = vpop.f32.mrb[62].mxu1 }
 0x967   : > { %4012 = vst.msk [vmem:[%s7135_s15 + $0x38] sm:$0xf] %vm929_vm14, %v5016_v32  ;;  %v5017_v17 = vpack.c.bf16 %v5616_v18, %v5616_v18  ;;  %v3982_v50 = vpop.f32.mrb[63].mxu1 }
 0x968   : > { %4010 = vst.msk [vmem:[%s7135_s15 + $0x30] sm:$0xf] %vm929_vm14, %v5014_v45  ;;  %v5015_v48 = vpack.c.bf16 %v3982_v50, %v3982_v50 }
 0x969   : > { %4013 = vst.msk [vmem:[%s7135_s15 + $0x3c] sm:$0xf] %vm929_vm14, %v5017_v17 }
 0x96a   : > { %4011 = vst.msk [vmem:[%s7135_s15 + $0x34] sm:$0xf] %vm929_vm14, %v5015_v48 }
 0x96b   : > { %v4228_v46 = vpop.xlane.xlu0 %4227 }
 0x96c   : > { %v4238_v39 = vsel %vm6893_vm7, %v4228_v46, 0.0 }
 0x96d   : > { %v4242_v52 = vadd.f32 %v4238_v39, %v4234_v6 }
 0x96f   : > { %v4253_v15 = vpack.c.bf16 %v4243_v43, %v4242_v52  ;;  %v4518_v63 = vpop.permute.xlu0 %4517 }
 0x970   : > { %v4541_v36 = vmul.f32 %v4518_v63, %v8075_v25 }
 0x971   : > { %5654 = vmatmul.mubr.msk.bf16.vlgmr.msra.gmra.mrb[68].mxu0 %vm518_vm0, %v4253_v15 }
 0x980   : > { %v5663_v47 = vpop.f32.mrb[64].mxu1 }
 0x981   : > { %4561 = vrot.lane.b32.xlu1 %v5663_v47, %s6213_s27  ;;  %v4478_v12 = vpop.f32.mrb[65].mxu1 }
 0x982   : > { %v5664_v37 = vpop.f32.mrb[66].mxu1 }
 0x983   : > { %4563 = vrot.lane.b32.xlu0 %v5664_v37, %s6213_s27  ;;  %v4481_v2 = vpop.f32.mrb[67].mxu1 }
 0x985   : > { %4557 = vrot.lane.b32.xlu1 %v4478_v12, %s6213_s27 }
 0x987   : > { %4559 = vrot.lane.b32.xlu0 %v4481_v2, %s6213_s27 }
 0x988   : > { %v5667_v59 = vpop.f32.mrb[68].mxu1 }
 0x989   : > { %v4494_v8 = vpop.f32.mrb[69].mxu1 }
 0x98a   : > { %4565 = vrot.lane.b32.xlu1 %v4494_v8, %s6213_s27  ;;  %v5668_v27 = vpop.f32.mrb[70].mxu1 }
 0x98b   : > { %v4497_v40 = vpop.f32.mrb[71].mxu1 }
 0x98c   : > { %4567 = vrot.lane.b32.xlu0 %v4497_v40, %s6213_s27 }
 0x98e   : > { %4569 = vrot.lane.b32.xlu1 %v5667_v59, %s6213_s27 }
 0x990   : > { %4571 = vrot.lane.b32.xlu0 %v5668_v27, %s6213_s27 }
 0x992   : > { %1313 = vrot.lane.b32.xlu1 %v4994_v3, %s6213_s27 }
 0x994   : > { %1315 = vrot.lane.b32.xlu0 %v4995_v58, %s6213_s27 }
 0x996   : > { %1317 = vrot.lane.b32.xlu1 %v4996_v23, %s6213_s27 }
 0x998   : > { %1319 = vrot.lane.b32.xlu0 %v4997_v4, %s6213_s27 }
 0x99a   : > { %2340 = vrot.lane.b32.xlu1 %v5002_v62, %s6213_s27 }
 0x99c   : > { %2342 = vrot.lane.b32.xlu0 %v5003_v26, %s6213_s27 }
 0x99e   : > { %2344 = vrot.lane.b32.xlu1 %v5004_v14, %s6213_s27 }
 0x9a0   : > { %2346 = vrot.lane.b32.xlu0 %v5005_v60, %s6213_s27 }
 0x9a1   : > { %v4524_v51 = vpop.permute.xlu0 %4523 }
 0x9a2   : > { %3366 = vrot.lane.b32.xlu1 %v5010_v11, %s6213_s27  ;;  %v4544_v33 = vmul.f32 %v4524_v51, %v8075_v25 }
 0x9a4   : > { %3368 = vrot.lane.b32.xlu0 %v5011_v30, %s6213_s27 }
 0x9a5   : > { %v4520_v13 = vpop.permute.xlu1 %4519 }
 0x9a6   : > { %3370 = vrot.lane.b32.xlu1 %v5012_v10, %s6213_s27  ;;  %v4542_v44 = vmul.f32 %v4520_v13, %v8075_v25 }
 0x9a8   : > { %3372 = vrot.lane.b32.xlu0 %v5013_v1, %s6213_s27 }
 0x9a9   : > { %v4530_v5 = vpop.permute.xlu1 %4529 }
 0x9aa   : > { %v4547_v45 = vmul.f32 %v4530_v5, %v8075_v25 }
 0x9ad   : > { %v8355_v16 = vpop.permute.xlu1 %4525 }
 0x9ae   : > { %v4545_v4 = vmul.f32 %v8355_v16, %v8075_v25 }
 0x9b1   : > { %v4532_v54 = vpop.permute.xlu0 %4531 }
 0x9b2   : > { %v4548_v50 = vmul.f32 %v4532_v54, %v8075_v25 }
 0x9b5   : > { %v4528_v24 = vpop.permute.xlu0 %4527 }
 0x9b6   : > { %v4546_v32 = vmul.f32 %v4528_v24, %v8075_v25 }
 0x9f3   : > { %v4562_v21 = vpop.permute.xlu1 %4561 }
 0x9f4   : > { %v4583_v35 = vadd.f32 %v4562_v21, %v4543_v57 }
 0x9f5   : > { %v4564_v53 = vpop.permute.xlu0 %4563 }
 0x9f6   : > { %v4584_v31 = vadd.f32 %v4564_v53, %v4544_v33 }
 0x9f7   : > { %v4558_v49 = vpop.permute.xlu1 %4557 }
 0x9f8   : > { %v4581_v41 = vadd.f32 %v4558_v49, %v4541_v36 }
 0x9f9   : > { %v4560_v29 = vpop.permute.xlu0 %4559 }
 0x9fa   : > { %v4582_v7 = vadd.f32 %v4560_v29, %v4542_v44 }
 0x9fc   : > { %v4566_v55 = vpop.permute.xlu1 %4565 }
 0x9fd   : > { %v4585_v22 = vadd.f32 %v4566_v55, %v4545_v4 }
 0x9fe   : > { %v4568_v19 = vpop.permute.xlu0 %4567 }
 0x9ff   : > { %v4586_v18 = vadd.f32 %v4568_v19, %v4546_v32 }
 0xa00   : > { %v4570_v17 = vpop.permute.xlu1 %4569 }
 0xa01   : > { %v4587_v48 = vadd.f32 %v4570_v17, %v4547_v45 }
 0xa02   : > { %v4572_v34 = vpop.permute.xlu0 %4571 }
 0xa03   : > { %v4588_v56 = vadd.f32 %v4572_v34, %v4548_v50 }
 0xa04   : > { %v1314_v20 = vpop.permute.xlu1 %1313 }
 0xa05   : > { %1326 = vst.msk [vmem:[%s7135_s15] sm:$0xf] %vm1325_vm15, %v1314_v20 }
 0xa06   : > { %v1316_v46 = vpop.permute.xlu0 %1315 }
 0xa07   : > { %1327 = vst.msk [vmem:[%s7135_s15 + $0x4] sm:$0xf] %vm1325_vm15, %v1316_v46 }
 0xa08   : > { %v1318_v6 = vpop.permute.xlu1 %1317 }
 0xa09   : > { %1328 = vst.msk [vmem:[%s7135_s15 + $0x8] sm:$0xf] %vm1325_vm15, %v1318_v6 }
 0xa0a   : > { %v1320_v39 = vpop.permute.xlu0 %1319 }
 0xa0b   : > { %1329 = vst.msk [vmem:[%s7135_s15 + $0xc] sm:$0xf] %vm1325_vm15, %v1320_v39 }
 0xa0c   : > { %v2341_v43 = vpop.permute.xlu1 %2340 }
 0xa0d   : > { %2352 = vst.msk [vmem:[%s7135_s15 + $0x10] sm:$0xf] %vm1325_vm15, %v2341_v43 }
 0xa0e   : > { %v2343_v52 = vpop.permute.xlu0 %2342 }
 0xa0f   : > { %2353 = vst.msk [vmem:[%s7135_s15 + $0x14] sm:$0xf] %vm1325_vm15, %v2343_v52 }
 0xa10   : > { %v2345_v15 = vpop.permute.xlu1 %2344 }
 0xa11   : > { %2354 = vst.msk [vmem:[%s7135_s15 + $0x18] sm:$0xf] %vm1325_vm15, %v2345_v15 }
 0xa12   : > { %v2347_v47 = vpop.permute.xlu0 %2346 }
 0xa13   : > { %2355 = vst.msk [vmem:[%s7135_s15 + $0x1c] sm:$0xf] %vm1325_vm15, %v2347_v47 }
 0xa14   : > { %v3367_v12 = vpop.permute.xlu1 %3366 }
 0xa15   : > { %3378 = vst.msk [vmem:[%s7135_s15 + $0x20] sm:$0xf] %vm1325_vm15, %v3367_v12 }
 0xa16   : > { %v3369_v37 = vpop.permute.xlu0 %3368 }
 0xa17   : > { %3379 = vst.msk [vmem:[%s7135_s15 + $0x24] sm:$0xf] %vm1325_vm15, %v3369_v37 }
 0xa18   : > { %v3371_v2 = vpop.permute.xlu1 %3370 }
 0xa19   : > { %3380 = vst.msk [vmem:[%s7135_s15 + $0x28] sm:$0xf] %vm1325_vm15, %v3371_v2 }
 0xa1a   : > { %v3373_v59 = vpop.permute.xlu0 %3372 }
 0xa1b   : > { %3381 = vst.msk [vmem:[%s7135_s15 + $0x2c] sm:$0xf] %vm1325_vm15, %v3373_v59 }
 0xa44   : > { %v5655_v8 = vpop.f32.mrb[68].mxu0 }
 0xa45   : > { %v5020_v27 = vpack.c.bf16 %v5655_v8, %v5655_v8  ;;  %v4365_v40 = vpop.f32.mrb[69].mxu0 }
 0xa46   : > { %v5656_v42 = vpop.f32.mrb[70].mxu0  ;;  %v5018_v58 = vpack.c.bf16 %v4365_v40, %v4365_v40 }
 0xa47   : > { %v5021_v3 = vpack.c.bf16 %v5656_v42, %v5656_v42  ;;  %v4368_v38 = vpop.f32.mrb[71].mxu0  ;;  %4396 = vrot.lane.b32.xlu1 %v5020_v27, %s6213_s27 }
 0xa48   : > { %v5019_v23 = vpack.c.bf16 %v4368_v38, %v4368_v38 }
 0xa49   : > { %4398 = vrot.lane.b32.xlu0 %v5021_v3, %s6213_s27 }
 0xa4b   : > { %4392 = vrot.lane.b32.xlu1 %v5018_v58, %s6213_s27 }
 0xa4d   : > { %4394 = vrot.lane.b32.xlu0 %v5019_v23, %s6213_s27 }
 0xa4f   : > { %4601 = vrot.lane.b32.xlu1 %v4583_v35, %s6213_s27 }
 0xa51   : > { %4603 = vrot.lane.b32.xlu0 %v4584_v31, %s6213_s27 }
 0xa53   : > { %4597 = vrot.lane.b32.xlu1 %v4581_v41, %s6213_s27 }
 0xa55   : > { %4599 = vrot.lane.b32.xlu0 %v4582_v7, %s6213_s27 }
 0xa57   : > { %4605 = vrot.lane.b32.xlu1 %v4585_v22, %s6213_s27 }
 0xa59   : > { %4607 = vrot.lane.b32.xlu0 %v4586_v18, %s6213_s27 }
 0xa5b   : > { %4609 = vrot.lane.b32.xlu1 %v4587_v48, %s6213_s27 }
 0xa5d   : > { %4611 = vrot.lane.b32.xlu0 %v4588_v56, %s6213_s27 }
 0xab9   : > { %v4397_v62 = vpop.permute.xlu1 %4396 }
 0xaba   : > { %4406 = vst.msk [vmem:[%s7135_s15 + $0x38] sm:$0xf] %vm1325_vm15, %v4397_v62 }
 0xabb   : > { %v4399_v25 = vpop.permute.xlu0 %4398 }
 0xabc   : > { %4407 = vst.msk [vmem:[%s7135_s15 + $0x3c] sm:$0xf] %vm1325_vm15, %v4399_v25 }
 0xabd   : > { %v4393_v28 = vpop.permute.xlu1 %4392 }
 0xabe   : > { %4404 = vst.msk [vmem:[%s7135_s15 + $0x30] sm:$0xf] %vm1325_vm15, %v4393_v28 }
 0xabf   : > { %v4395_v26 = vpop.permute.xlu0 %4394 }
 0xac0   : > { %4405 = vst.msk [vmem:[%s7135_s15 + $0x34] sm:$0xf] %vm1325_vm15, %v4395_v26 }
 0xac1   : > { %v4602_v61 = vpop.permute.xlu1 %4601 }
 0xac2   : > { %6120 = shalt.err (!%p6117_p1)
}
 0xac3   : > { %s6121_s16 = scalar_lea.hbm %s8411_s13, 1024  ;;  %s6125_s5 = scalar_lea.hbm %s8623_s1, 2048 }
 0xac4   : > { %p6122_p6 = scmp.ne.s32.totalorder %s8411_s13, %s6121_s16  ;;  %p6126_p4 = scmp.lt.u32.totalorder %s8411_s13, %s8623_s1 }
 0xac5   : > { %p6127_p8 = scmp.lt.u32.totalorder %s6125_s5, %s6121_s16  ;;  %p6129_p13 = scmp.lt.u32.totalorder %s6121_s16, %s8411_s13 }
 0xac6   : > { %p6123_p2 = pnand %p6122_p6, %p8624_p3 }
 0xac7   : > { %p6128_p10 = por %p6127_p8, %p6126_p4 }
 0xac8   : > { %p6124_p0 = pneg %p6123_p2 }
 0xac9   : > { %p6130_p11 = por %p6129_p13, %p6128_p10 }
 0xacb   : > { %p6131_p5 = pnand %p6130_p11, %p6124_p0 }
 0xacd   : > { %6134 = shalt.err (!%p6131_p5)
}
 0xace   : > { %s6215_s15 = smov 4   ;;  %4623 = vst.msk [vmem:[#allocation2 + $0x50] sm:$0xff] %vm457_vm2, %v4602_v61  ;;  %v4604_v14 = vpop.permute.xlu0 %4603  ;;  %v4598_v9 = vpop.permute.xlu1 %4597 }
 0xacf   : > { %5793 = dma.vmem_to_hbm [thread:$0]  (%p8624_p3), %s8415_s0, 1024, %s8411_s13, %s4630_s24, %s6213_s27, %s6213_s27, %s6215_s15   ;;  %4624 = vst.msk [vmem:[#allocation2 + $0x58] sm:$0xff] %vm457_vm2, %v4604_v14  ;;  %4621 = vst.msk [vmem:[#allocation2 + $0x40] sm:$0xff] %vm457_vm2, %v4598_v9 }
 0xad2   : > { %v4600_v60 = vpop.permute.xlu0 %4599  ;;  %v4606_v11 = vpop.permute.xlu1 %4605 }
 0xad3   : > { %4622 = vst.msk [vmem:[#allocation2 + $0x48] sm:$0xff] %vm457_vm2, %v4600_v60  ;;  %4625 = vst.msk [vmem:[#allocation2 + $0x60] sm:$0xff] %vm457_vm2, %v4606_v11 }
 0xad6   : > { %v4608_v30 = vpop.permute.xlu0 %4607  ;;  %v4610_v10 = vpop.permute.xlu1 %4609 }
 0xad7   : > { %4626 = vst.msk [vmem:[#allocation2 + $0x68] sm:$0xff] %vm457_vm2, %v4608_v30  ;;  %4627 = vst.msk [vmem:[#allocation2 + $0x70] sm:$0xff] %vm457_vm2, %v4610_v10 }
 0xada   : > { %v4612_v1 = vpop.permute.xlu0 %4611 }
 0xadb   : > { %4628 = vst.msk [vmem:[#allocation2 + $0x78] sm:$0xff] %vm457_vm2, %v4612_v1 }
 0xadc PF: > { %s8625_s8 = sld [smem:[#allocation18_spill]]  ;;  %s8626_s12 = sld [smem:[#allocation20_spill]] }
 0xadd   : > { %p8628_p9 = scmp.ge.s32.totalorder %s6201_s26, 2 }
 0xae2   : > { %s4660_s27 = sand.u32 1, %s8625_s8   ;;  %p8627_p3 = scmp.ne.s32.totalorder %s8626_s12, 0 }
 0xae3   : > { %s4661_s28 = scalar_lea.sflag [#allocation5], %s4660_s27 }
 0xae4   : > { %p5813_p12 = pnand %p8628_p9, %p8627_p3 }
 0xae6   : > { %6176 = dma.done.wait (!%p5813_p12), %s4661_s28, 1024  }
 0xae7   : > { %6178 = vsyncadd (!%p5813_p12), %s4661_s28, 4294966272  ;;  %s28_s26 = sadd.s32 1, %s6201_s26   ;;  %s8629_s18 = sld [smem:[#allocation19_spill]] }
 0xae8   : > { %p25_p7 = scmp.ge.s32.totalorder %s28_s26, 4   ;;  %s8630_s23 = sld [smem:[#allocation22_spill]] }
 0xae9   : > { %s8631_s29 = sld [smem:[#allocation21_spill]]  ;;  %s8632_s21 = smov %s6185_s22 }
 0xaea   : > { %s8634_s24 = smov %s6197_s25  ;;  %27 = sbr.rel (!%p25_p7) target bundleno = 15 (0xf), region = 135 }
 0xaed   : > { %s8633_s22 = smov %s8629_s18 }
 0xaef   : > { %s8635_s25 = smov %s8631_s29 }
 0xaf1   :  { %4666 = vsyncpa [#allocation4], 1 }
 0xaf2   :  { %4668 = vsyncpa [#allocation4 + $0x1], 1 }
 0xaf3   :  { %4669 = vsyncpa [#allocation7], 1 }
 0xaf4   :  { %4671 = vsyncpa [#allocation7 + $0x1], 1 }
 0xaf5   :  { %4672 = vsyncpa [#allocation10], 1 }
 0xaf6   :  { %4674 = vsyncpa [#allocation10 + $0x1], 1 }
 0xaf7   :  { %4675 = vsyncpa [#allocation5], 1 }
 0xaf8   :  { %4677 = vsyncpa [#allocation5 + $0x1], 1 }

</bundles_post_ra>
